<compile_context>
chip_gen: v7x
topology: tpu7x:2x2x1
jax: 0.10.0
libtpu: 0.0.40
codegen_flags: <defaults>
</compile_context>

<pallas_src>
import functools
import math

import jax
import jax.numpy as jnp
from jax import lax
from jax.experimental import pallas as pl
from jax.experimental.pallas import tpu as pltpu

BN_EPS = 1e-5       # nn.BatchNorm1d default eps
NORM_EPS = 1e-12    # F.normalize default eps


def _round_up(x, m):
    return ((x + m - 1) // m) * m


def _vmem_limit_bytes():
    """Generation-aware scoped-VMEM limit: 3/4 of physical, capped at 64 MiB.
    v5e/v6e (128 MiB physical) -> 64 MiB; v7x (64 MiB physical) -> 48 MiB."""
    cap = 128 * 1024 * 1024
    try:
        cap = int(pltpu.get_tpu_info().vmem_capacity_bytes)
    except Exception:
        pass
    return min(64 * 1024 * 1024, (cap * 3) // 4)


# ------------------------------------ kernel ------------------------------------

def _fused_kernel(x_ref, w1p_ref, b1p_ref, w2p_ref, b2p_ref, protop_ref,
                  w1c_ref, b1c_ref, w2c_ref, b2c_ref, protoc_ref,
                  lp_ref, zp_ref, lc_ref, zc_ref,
                  *, num_pattern, hid):
    """One batch tile: head_pattern -> argmax over patterns -> all class heads
    (fused first layer) -> per-row gather by argmax.  Weights bf16, accum f32,
    prototype matmuls f32."""
    # ---------------- head_pattern (pattern_idx = 0) ----------------
    x = x_ref[...]                                                         # [TB, din] bf16
    h = jnp.dot(x, w1p_ref[...], preferred_element_type=jnp.float32) + b1p_ref[...]
    h = jnp.maximum(h, 0.0)                                                # Linear + BN(eval, folded) + ReLU
    zp = jnp.dot(h.astype(jnp.bfloat16), w2p_ref[...],
                 preferred_element_type=jnp.float32) + b2p_ref[...]        # [TB, dpad]; pad cols exactly 0
    s = jnp.sum(zp * zp, axis=1, keepdims=True)
    zpn = zp * lax.rsqrt(jnp.maximum(s, NORM_EPS * NORM_EPS))              # F.normalize(dim=1)
    lp = jnp.dot(zpn, protop_ref[...], preferred_element_type=jnp.float32)  # [TB, npat_pad], f32 protos
    lp_ref[...] = lp
    zp_ref[...] = zpn

    # Row-wise argmax over the *real* pattern columns (== logits_pattern.max(1)[1]).
    col = lax.broadcasted_iota(jnp.int32, lp.shape, 1).astype(jnp.float32)
    lp_m = jnp.where(col < num_pattern, lp, -jnp.inf)
    row_max = jnp.max(lp_m, axis=1, keepdims=True)
    first_idx = jnp.where(lp_m == row_max, col, jnp.float32(lp.shape[1]))
    sel = jnp.min(first_idx, axis=1, keepdims=True)                        # [TB, 1] first-max index (f32)

    # ---------------- head_class: all patterns, rows gathered by argmax ----------------
    # Fused first layer: one [TB, dpad] x [dpad, P*hid] matmul (per-pattern w1 concatenated).
    hc = jnp.dot(zpn.astype(jnp.bfloat16), w1c_ref[...],
                 preferred_element_type=jnp.float32) + b1c_ref[...]        # [TB, P*hid]
    hc = jnp.maximum(hc, 0.0)

    lc = jnp.zeros(lc_ref.shape, jnp.float32)
    zc = jnp.zeros(zc_ref.shape, jnp.float32)
    for i in range(num_pattern):                                           # static, small unrolled loop
        h_i = hc[:, i * hid:(i + 1) * hid].astype(jnp.bfloat16)            # lane-aligned slice
        z_i = jnp.dot(h_i, w2c_ref[i], preferred_element_type=jnp.float32) + b2c_ref[i]
        s_i = jnp.sum(z_i * z_i, axis=1, keepdims=True)
        zn_i = z_i * lax.rsqrt(jnp.maximum(s_i, NORM_EPS * NORM_EPS))
        lc_i = jnp.dot(zn_i, protoc_ref[i], preferred_element_type=jnp.float32)
        m = (sel == jnp.float32(i)).astype(jnp.float32)                    # [TB, 1] one-hot over patterns
        lc = lc + m * lc_i
        zc = zc + m * zn_i
    lc_ref[...] = lc
    zc_ref[...] = zc


# ----------------------- deterministic parameter construction -----------------------

def _linear_params(key, din, dout):
    """torch nn.Linear init (uniform +-1/sqrt(fan_in)); returned in [din, dout] layout."""
    kw, kb = jax.random.split(key)
    bound = 1.0 / math.sqrt(din)
    w = jax.random.uniform(kw, (dout, din), jnp.float32, -bound, bound)
    b = jax.random.uniform(kb, (dout,), jnp.float32, -bound, bound)
    return w.T, b


def _prototypes(key, dout, nproto):
    bound = 1.0 / math.sqrt(dout)
    w = jax.random.uniform(key, (nproto, dout), jnp.float32, -bound, bound)
    # Prototypes.normalize_prototypes(): row-wise L2 normalize (dim=1)
    w = w / jnp.maximum(jnp.linalg.norm(w, axis=1, keepdims=True), NORM_EPS)
    return w.T                                                             # [dout, nproto]


def _fold_bn_eval(w1, b1):
    """Fold eval-mode BatchNorm1d with fresh stats (mean=0, var=1, gamma=1, beta=0)."""
    scale = 1.0 / math.sqrt(1.0 + BN_EPS)
    return w1 * scale, b1 * scale


def init_multi_pattern_params(key, feat_dim, hidden_dim, mlp_out_dim,
                              num_pattern, num_classes):
    dpad = _round_up(mlp_out_dim, 128)
    npat_pad = _round_up(num_pattern, 128)
    ncls_pad = _round_up(num_classes, 128)
    kp, kc = jax.random.split(key)

    # ---- head_pattern: 1 projector feat_dim -> hid -> mlp_out_dim, prototypes -> num_pattern
    k1, k2, k3 = jax.random.split(kp, 3)
    w1p, b1p = _fold_bn_eval(*_linear_params(k1, feat_dim, hidden_dim))
    w2p, b2p = _linear_params(k2, hidden_dim, mlp_out_dim)
    protop = _prototypes(k3, mlp_out_dim, num_pattern)
    w2p = jnp.pad(w2p, ((0, 0), (0, dpad - mlp_out_dim)))       # exact-zero pad cols -> padded z cols are 0
    b2p = jnp.pad(b2p, (0, dpad - mlp_out_dim))
    protop = jnp.pad(protop, ((0, dpad - mlp_out_dim), (0, npat_pad - num_pattern)))

    # ---- head_class: num_pattern projectors mlp_out_dim -> hid -> mlp_out_dim, protos -> num_classes
    w1c_l, b1c_l, w2c_l, b2c_l, protoc_l = [], [], [], [], []
    for i in range(num_pattern):
        ki = jax.random.fold_in(kc, i)
        k1, k2, k3 = jax.random.split(ki, 3)
        w1, b1 = _fold_bn_eval(*_linear_params(k1, mlp_out_dim, hidden_dim))
        w2, b2 = _linear_params(k2, hidden_dim, mlp_out_dim)
        pr = _prototypes(k3, mlp_out_dim, num_classes)
        w1c_l.append(jnp.pad(w1, ((0, dpad - mlp_out_dim), (0, 0))))   # zero rows for padded z cols
        b1c_l.append(b1)
        w2c_l.append(jnp.pad(w2, ((0, 0), (0, dpad - mlp_out_dim))))
        b2c_l.append(jnp.pad(b2, (0, dpad - mlp_out_dim)))
        protoc_l.append(jnp.pad(pr, ((0, dpad - mlp_out_dim), (0, ncls_pad - num_classes))))

    return {
        "num_pattern": num_pattern,
        "num_classes": num_classes,
        "mlp_out_dim": mlp_out_dim,
        "hidden_dim": hidden_dim,
        "dpad": dpad, "npat_pad": npat_pad, "ncls_pad": ncls_pad,
        # head_pattern: bf16 weight streams, f32 biases, f32 prototypes
        "w1p": w1p.astype(jnp.bfloat16),                              # [feat_dim, hid]
        "b1p": b1p[None, :],                                          # [1, hid]
        "w2p": w2p.astype(jnp.bfloat16),                              # [hid, dpad]
        "b2p": b2p[None, :],                                          # [1, dpad]
        "protop": protop,                                             # [dpad, npat_pad] f32
        # head_class: first layers concatenated lane-dense; layer-2 / protos stacked per pattern
        "w1c": jnp.concatenate(w1c_l, axis=1).astype(jnp.bfloat16),   # [dpad, P*hid]
        "b1c": jnp.concatenate(b1c_l, axis=0)[None, :],               # [1, P*hid]
        "w2c": jnp.stack(w2c_l).astype(jnp.bfloat16),                 # [P, hid, dpad]
        "b2c": jnp.stack(b2c_l)[:, None, :],                          # [P, 1, dpad]
        "protoc": jnp.stack(protoc_l),                                # [P, dpad, ncls_pad] f32
    }


# ----------------------------- forward (single-view path) -----------------------------

def multi_pattern_forward(feats, params):
    """Eval-mode forward_heads of MultiPatternModel on encoder features [B, feat_dim]."""
    B, din = feats.shape
    P = params["num_pattern"]
    hid = params["hidden_dim"]
    dout = params["mlp_out_dim"]
    dpad, npat_pad, ncls_pad = params["dpad"], params["npat_pad"], params["ncls_pad"]

    # Batch tile: multiple of 16 (bf16 sublane packing / MXU row occupancy).
    TB = min(128, _round_up(B, 16))
    B_pad = _round_up(B, TB)
    x = jnp.pad(feats, ((0, B_pad - B), (0, 0))).astype(jnp.bfloat16)   # wrapper-side bf16 cast

    kernel = functools.partial(_fused_kernel, num_pattern=P, hid=hid)
    out_shapes = (
        jax.ShapeDtypeStruct((B_pad, npat_pad), jnp.float32),   # logits_pattern  (padded)
        jax.ShapeDtypeStruct((B_pad, dpad), jnp.float32),       # proj_feats_pattern (padded)
        jax.ShapeDtypeStruct((B_pad, ncls_pad), jnp.float32),   # logits_class    (padded)
        jax.ShapeDtypeStruct((B_pad, dpad), jnp.float32),       # proj_feats_class (padded)
    )

    def build(use_single_buffer):
        if use_single_buffer and hasattr(pl, "Buffered"):
            def resident(shape):  # constant-index blocks: no wasted double buffer
                return pl.BlockSpec(shape, lambda i, _s=shape: (0,) * len(_s),
                                    pipeline_mode=pl.Buffered(1))
        else:
            def resident(shape):
                return pl.BlockSpec(shape, lambda i, _s=shape: (0,) * len(_s))

        in_specs = [
            pl.BlockSpec((TB, din), lambda i: (i, 0)),          # streamed batch tile (double-buffered)
            resident((din, hid)),                               # w1p (BN folded), bf16
            resident((1, hid)),                                 # b1p
            resident((hid, dpad)),                              # w2p, bf16
            resident((1, dpad)),                                # b2p
            resident((dpad, npat_pad)),                         # protop, f32
            resident((dpad, P * hid)),                          # w1c concat, bf16
            resident((1, P * hid)),                             # b1c concat
            resident((P, hid, dpad)),                           # w2c, bf16
            resident((P, 1, dpad)),                             # b2c
            resident((P, dpad, ncls_pad)),                      # protoc, f32
        ]
        out_specs = [
            pl.BlockSpec((TB, npat_pad), lambda i: (i, 0)),
            pl.BlockSpec((TB, dpad), lambda i: (i, 0)),
            pl.BlockSpec((TB, ncls_pad), lambda i: (i, 0)),
            pl.BlockSpec((TB, dpad), lambda i: (i, 0)),
        ]
        return pl.pallas_call(
            kernel,
            out_shape=out_shapes,
            grid_spec=pltpu.PrefetchScalarGridSpec(
                num_scalar_prefetch=0,
                grid=(B_pad // TB,),
                in_specs=in_specs,
                out_specs=out_specs,
            ),
            compiler_params=pltpu.CompilerParams(
                dimension_semantics=("parallel",),       # batch axis -> even megacore split on v7x
                vmem_limit_bytes=_vmem_limit_bytes(),    # gen-aware (48 MiB v7x / 64 MiB v5e,v6e)
            ),
        )

    args = (x, params["w1p"], params["b1p"], params["w2p"], params["b2p"], params["protop"],
            params["w1c"], params["b1c"], params["w2c"], params["b2c"], params["protoc"])
    try:
        lp, zp, lc, zc = build(True)(*args)
    except Exception:
        # pl.Buffered(1) pipeline_mode not supported on this jax build: fall back to defaults.
        lp, zp, lc, zc = build(False)(*args)

    return {
        "feats": feats,
        "logits_pattern": lp[:B, :P],
        "proj_feats_pattern": zp[:B, :dout],
        "logits_class": lc[:B, :params["num_classes"]],
        "proj_feats_class": zc[:B, :dout],
    }


if __name__ == "__main__":
    # small shapes consistent with the module defaults (scaled down)
    B = 8
    feat_dim = 64          # stand-in for encoder feat_dim (resnet fc in-features)
    hidden_dim = 128       # hidden_dim (2048 in the original, scaled down)
    mlp_out_dim = 64       # mlp_out_dim (256 in the original, scaled down)
    num_pattern = 5
    num_old_classes = 10
    num_classes = num_old_classes   # mode='supervised'

    key = jax.random.PRNGKey(0)
    kf, kparams = jax.random.split(key)
    feats = jax.random.normal(kf, (B, feat_dim), jnp.float32)
    params = init_multi_pattern_params(kparams, feat_dim, hidden_dim, mlp_out_dim,
                                       num_pattern, num_classes)

    out = multi_pattern_forward(feats, params)
    out = jax.tree_util.tree_map(jax.block_until_ready, out)

    assert out["logits_pattern"].shape == (B, num_pattern)
    assert out["proj_feats_pattern"].shape == (B, mlp_out_dim)
    assert out["logits_class"].shape == (B, num_classes)
    assert out["proj_feats_class"].shape == (B, mlp_out_dim)
    for v in out.values():
        assert bool(jnp.all(jnp.isfinite(v)))
    # F.normalize(dim=1) => projected feature rows must be (approximately) unit norm.
    nrm = jnp.linalg.norm(out["proj_feats_pattern"], axis=1)
    assert bool(jnp.all(jnp.abs(nrm - 1.0) < 1e-2))
    print("KERNEL_OK")
</pallas_src>

<mosaic_0001>
module attributes {stable_mosaic.version = 11 : i64} {
  func.func @_fused_kernel(%arg0: i32, %arg1: memref<16x64xbf16, #tpu.memory_space<vmem>>, %arg2: memref<64x128xbf16, #tpu.memory_space<vmem>>, %arg3: memref<1x128xf32, #tpu.memory_space<vmem>>, %arg4: memref<128x128xbf16, #tpu.memory_space<vmem>>, %arg5: memref<1x128xf32, #tpu.memory_space<vmem>>, %arg6: memref<128x128xf32, #tpu.memory_space<vmem>>, %arg7: memref<128x640xbf16, #tpu.memory_space<vmem>>, %arg8: memref<1x640xf32, #tpu.memory_space<vmem>>, %arg9: memref<5x128x128xbf16, #tpu.memory_space<vmem>>, %arg10: memref<5x1x128xf32, #tpu.memory_space<vmem>>, %arg11: memref<5x128x128xf32, #tpu.memory_space<vmem>>, %arg12: memref<16x128xf32, #tpu.memory_space<vmem>>, %arg13: memref<16x128xf32, #tpu.memory_space<vmem>>, %arg14: memref<16x128xf32, #tpu.memory_space<vmem>>, %arg15: memref<16x128xf32, #tpu.memory_space<vmem>>) attributes {dimension_semantics = [#tpu.dimension_semantics<parallel>], iteration_bounds = array<i64: 1>, scalar_prefetch = 0 : i64, scratch_operands = 0 : i64, tpu.core_type = #tpu.core_type<tc>, window_params = [{transform_indices = @transform_0, window_bounds = array<i64: 16, 64>}, {pipeline_mode = #tpu.pipeline_mode<synchronous>, transform_indices = @transform_1, window_bounds = array<i64: 64, 128>}, {pipeline_mode = #tpu.pipeline_mode<synchronous>, transform_indices = @transform_2, window_bounds = array<i64: 1, 128>}, {pipeline_mode = #tpu.pipeline_mode<synchronous>, transform_indices = @transform_3, window_bounds = array<i64: 128, 128>}, {pipeline_mode = #tpu.pipeline_mode<synchronous>, transform_indices = @transform_4, window_bounds = array<i64: 1, 128>}, {pipeline_mode = #tpu.pipeline_mode<synchronous>, transform_indices = @transform_5, window_bounds = array<i64: 128, 128>}, {pipeline_mode = #tpu.pipeline_mode<synchronous>, transform_indices = @transform_6, window_bounds = array<i64: 128, 640>}, {pipeline_mode = #tpu.pipeline_mode<synchronous>, transform_indices = @transform_7, window_bounds = array<i64: 1, 640>}, {pipeline_mode = #tpu.pipeline_mode<synchronous>, transform_indices = @transform_8, window_bounds = array<i64: 5, 128, 128>}, {pipeline_mode = #tpu.pipeline_mode<synchronous>, transform_indices = @transform_9, window_bounds = array<i64: 5, 1, 128>}, {pipeline_mode = #tpu.pipeline_mode<synchronous>, transform_indices = @transform_10, window_bounds = array<i64: 5, 128, 128>}, {transform_indices = @transform_11, window_bounds = array<i64: 16, 128>}, {transform_indices = @transform_12, window_bounds = array<i64: 16, 128>}, {transform_indices = @transform_13, window_bounds = array<i64: 16, 128>}, {transform_indices = @transform_14, window_bounds = array<i64: 16, 128>}]} {
    %c0 = arith.constant 0 : index
    %c0_0 = arith.constant 0 : index
    %0 = vector.load %arg1[%c0, %c0_0] : memref<16x64xbf16, #tpu.memory_space<vmem>>, vector<16x64xbf16>
    %c0_1 = arith.constant 0 : index
    %c0_2 = arith.constant 0 : index
    %1 = vector.load %arg2[%c0_1, %c0_2] : memref<64x128xbf16, #tpu.memory_space<vmem>>, vector<64x128xbf16>
    %cst = arith.constant dense<0.000000e+00> : vector<16x128xf32>
    %2 = tpu.matmul %0, %1, %cst {dimension_numbers = #tpu.dot_dimension_numbers<[1], [0], [0], [1], [0, 0, 1, 1], [], []>} : vector<16x64xbf16>, vector<64x128xbf16>, vector<16x128xf32> -> vector<16x128xf32>
    %c0_3 = arith.constant 0 : index
    %c0_4 = arith.constant 0 : index
    %3 = vector.load %arg3[%c0_3, %c0_4] : memref<1x128xf32, #tpu.memory_space<vmem>>, vector<1x128xf32>
    %4 = vector.broadcast %3 : vector<1x128xf32> to vector<16x128xf32>
    %5 = arith.addf %2, %4 : vector<16x128xf32>
    %cst_5 = arith.constant 0.000000e+00 : f32
    %6 = vector.broadcast %cst_5 : f32 to vector<16x128xf32>
    %7 = arith.maximumf %5, %6 : vector<16x128xf32>
    %8 = arith.truncf %7 : vector<16x128xf32> to vector<16x128xbf16>
    %c0_6 = arith.constant 0 : index
    %c0_7 = arith.constant 0 : index
    %9 = vector.load %arg4[%c0_6, %c0_7] : memref<128x128xbf16, #tpu.memory_space<vmem>>, vector<128x128xbf16>
    %cst_8 = arith.constant dense<0.000000e+00> : vector<16x128xf32>
    %10 = tpu.matmul %8, %9, %cst_8 {dimension_numbers = #tpu.dot_dimension_numbers<[1], [0], [0], [1], [0, 0, 1, 1], [], []>} : vector<16x128xbf16>, vector<128x128xbf16>, vector<16x128xf32> -> vector<16x128xf32>
    %c0_9 = arith.constant 0 : index
    %c0_10 = arith.constant 0 : index
    %11 = vector.load %arg5[%c0_9, %c0_10] : memref<1x128xf32, #tpu.memory_space<vmem>>, vector<1x128xf32>
    %12 = vector.broadcast %11 : vector<1x128xf32> to vector<16x128xf32>
    %13 = arith.addf %10, %12 : vector<16x128xf32>
    %14 = arith.mulf %13, %13 : vector<16x128xf32>
    %cst_11 = arith.constant dense<0.000000e+00> : vector<16xf32>
    %15 = vector.multi_reduction <add>, %14, %cst_11 [1] : vector<16x128xf32> to vector<16xf32>
    %16 = vector.shape_cast %15 : vector<16xf32> to vector<16x1xf32>
    %cst_12 = arith.constant 1.000000e-24 : f32
    %17 = vector.broadcast %cst_12 : f32 to vector<16x1xf32>
    %18 = arith.maximumf %16, %17 : vector<16x1xf32>
    %19 = math.rsqrt %18 : vector<16x1xf32>
    %20 = vector.broadcast %19 : vector<16x1xf32> to vector<16x128xf32>
    %21 = arith.mulf %13, %20 : vector<16x128xf32>
    %c0_13 = arith.constant 0 : index
    %c0_14 = arith.constant 0 : index
    %22 = vector.load %arg6[%c0_13, %c0_14] : memref<128x128xf32, #tpu.memory_space<vmem>>, vector<128x128xf32>
    %cst_15 = arith.constant dense<0.000000e+00> : vector<16x128xf32>
    %23 = tpu.matmul %21, %22, %cst_15 {dimension_numbers = #tpu.dot_dimension_numbers<[1], [0], [0], [1], [0, 0, 1, 1], [], []>} : vector<16x128xf32>, vector<128x128xf32>, vector<16x128xf32> -> vector<16x128xf32>
    %c0_16 = arith.constant 0 : index
    %c0_17 = arith.constant 0 : index
    %24 = vector.load %arg12[%c0_16, %c0_17] : memref<16x128xf32, #tpu.memory_space<vmem>>, vector<16x128xf32>
    tpu.vector_store %arg12[%c0_16, %c0_17], %23 {strides = array<i32>} : memref<16x128xf32, #tpu.memory_space<vmem>>, vector<16x128xf32>,
    %c0_18 = arith.constant 0 : index
    %c0_19 = arith.constant 0 : index
    %25 = vector.load %arg13[%c0_18, %c0_19] : memref<16x128xf32, #tpu.memory_space<vmem>>, vector<16x128xf32>
    tpu.vector_store %arg13[%c0_18, %c0_19], %21 {strides = array<i32>} : memref<16x128xf32, #tpu.memory_space<vmem>>, vector<16x128xf32>,
    %26 = tpu.iota {dimensions = array<i32: 1>} : vector<16x128xi32>
    %27 = arith.sitofp %26 : vector<16x128xi32> to vector<16x128xf32>
    %cst_20 = arith.constant 5.000000e+00 : f32
    %28 = vector.broadcast %cst_20 : f32 to vector<16x128xf32>
    %29 = arith.cmpf olt, %27, %28 : vector<16x128xf32>
    %cst_21 = arith.constant 0xFF800000 : f32
    %30 = vector.broadcast %cst_21 : f32 to vector<16x128xf32>
    %31 = arith.select %29, %23, %30 : vector<16x128xi1>, vector<16x128xf32>
    %cst_22 = arith.constant dense<0xFF800000> : vector<16xf32>
    %32 = vector.multi_reduction <maximumf>, %31, %cst_22 [1] : vector<16x128xf32> to vector<16xf32>
    %33 = vector.shape_cast %32 : vector<16xf32> to vector<16x1xf32>
    %34 = vector.broadcast %33 : vector<16x1xf32> to vector<16x128xf32>
    %35 = arith.cmpf oeq, %31, %34 : vector<16x128xf32>
    %cst_23 = arith.constant 1.280000e+02 : f32
    %36 = vector.broadcast %cst_23 : f32 to vector<16x128xf32>
    %37 = arith.select %35, %27, %36 : vector<16x128xi1>, vector<16x128xf32>
    %cst_24 = arith.constant dense<0x7F800000> : vector<16xf32>
    %38 = vector.multi_reduction <minimumf>, %37, %cst_24 [1] : vector<16x128xf32> to vector<16xf32>
    %39 = vector.shape_cast %38 : vector<16xf32> to vector<16x1xf32>
    %40 = arith.truncf %21 : vector<16x128xf32> to vector<16x128xbf16>
    %c0_25 = arith.constant 0 : index
    %c0_26 = arith.constant 0 : index
    %41 = vector.load %arg7[%c0_25, %c0_26] : memref<128x640xbf16, #tpu.memory_space<vmem>>, vector<128x640xbf16>
    %cst_27 = arith.constant dense<0.000000e+00> : vector<16x640xf32>
    %42 = tpu.matmul %40, %41, %cst_27 {dimension_numbers = #tpu.dot_dimension_numbers<[1], [0], [0], [1], [0, 0, 1, 1], [], []>} : vector<16x128xbf16>, vector<128x640xbf16>, vector<16x640xf32> -> vector<16x640xf32>
    %c0_28 = arith.constant 0 : index
    %c0_29 = arith.constant 0 : index
    %43 = vector.load %arg8[%c0_28, %c0_29] : memref<1x640xf32, #tpu.memory_space<vmem>>, vector<1x640xf32>
    %44 = vector.broadcast %43 : vector<1x640xf32> to vector<16x640xf32>
    %45 = arith.addf %42, %44 : vector<16x640xf32>
    %cst_30 = arith.constant 0.000000e+00 : f32
    %46 = vector.broadcast %cst_30 : f32 to vector<16x640xf32>
    %47 = arith.maximumf %45, %46 : vector<16x640xf32>
    %cst_31 = arith.constant 0.000000e+00 : f32
    %48 = vector.broadcast %cst_31 : f32 to vector<16x128xf32>
    %cst_32 = arith.constant 0.000000e+00 : f32
    %49 = vector.broadcast %cst_32 : f32 to vector<16x128xf32>
    %50 = vector.extract_strided_slice %47 {offsets = [0, 0], sizes = [16, 128], strides = [1, 1]} : vector<16x640xf32> to vector<16x128xf32>
    %51 = arith.truncf %50 : vector<16x128xf32> to vector<16x128xbf16>
    %c0_33 = arith.constant 0 : index
    %c0_34 = arith.constant 0 : index
    %c0_35 = arith.constant 0 : index
    %52 = vector.load %arg9[%c0_33, %c0_34, %c0_35] : memref<5x128x128xbf16, #tpu.memory_space<vmem>>, vector<1x128x128xbf16>
    %53 = vector.shape_cast %52 : vector<1x128x128xbf16> to vector<128x128xbf16>
    %cst_36 = arith.constant dense<0.000000e+00> : vector<16x128xf32>
    %54 = tpu.matmul %51, %53, %cst_36 {dimension_numbers = #tpu.dot_dimension_numbers<[1], [0], [0], [1], [0, 0, 1, 1], [], []>} : vector<16x128xbf16>, vector<128x128xbf16>, vector<16x128xf32> -> vector<16x128xf32>
    %c0_37 = arith.constant 0 : index
    %c0_38 = arith.constant 0 : index
    %c0_39 = arith.constant 0 : index
    %55 = vector.load %arg10[%c0_37, %c0_38, %c0_39] : memref<5x1x128xf32, #tpu.memory_space<vmem>>, vector<1x1x128xf32>
    %56 = vector.shape_cast %55 : vector<1x1x128xf32> to vector<1x128xf32>
    %57 = vector.broadcast %56 : vector<1x128xf32> to vector<16x128xf32>
    %58 = arith.addf %54, %57 : vector<16x128xf32>
    %59 = arith.mulf %58, %58 : vector<16x128xf32>
    %cst_40 = arith.constant dense<0.000000e+00> : vector<16xf32>
    %60 = vector.multi_reduction <add>, %59, %cst_40 [1] : vector<16x128xf32> to vector<16xf32>
    %61 = vector.shape_cast %60 : vector<16xf32> to vector<16x1xf32>
    %cst_41 = arith.constant 1.000000e-24 : f32
    %62 = vector.broadcast %cst_41 : f32 to vector<16x1xf32>
    %63 = arith.maximumf %61, %62 : vector<16x1xf32>
    %64 = math.rsqrt %63 : vector<16x1xf32>
    %65 = vector.broadcast %64 : vector<16x1xf32> to vector<16x128xf32>
    %66 = arith.mulf %58, %65 : vector<16x128xf32>
    %c0_42 = arith.constant 0 : index
    %c0_43 = arith.constant 0 : index
    %c0_44 = arith.constant 0 : index
    %67 = vector.load %arg11[%c0_42, %c0_43, %c0_44] : memref<5x128x128xf32, #tpu.memory_space<vmem>>, vector<1x128x128xf32>
    %68 = vector.shape_cast %67 : vector<1x128x128xf32> to vector<128x128xf32>
    %cst_45 = arith.constant dense<0.000000e+00> : vector<16x128xf32>
    %69 = tpu.matmul %66, %68, %cst_45 {dimension_numbers = #tpu.dot_dimension_numbers<[1], [0], [0], [1], [0, 0, 1, 1], [], []>} : vector<16x128xf32>, vector<128x128xf32>, vector<16x128xf32> -> vector<16x128xf32>
    %cst_46 = arith.constant 0.000000e+00 : f32
    %70 = vector.broadcast %cst_46 : f32 to vector<16x1xf32>
    %71 = arith.cmpf oeq, %39, %70 : vector<16x1xf32>
    %72 = arith.extui %71 : vector<16x1xi1> to vector<16x1xi32>
    %73 = arith.sitofp %72 : vector<16x1xi32> to vector<16x1xf32>
    %74 = vector.broadcast %73 : vector<16x1xf32> to vector<16x128xf32>
    %75 = arith.mulf %74, %69 : vector<16x128xf32>
    %76 = arith.addf %48, %75 : vector<16x128xf32>
    %77 = vector.broadcast %73 : vector<16x1xf32> to vector<16x128xf32>
    %78 = arith.mulf %77, %66 : vector<16x128xf32>
    %79 = arith.addf %49, %78 : vector<16x128xf32>
    %80 = vector.extract_strided_slice %47 {offsets = [0, 128], sizes = [16, 128], strides = [1, 1]} : vector<16x640xf32> to vector<16x128xf32>
    %81 = arith.truncf %80 : vector<16x128xf32> to vector<16x128xbf16>
    %c1 = arith.constant 1 : index
    %c0_47 = arith.constant 0 : index
    %c0_48 = arith.constant 0 : index
    %82 = vector.load %arg9[%c1, %c0_47, %c0_48] : memref<5x128x128xbf16, #tpu.memory_space<vmem>>, vector<1x128x128xbf16>
    %83 = vector.shape_cast %82 : vector<1x128x128xbf16> to vector<128x128xbf16>
    %cst_49 = arith.constant dense<0.000000e+00> : vector<16x128xf32>
    %84 = tpu.matmul %81, %83, %cst_49 {dimension_numbers = #tpu.dot_dimension_numbers<[1], [0], [0], [1], [0, 0, 1, 1], [], []>} : vector<16x128xbf16>, vector<128x128xbf16>, vector<16x128xf32> -> vector<16x128xf32>
    %c1_50 = arith.constant 1 : index
    %c0_51 = arith.constant 0 : index
    %c0_52 = arith.constant 0 : index
    %85 = vector.load %arg10[%c1_50, %c0_51, %c0_52] : memref<5x1x128xf32, #tpu.memory_space<vmem>>, vector<1x1x128xf32>
    %86 = vector.shape_cast %85 : vector<1x1x128xf32> to vector<1x128xf32>
    %87 = vector.broadcast %86 : vector<1x128xf32> to vector<16x128xf32>
    %88 = arith.addf %84, %87 : vector<16x128xf32>
    %89 = arith.mulf %88, %88 : vector<16x128xf32>
    %cst_53 = arith.constant dense<0.000000e+00> : vector<16xf32>
    %90 = vector.multi_reduction <add>, %89, %cst_53 [1] : vector<16x128xf32> to vector<16xf32>
    %91 = vector.shape_cast %90 : vector<16xf32> to vector<16x1xf32>
    %cst_54 = arith.constant 1.000000e-24 : f32
    %92 = vector.broadcast %cst_54 : f32 to vector<16x1xf32>
    %93 = arith.maximumf %91, %92 : vector<16x1xf32>
    %94 = math.rsqrt %93 : vector<16x1xf32>
    %95 = vector.broadcast %94 : vector<16x1xf32> to vector<16x128xf32>
    %96 = arith.mulf %88, %95 : vector<16x128xf32>
    %c1_55 = arith.constant 1 : index
    %c0_56 = arith.constant 0 : index
    %c0_57 = arith.constant 0 : index
    %97 = vector.load %arg11[%c1_55, %c0_56, %c0_57] : memref<5x128x128xf32, #tpu.memory_space<vmem>>, vector<1x128x128xf32>
    %98 = vector.shape_cast %97 : vector<1x128x128xf32> to vector<128x128xf32>
    %cst_58 = arith.constant dense<0.000000e+00> : vector<16x128xf32>
    %99 = tpu.matmul %96, %98, %cst_58 {dimension_numbers = #tpu.dot_dimension_numbers<[1], [0], [0], [1], [0, 0, 1, 1], [], []>} : vector<16x128xf32>, vector<128x128xf32>, vector<16x128xf32> -> vector<16x128xf32>
    %cst_59 = arith.constant 1.000000e+00 : f32
    %100 = vector.broadcast %cst_59 : f32 to vector<16x1xf32>
    %101 = arith.cmpf oeq, %39, %100 : vector<16x1xf32>
    %102 = arith.extui %101 : vector<16x1xi1> to vector<16x1xi32>
    %103 = arith.sitofp %102 : vector<16x1xi32> to vector<16x1xf32>
    %104 = vector.broadcast %103 : vector<16x1xf32> to vector<16x128xf32>
    %105 = arith.mulf %104, %99 : vector<16x128xf32>
    %106 = arith.addf %76, %105 : vector<16x128xf32>
    %107 = vector.broadcast %103 : vector<16x1xf32> to vector<16x128xf32>
    %108 = arith.mulf %107, %96 : vector<16x128xf32>
    %109 = arith.addf %79, %108 : vector<16x128xf32>
    %110 = vector.extract_strided_slice %47 {offsets = [0, 256], sizes = [16, 128], strides = [1, 1]} : vector<16x640xf32> to vector<16x128xf32>
    %111 = arith.truncf %110 : vector<16x128xf32> to vector<16x128xbf16>
    %c2 = arith.constant 2 : index
    %c0_60 = arith.constant 0 : index
    %c0_61 = arith.constant 0 : index
    %112 = vector.load %arg9[%c2, %c0_60, %c0_61] : memref<5x128x128xbf16, #tpu.memory_space<vmem>>, vector<1x128x128xbf16>
    %113 = vector.shape_cast %112 : vector<1x128x128xbf16> to vector<128x128xbf16>
    %cst_62 = arith.constant dense<0.000000e+00> : vector<16x128xf32>
    %114 = tpu.matmul %111, %113, %cst_62 {dimension_numbers = #tpu.dot_dimension_numbers<[1], [0], [0], [1], [0, 0, 1, 1], [], []>} : vector<16x128xbf16>, vector<128x128xbf16>, vector<16x128xf32> -> vector<16x128xf32>
    %c2_63 = arith.constant 2 : index
    %c0_64 = arith.constant 0 : index
    %c0_65 = arith.constant 0 : index
    %115 = vector.load %arg10[%c2_63, %c0_64, %c0_65] : memref<5x1x128xf32, #tpu.memory_space<vmem>>, vector<1x1x128xf32>
    %116 = vector.shape_cast %115 : vector<1x1x128xf32> to vector<1x128xf32>
    %117 = vector.broadcast %116 : vector<1x128xf32> to vector<16x128xf32>
    %118 = arith.addf %114, %117 : vector<16x128xf32>
    %119 = arith.mulf %118, %118 : vector<16x128xf32>
    %cst_66 = arith.constant dense<0.000000e+00> : vector<16xf32>
    %120 = vector.multi_reduction <add>, %119, %cst_66 [1] : vector<16x128xf32> to vector<16xf32>
    %121 = vector.shape_cast %120 : vector<16xf32> to vector<16x1xf32>
    %cst_67 = arith.constant 1.000000e-24 : f32
    %122 = vector.broadcast %cst_67 : f32 to vector<16x1xf32>
    %123 = arith.maximumf %121, %122 : vector<16x1xf32>
    %124 = math.rsqrt %123 : vector<16x1xf32>
    %125 = vector.broadcast %124 : vector<16x1xf32> to vector<16x128xf32>
    %126 = arith.mulf %118, %125 : vector<16x128xf32>
    %c2_68 = arith.constant 2 : index
    %c0_69 = arith.constant 0 : index
    %c0_70 = arith.constant 0 : index
    %127 = vector.load %arg11[%c2_68, %c0_69, %c0_70] : memref<5x128x128xf32, #tpu.memory_space<vmem>>, vector<1x128x128xf32>
    %128 = vector.shape_cast %127 : vector<1x128x128xf32> to vector<128x128xf32>
    %cst_71 = arith.constant dense<0.000000e+00> : vector<16x128xf32>
    %129 = tpu.matmul %126, %128, %cst_71 {dimension_numbers = #tpu.dot_dimension_numbers<[1], [0], [0], [1], [0, 0, 1, 1], [], []>} : vector<16x128xf32>, vector<128x128xf32>, vector<16x128xf32> -> vector<16x128xf32>
    %cst_72 = arith.constant 2.000000e+00 : f32
    %130 = vector.broadcast %cst_72 : f32 to vector<16x1xf32>
    %131 = arith.cmpf oeq, %39, %130 : vector<16x1xf32>
    %132 = arith.extui %131 : vector<16x1xi1> to vector<16x1xi32>
    %133 = arith.sitofp %132 : vector<16x1xi32> to vector<16x1xf32>
    %134 = vector.broadcast %133 : vector<16x1xf32> to vector<16x128xf32>
    %135 = arith.mulf %134, %129 : vector<16x128xf32>
    %136 = arith.addf %106, %135 : vector<16x128xf32>
    %137 = vector.broadcast %133 : vector<16x1xf32> to vector<16x128xf32>
    %138 = arith.mulf %137, %126 : vector<16x128xf32>
    %139 = arith.addf %109, %138 : vector<16x128xf32>
    %140 = vector.extract_strided_slice %47 {offsets = [0, 384], sizes = [16, 128], strides = [1, 1]} : vector<16x640xf32> to vector<16x128xf32>
    %141 = arith.truncf %140 : vector<16x128xf32> to vector<16x128xbf16>
    %c3 = arith.constant 3 : index
    %c0_73 = arith.constant 0 : index
    %c0_74 = arith.constant 0 : index
    %142 = vector.load %arg9[%c3, %c0_73, %c0_74] : memref<5x128x128xbf16, #tpu.memory_space<vmem>>, vector<1x128x128xbf16>
    %143 = vector.shape_cast %142 : vector<1x128x128xbf16> to vector<128x128xbf16>
    %cst_75 = arith.constant dense<0.000000e+00> : vector<16x128xf32>
    %144 = tpu.matmul %141, %143, %cst_75 {dimension_numbers = #tpu.dot_dimension_numbers<[1], [0], [0], [1], [0, 0, 1, 1], [], []>} : vector<16x128xbf16>, vector<128x128xbf16>, vector<16x128xf32> -> vector<16x128xf32>
    %c3_76 = arith.constant 3 : index
    %c0_77 = arith.constant 0 : index
    %c0_78 = arith.constant 0 : index
    %145 = vector.load %arg10[%c3_76, %c0_77, %c0_78] : memref<5x1x128xf32, #tpu.memory_space<vmem>>, vector<1x1x128xf32>
    %146 = vector.shape_cast %145 : vector<1x1x128xf32> to vector<1x128xf32>
    %147 = vector.broadcast %146 : vector<1x128xf32> to vector<16x128xf32>
    %148 = arith.addf %144, %147 : vector<16x128xf32>
    %149 = arith.mulf %148, %148 : vector<16x128xf32>
    %cst_79 = arith.constant dense<0.000000e+00> : vector<16xf32>
    %150 = vector.multi_reduction <add>, %149, %cst_79 [1] : vector<16x128xf32> to vector<16xf32>
    %151 = vector.shape_cast %150 : vector<16xf32> to vector<16x1xf32>
    %cst_80 = arith.constant 1.000000e-24 : f32
    %152 = vector.broadcast %cst_80 : f32 to vector<16x1xf32>
    %153 = arith.maximumf %151, %152 : vector<16x1xf32>
    %154 = math.rsqrt %153 : vector<16x1xf32>
    %155 = vector.broadcast %154 : vector<16x1xf32> to vector<16x128xf32>
    %156 = arith.mulf %148, %155 : vector<16x128xf32>
    %c3_81 = arith.constant 3 : index
    %c0_82 = arith.constant 0 : index
    %c0_83 = arith.constant 0 : index
    %157 = vector.load %arg11[%c3_81, %c0_82, %c0_83] : memref<5x128x128xf32, #tpu.memory_space<vmem>>, vector<1x128x128xf32>
    %158 = vector.shape_cast %157 : vector<1x128x128xf32> to vector<128x128xf32>
    %cst_84 = arith.constant dense<0.000000e+00> : vector<16x128xf32>
    %159 = tpu.matmul %156, %158, %cst_84 {dimension_numbers = #tpu.dot_dimension_numbers<[1], [0], [0], [1], [0, 0, 1, 1], [], []>} : vector<16x128xf32>, vector<128x128xf32>, vector<16x128xf32> -> vector<16x128xf32>
    %cst_85 = arith.constant 3.000000e+00 : f32
    %160 = vector.broadcast %cst_85 : f32 to vector<16x1xf32>
    %161 = arith.cmpf oeq, %39, %160 : vector<16x1xf32>
    %162 = arith.extui %161 : vector<16x1xi1> to vector<16x1xi32>
    %163 = arith.sitofp %162 : vector<16x1xi32> to vector<16x1xf32>
    %164 = vector.broadcast %163 : vector<16x1xf32> to vector<16x128xf32>
    %165 = arith.mulf %164, %159 : vector<16x128xf32>
    %166 = arith.addf %136, %165 : vector<16x128xf32>
    %167 = vector.broadcast %163 : vector<16x1xf32> to vector<16x128xf32>
    %168 = arith.mulf %167, %156 : vector<16x128xf32>
    %169 = arith.addf %139, %168 : vector<16x128xf32>
    %170 = vector.extract_strided_slice %47 {offsets = [0, 512], sizes = [16, 128], strides = [1, 1]} : vector<16x640xf32> to vector<16x128xf32>
    %171 = arith.truncf %170 : vector<16x128xf32> to vector<16x128xbf16>
    %c4 = arith.constant 4 : index
    %c0_86 = arith.constant 0 : index
    %c0_87 = arith.constant 0 : index
    %172 = vector.load %arg9[%c4, %c0_86, %c0_87] : memref<5x128x128xbf16, #tpu.memory_space<vmem>>, vector<1x128x128xbf16>
    %173 = vector.shape_cast %172 : vector<1x128x128xbf16> to vector<128x128xbf16>
    %cst_88 = arith.constant dense<0.000000e+00> : vector<16x128xf32>
    %174 = tpu.matmul %171, %173, %cst_88 {dimension_numbers = #tpu.dot_dimension_numbers<[1], [0], [0], [1], [0, 0, 1, 1], [], []>} : vector<16x128xbf16>, vector<128x128xbf16>, vector<16x128xf32> -> vector<16x128xf32>
    %c4_89 = arith.constant 4 : index
    %c0_90 = arith.constant 0 : index
    %c0_91 = arith.constant 0 : index
    %175 = vector.load %arg10[%c4_89, %c0_90, %c0_91] : memref<5x1x128xf32, #tpu.memory_space<vmem>>, vector<1x1x128xf32>
    %176 = vector.shape_cast %175 : vector<1x1x128xf32> to vector<1x128xf32>
    %177 = vector.broadcast %176 : vector<1x128xf32> to vector<16x128xf32>
    %178 = arith.addf %174, %177 : vector<16x128xf32>
    %179 = arith.mulf %178, %178 : vector<16x128xf32>
    %cst_92 = arith.constant dense<0.000000e+00> : vector<16xf32>
    %180 = vector.multi_reduction <add>, %179, %cst_92 [1] : vector<16x128xf32> to vector<16xf32>
    %181 = vector.shape_cast %180 : vector<16xf32> to vector<16x1xf32>
    %cst_93 = arith.constant 1.000000e-24 : f32
    %182 = vector.broadcast %cst_93 : f32 to vector<16x1xf32>
    %183 = arith.maximumf %181, %182 : vector<16x1xf32>
    %184 = math.rsqrt %183 : vector<16x1xf32>
    %185 = vector.broadcast %184 : vector<16x1xf32> to vector<16x128xf32>
    %186 = arith.mulf %178, %185 : vector<16x128xf32>
    %c4_94 = arith.constant 4 : index
    %c0_95 = arith.constant 0 : index
    %c0_96 = arith.constant 0 : index
    %187 = vector.load %arg11[%c4_94, %c0_95, %c0_96] : memref<5x128x128xf32, #tpu.memory_space<vmem>>, vector<1x128x128xf32>
    %188 = vector.shape_cast %187 : vector<1x128x128xf32> to vector<128x128xf32>
    %cst_97 = arith.constant dense<0.000000e+00> : vector<16x128xf32>
    %189 = tpu.matmul %186, %188, %cst_97 {dimension_numbers = #tpu.dot_dimension_numbers<[1], [0], [0], [1], [0, 0, 1, 1], [], []>} : vector<16x128xf32>, vector<128x128xf32>, vector<16x128xf32> -> vector<16x128xf32>
    %cst_98 = arith.constant 4.000000e+00 : f32
    %190 = vector.broadcast %cst_98 : f32 to vector<16x1xf32>
    %191 = arith.cmpf oeq, %39, %190 : vector<16x1xf32>
    %192 = arith.extui %191 : vector<16x1xi1> to vector<16x1xi32>
    %193 = arith.sitofp %192 : vector<16x1xi32> to vector<16x1xf32>
    %194 = vector.broadcast %193 : vector<16x1xf32> to vector<16x128xf32>
    %195 = arith.mulf %194, %189 : vector<16x128xf32>
    %196 = arith.addf %166, %195 : vector<16x128xf32>
    %197 = vector.broadcast %193 : vector<16x1xf32> to vector<16x128xf32>
    %198 = arith.mulf %197, %186 : vector<16x128xf32>
    %199 = arith.addf %169, %198 : vector<16x128xf32>
    %c0_99 = arith.constant 0 : index
    %c0_100 = arith.constant 0 : index
    %200 = vector.load %arg14[%c0_99, %c0_100] : memref<16x128xf32, #tpu.memory_space<vmem>>, vector<16x128xf32>
    tpu.vector_store %arg14[%c0_99, %c0_100], %196 {strides = array<i32>} : memref<16x128xf32, #tpu.memory_space<vmem>>, vector<16x128xf32>,
    %c0_101 = arith.constant 0 : index
    %c0_102 = arith.constant 0 : index
    %201 = vector.load %arg15[%c0_101, %c0_102] : memref<16x128xf32, #tpu.memory_space<vmem>>, vector<16x128xf32>
    tpu.vector_store %arg15[%c0_101, %c0_102], %199 {strides = array<i32>} : memref<16x128xf32, #tpu.memory_space<vmem>>, vector<16x128xf32>,
    return
  }
  func.func @transform_0(%arg0: i32) -> (i32, i32) {
    %c0_i32 = arith.constant 0 : i32
    %c0_i32_0 = arith.constant 0 : i32
    return %arg0, %c0_i32 : i32, i32
  }
  func.func @transform_1(%arg0: i32) -> (i32, i32) {
    %c0_i32 = arith.constant 0 : i32
    %c0_i32_0 = arith.constant 0 : i32
    %c0_i32_1 = arith.constant 0 : i32
    return %c0_i32, %c0_i32_0 : i32, i32
  }
  func.func @transform_2(%arg0: i32) -> (i32, i32) {
    %c0_i32 = arith.constant 0 : i32
    %c0_i32_0 = arith.constant 0 : i32
    %c0_i32_1 = arith.constant 0 : i32
    return %c0_i32, %c0_i32_0 : i32, i32
  }
  func.func @transform_3(%arg0: i32) -> (i32, i32) {
    %c0_i32 = arith.constant 0 : i32
    %c0_i32_0 = arith.constant 0 : i32
    %c0_i32_1 = arith.constant 0 : i32
    return %c0_i32, %c0_i32_0 : i32, i32
  }
  func.func @transform_4(%arg0: i32) -> (i32, i32) {
    %c0_i32 = arith.constant 0 : i32
    %c0_i32_0 = arith.constant 0 : i32
    %c0_i32_1 = arith.constant 0 : i32
    return %c0_i32, %c0_i32_0 : i32, i32
  }
  func.func @transform_5(%arg0: i32) -> (i32, i32) {
    %c0_i32 = arith.constant 0 : i32
    %c0_i32_0 = arith.constant 0 : i32
    %c0_i32_1 = arith.constant 0 : i32
    return %c0_i32, %c0_i32_0 : i32, i32
  }
  func.func @transform_6(%arg0: i32) -> (i32, i32) {
    %c0_i32 = arith.constant 0 : i32
    %c0_i32_0 = arith.constant 0 : i32
    %c0_i32_1 = arith.constant 0 : i32
    return %c0_i32, %c0_i32_0 : i32, i32
  }
  func.func @transform_7(%arg0: i32) -> (i32, i32) {
    %c0_i32 = arith.constant 0 : i32
    %c0_i32_0 = arith.constant 0 : i32
    %c0_i32_1 = arith.constant 0 : i32
    return %c0_i32, %c0_i32_0 : i32, i32
  }
  func.func @transform_8(%arg0: i32) -> (i32, i32, i32) {
    %c0_i32 = arith.constant 0 : i32
    %c0_i32_0 = arith.constant 0 : i32
    %c0_i32_1 = arith.constant 0 : i32
    %c0_i32_2 = arith.constant 0 : i32
    return %c0_i32, %c0_i32_0, %c0_i32_1 : i32, i32, i32
  }
  func.func @transform_9(%arg0: i32) -> (i32, i32, i32) {
    %c0_i32 = arith.constant 0 : i32
    %c0_i32_0 = arith.constant 0 : i32
    %c0_i32_1 = arith.constant 0 : i32
    %c0_i32_2 = arith.constant 0 : i32
    return %c0_i32, %c0_i32_0, %c0_i32_1 : i32, i32, i32
  }
  func.func @transform_10(%arg0: i32) -> (i32, i32, i32) {
    %c0_i32 = arith.constant 0 : i32
    %c0_i32_0 = arith.constant 0 : i32
    %c0_i32_1 = arith.constant 0 : i32
    %c0_i32_2 = arith.constant 0 : i32
    return %c0_i32, %c0_i32_0, %c0_i32_1 : i32, i32, i32
  }
  func.func @transform_11(%arg0: i32) -> (i32, i32) {
    %c0_i32 = arith.constant 0 : i32
    %c0_i32_0 = arith.constant 0 : i32
    return %arg0, %c0_i32 : i32, i32
  }
  func.func @transform_12(%arg0: i32) -> (i32, i32) {
    %c0_i32 = arith.constant 0 : i32
    %c0_i32_0 = arith.constant 0 : i32
    return %arg0, %c0_i32 : i32, i32
  }
  func.func @transform_13(%arg0: i32) -> (i32, i32) {
    %c0_i32 = arith.constant 0 : i32
    %c0_i32_0 = arith.constant 0 : i32
    return %arg0, %c0_i32 : i32, i32
  }
  func.func @transform_14(%arg0: i32) -> (i32, i32) {
    %c0_i32 = arith.constant 0 : i32
    %c0_i32_0 = arith.constant 0 : i32
    return %arg0, %c0_i32 : i32, i32
  }
}

module attributes {stable_mosaic.version = 11 : i64} {
  func.func @_fused_kernel(%arg0: i32, %arg1: memref<16x64xbf16, #tpu.memory_space<vmem>>, %arg2: memref<64x128xbf16, #tpu.memory_space<vmem>>, %arg3: memref<1x128xf32, #tpu.memory_space<vmem>>, %arg4: memref<128x128xbf16, #tpu.memory_space<vmem>>, %arg5: memref<1x128xf32, #tpu.memory_space<vmem>>, %arg6: memref<128x128xf32, #tpu.memory_space<vmem>>, %arg7: memref<128x640xbf16, #tpu.memory_space<vmem>>, %arg8: memref<1x640xf32, #tpu.memory_space<vmem>>, %arg9: memref<5x128x128xbf16, #tpu.memory_space<vmem>>, %arg10: memref<5x1x128xf32, #tpu.memory_space<vmem>>, %arg11: memref<5x128x128xf32, #tpu.memory_space<vmem>>, %arg12: memref<16x128xf32, #tpu.memory_space<vmem>>, %arg13: memref<16x128xf32, #tpu.memory_space<vmem>>, %arg14: memref<16x128xf32, #tpu.memory_space<vmem>>, %arg15: memref<16x128xf32, #tpu.memory_space<vmem>>) attributes {dimension_semantics = [#tpu.dimension_semantics<parallel>], iteration_bounds = array<i64: 1>, scalar_prefetch = 0 : i64, scratch_operands = 0 : i64, tpu.core_type = #tpu.core_type<tc>, window_params = [{transform_indices = @transform_0, window_bounds = array<i64: 16, 64>}, {pipeline_mode = #tpu.pipeline_mode<synchronous>, transform_indices = @transform_1, window_bounds = array<i64: 64, 128>}, {pipeline_mode = #tpu.pipeline_mode<synchronous>, transform_indices = @transform_2, window_bounds = array<i64: 1, 128>}, {pipeline_mode = #tpu.pipeline_mode<synchronous>, transform_indices = @transform_3, window_bounds = array<i64: 128, 128>}, {pipeline_mode = #tpu.pipeline_mode<synchronous>, transform_indices = @transform_4, window_bounds = array<i64: 1, 128>}, {pipeline_mode = #tpu.pipeline_mode<synchronous>, transform_indices = @transform_5, window_bounds = array<i64: 128, 128>}, {pipeline_mode = #tpu.pipeline_mode<synchronous>, transform_indices = @transform_6, window_bounds = array<i64: 128, 640>}, {pipeline_mode = #tpu.pipeline_mode<synchronous>, transform_indices = @transform_7, window_bounds = array<i64: 1, 640>}, {pipeline_mode = #tpu.pipeline_mode<synchronous>, transform_indices = @transform_8, window_bounds = array<i64: 5, 128, 128>}, {pipeline_mode = #tpu.pipeline_mode<synchronous>, transform_indices = @transform_9, window_bounds = array<i64: 5, 1, 128>}, {pipeline_mode = #tpu.pipeline_mode<synchronous>, transform_indices = @transform_10, window_bounds = array<i64: 5, 128, 128>}, {transform_indices = @transform_11, window_bounds = array<i64: 16, 128>}, {transform_indices = @transform_12, window_bounds = array<i64: 16, 128>}, {transform_indices = @transform_13, window_bounds = array<i64: 16, 128>}, {transform_indices = @transform_14, window_bounds = array<i64: 16, 128>}]} {
    %c0 = arith.constant 0 : index
    %c0_0 = arith.constant 0 : index
    %0 = vector.load %arg1[%c0, %c0_0] : memref<16x64xbf16, #tpu.memory_space<vmem>>, vector<16x64xbf16>
    %c0_1 = arith.constant 0 : index
    %c0_2 = arith.constant 0 : index
    %1 = vector.load %arg2[%c0_1, %c0_2] : memref<64x128xbf16, #tpu.memory_space<vmem>>, vector<64x128xbf16>
    %cst = arith.constant dense<0.000000e+00> : vector<16x128xf32>
    %2 = tpu.matmul %0, %1, %cst {dimension_numbers = #tpu.dot_dimension_numbers<[1], [0], [0], [1], [0, 0, 1, 1], [], []>} : vector<16x64xbf16>, vector<64x128xbf16>, vector<16x128xf32> -> vector<16x128xf32>
    %c0_3 = arith.constant 0 : index
    %c0_4 = arith.constant 0 : index
    %3 = vector.load %arg3[%c0_3, %c0_4] : memref<1x128xf32, #tpu.memory_space<vmem>>, vector<1x128xf32>
    %4 = vector.broadcast %3 : vector<1x128xf32> to vector<16x128xf32>
    %5 = arith.addf %2, %4 : vector<16x128xf32>
    %cst_5 = arith.constant 0.000000e+00 : f32
    %6 = vector.broadcast %cst_5 : f32 to vector<16x128xf32>
    %7 = arith.maximumf %5, %6 : vector<16x128xf32>
    %8 = arith.truncf %7 : vector<16x128xf32> to vector<16x128xbf16>
    %c0_6 = arith.constant 0 : index
    %c0_7 = arith.constant 0 : index
    %9 = vector.load %arg4[%c0_6, %c0_7] : memref<128x128xbf16, #tpu.memory_space<vmem>>, vector<128x128xbf16>
    %cst_8 = arith.constant dense<0.000000e+00> : vector<16x128xf32>
    %10 = tpu.matmul %8, %9, %cst_8 {dimension_numbers = #tpu.dot_dimension_numbers<[1], [0], [0], [1], [0, 0, 1, 1], [], []>} : vector<16x128xbf16>, vector<128x128xbf16>, vector<16x128xf32> -> vector<16x128xf32>
    %c0_9 = arith.constant 0 : index
    %c0_10 = arith.constant 0 : index
    %11 = vector.load %arg5[%c0_9, %c0_10] : memref<1x128xf32, #tpu.memory_space<vmem>>, vector<1x128xf32>
    %12 = vector.broadcast %11 : vector<1x128xf32> to vector<16x128xf32>
    %13 = arith.addf %10, %12 : vector<16x128xf32>
    %14 = arith.mulf %13, %13 : vector<16x128xf32>
    %cst_11 = arith.constant dense<0.000000e+00> : vector<16xf32>
    %15 = vector.multi_reduction <add>, %14, %cst_11 [1] : vector<16x128xf32> to vector<16xf32>
    %16 = vector.shape_cast %15 : vector<16xf32> to vector<16x1xf32>
    %cst_12 = arith.constant 1.000000e-24 : f32
    %17 = vector.broadcast %cst_12 : f32 to vector<16x1xf32>
    %18 = arith.maximumf %16, %17 : vector<16x1xf32>
    %19 = math.rsqrt %18 : vector<16x1xf32>
    %20 = vector.broadcast %19 : vector<16x1xf32> to vector<16x128xf32>
    %21 = arith.mulf %13, %20 : vector<16x128xf32>
    %c0_13 = arith.constant 0 : index
    %c0_14 = arith.constant 0 : index
    %22 = vector.load %arg6[%c0_13, %c0_14] : memref<128x128xf32, #tpu.memory_space<vmem>>, vector<128x128xf32>
    %cst_15 = arith.constant dense<0.000000e+00> : vector<16x128xf32>
    %23 = tpu.matmul %21, %22, %cst_15 {dimension_numbers = #tpu.dot_dimension_numbers<[1], [0], [0], [1], [0, 0, 1, 1], [], []>} : vector<16x128xf32>, vector<128x128xf32>, vector<16x128xf32> -> vector<16x128xf32>
    %c0_16 = arith.constant 0 : index
    %c0_17 = arith.constant 0 : index
    %24 = vector.load %arg12[%c0_16, %c0_17] : memref<16x128xf32, #tpu.memory_space<vmem>>, vector<16x128xf32>
    tpu.vector_store %arg12[%c0_16, %c0_17], %23 {strides = array<i32>} : memref<16x128xf32, #tpu.memory_space<vmem>>, vector<16x128xf32>,
    %c0_18 = arith.constant 0 : index
    %c0_19 = arith.constant 0 : index
    %25 = vector.load %arg13[%c0_18, %c0_19] : memref<16x128xf32, #tpu.memory_space<vmem>>, vector<16x128xf32>
    tpu.vector_store %arg13[%c0_18, %c0_19], %21 {strides = array<i32>} : memref<16x128xf32, #tpu.memory_space<vmem>>, vector<16x128xf32>,
    %26 = tpu.iota {dimensions = array<i32: 1>} : vector<16x128xi32>
    %27 = arith.sitofp %26 : vector<16x128xi32> to vector<16x128xf32>
    %cst_20 = arith.constant 5.000000e+00 : f32
    %28 = vector.broadcast %cst_20 : f32 to vector<16x128xf32>
    %29 = arith.cmpf olt, %27, %28 : vector<16x128xf32>
    %cst_21 = arith.constant 0xFF800000 : f32
    %30 = vector.broadcast %cst_21 : f32 to vector<16x128xf32>
    %31 = arith.select %29, %23, %30 : vector<16x128xi1>, vector<16x128xf32>
    %cst_22 = arith.constant dense<0xFF800000> : vector<16xf32>
    %32 = vector.multi_reduction <maximumf>, %31, %cst_22 [1] : vector<16x128xf32> to vector<16xf32>
    %33 = vector.shape_cast %32 : vector<16xf32> to vector<16x1xf32>
    %34 = vector.broadcast %33 : vector<16x1xf32> to vector<16x128xf32>
    %35 = arith.cmpf oeq, %31, %34 : vector<16x128xf32>
    %cst_23 = arith.constant 1.280000e+02 : f32
    %36 = vector.broadcast %cst_23 : f32 to vector<16x128xf32>
    %37 = arith.select %35, %27, %36 : vector<16x128xi1>, vector<16x128xf32>
    %cst_24 = arith.constant dense<0x7F800000> : vector<16xf32>
    %38 = vector.multi_reduction <minimumf>, %37, %cst_24 [1] : vector<16x128xf32> to vector<16xf32>
    %39 = vector.shape_cast %38 : vector<16xf32> to vector<16x1xf32>
    %40 = arith.truncf %21 : vector<16x128xf32> to vector<16x128xbf16>
    %c0_25 = arith.constant 0 : index
    %c0_26 = arith.constant 0 : index
    %41 = vector.load %arg7[%c0_25, %c0_26] : memref<128x640xbf16, #tpu.memory_space<vmem>>, vector<128x640xbf16>
    %cst_27 = arith.constant dense<0.000000e+00> : vector<16x640xf32>
    %42 = tpu.matmul %40, %41, %cst_27 {dimension_numbers = #tpu.dot_dimension_numbers<[1], [0], [0], [1], [0, 0, 1, 1], [], []>} : vector<16x128xbf16>, vector<128x640xbf16>, vector<16x640xf32> -> vector<16x640xf32>
    %c0_28 = arith.constant 0 : index
    %c0_29 = arith.constant 0 : index
    %43 = vector.load %arg8[%c0_28, %c0_29] : memref<1x640xf32, #tpu.memory_space<vmem>>, vector<1x640xf32>
    %44 = vector.broadcast %43 : vector<1x640xf32> to vector<16x640xf32>
    %45 = arith.addf %42, %44 : vector<16x640xf32>
    %cst_30 = arith.constant 0.000000e+00 : f32
    %46 = vector.broadcast %cst_30 : f32 to vector<16x640xf32>
    %47 = arith.maximumf %45, %46 : vector<16x640xf32>
    %cst_31 = arith.constant 0.000000e+00 : f32
    %48 = vector.broadcast %cst_31 : f32 to vector<16x128xf32>
    %cst_32 = arith.constant 0.000000e+00 : f32
    %49 = vector.broadcast %cst_32 : f32 to vector<16x128xf32>
    %50 = vector.extract_strided_slice %47 {offsets = [0, 0], sizes = [16, 128], strides = [1, 1]} : vector<16x640xf32> to vector<16x128xf32>
    %51 = arith.truncf %50 : vector<16x128xf32> to vector<16x128xbf16>
    %c0_33 = arith.constant 0 : index
    %c0_34 = arith.constant 0 : index
    %c0_35 = arith.constant 0 : index
    %52 = vector.load %arg9[%c0_33, %c0_34, %c0_35] : memref<5x128x128xbf16, #tpu.memory_space<vmem>>, vector<1x128x128xbf16>
    %53 = vector.shape_cast %52 : vector<1x128x128xbf16> to vector<128x128xbf16>
    %cst_36 = arith.constant dense<0.000000e+00> : vector<16x128xf32>
    %54 = tpu.matmul %51, %53, %cst_36 {dimension_numbers = #tpu.dot_dimension_numbers<[1], [0], [0], [1], [0, 0, 1, 1], [], []>} : vector<16x128xbf16>, vector<128x128xbf16>, vector<16x128xf32> -> vector<16x128xf32>
    %c0_37 = arith.constant 0 : index
    %c0_38 = arith.constant 0 : index
    %c0_39 = arith.constant 0 : index
    %55 = vector.load %arg10[%c0_37, %c0_38, %c0_39] : memref<5x1x128xf32, #tpu.memory_space<vmem>>, vector<1x1x128xf32>
    %56 = vector.shape_cast %55 : vector<1x1x128xf32> to vector<1x128xf32>
    %57 = vector.broadcast %56 : vector<1x128xf32> to vector<16x128xf32>
    %58 = arith.addf %54, %57 : vector<16x128xf32>
    %59 = arith.mulf %58, %58 : vector<16x128xf32>
    %cst_40 = arith.constant dense<0.000000e+00> : vector<16xf32>
    %60 = vector.multi_reduction <add>, %59, %cst_40 [1] : vector<16x128xf32> to vector<16xf32>
    %61 = vector.shape_cast %60 : vector<16xf32> to vector<16x1xf32>
    %cst_41 = arith.constant 1.000000e-24 : f32
    %62 = vector.broadcast %cst_41 : f32 to vector<16x1xf32>
    %63 = arith.maximumf %61, %62 : vector<16x1xf32>
    %64 = math.rsqrt %63 : vector<16x1xf32>
    %65 = vector.broadcast %64 : vector<16x1xf32> to vector<16x128xf32>
    %66 = arith.mulf %58, %65 : vector<16x128xf32>
    %c0_42 = arith.constant 0 : index
    %c0_43 = arith.constant 0 : index
    %c0_44 = arith.constant 0 : index
    %67 = vector.load %arg11[%c0_42, %c0_43, %c0_44] : memref<5x128x128xf32, #tpu.memory_space<vmem>>, vector<1x128x128xf32>
    %68 = vector.shape_cast %67 : vector<1x128x128xf32> to vector<128x128xf32>
    %cst_45 = arith.constant dense<0.000000e+00> : vector<16x128xf32>
    %69 = tpu.matmul %66, %68, %cst_45 {dimension_numbers = #tpu.dot_dimension_numbers<[1], [0], [0], [1], [0, 0, 1, 1], [], []>} : vector<16x128xf32>, vector<128x128xf32>, vector<16x128xf32> -> vector<16x128xf32>
    %cst_46 = arith.constant 0.000000e+00 : f32
    %70 = vector.broadcast %cst_46 : f32 to vector<16x1xf32>
    %71 = arith.cmpf oeq, %39, %70 : vector<16x1xf32>
    %72 = arith.extui %71 : vector<16x1xi1> to vector<16x1xi32>
    %73 = arith.sitofp %72 : vector<16x1xi32> to vector<16x1xf32>
    %74 = vector.broadcast %73 : vector<16x1xf32> to vector<16x128xf32>
    %75 = arith.mulf %74, %69 : vector<16x128xf32>
    %76 = arith.addf %48, %75 : vector<16x128xf32>
    %77 = vector.broadcast %73 : vector<16x1xf32> to vector<16x128xf32>
    %78 = arith.mulf %77, %66 : vector<16x128xf32>
    %79 = arith.addf %49, %78 : vector<16x128xf32>
    %80 = vector.extract_strided_slice %47 {offsets = [0, 128], sizes = [16, 128], strides = [1, 1]} : vector<16x640xf32> to vector<16x128xf32>
    %81 = arith.truncf %80 : vector<16x128xf32> to vector<16x128xbf16>
    %c1 = arith.constant 1 : index
    %c0_47 = arith.constant 0 : index
    %c0_48 = arith.constant 0 : index
    %82 = vector.load %arg9[%c1, %c0_47, %c0_48] : memref<5x128x128xbf16, #tpu.memory_space<vmem>>, vector<1x128x128xbf16>
    %83 = vector.shape_cast %82 : vector<1x128x128xbf16> to vector<128x128xbf16>
    %cst_49 = arith.constant dense<0.000000e+00> : vector<16x128xf32>
    %84 = tpu.matmul %81, %83, %cst_49 {dimension_numbers = #tpu.dot_dimension_numbers<[1], [0], [0], [1], [0, 0, 1, 1], [], []>} : vector<16x128xbf16>, vector<128x128xbf16>, vector<16x128xf32> -> vector<16x128xf32>
    %c1_50 = arith.constant 1 : index
    %c0_51 = arith.constant 0 : index
    %c0_52 = arith.constant 0 : index
    %85 = vector.load %arg10[%c1_50, %c0_51, %c0_52] : memref<5x1x128xf32, #tpu.memory_space<vmem>>, vector<1x1x128xf32>
    %86 = vector.shape_cast %85 : vector<1x1x128xf32> to vector<1x128xf32>
    %87 = vector.broadcast %86 : vector<1x128xf32> to vector<16x128xf32>
    %88 = arith.addf %84, %87 : vector<16x128xf32>
    %89 = arith.mulf %88, %88 : vector<16x128xf32>
    %cst_53 = arith.constant dense<0.000000e+00> : vector<16xf32>
    %90 = vector.multi_reduction <add>, %89, %cst_53 [1] : vector<16x128xf32> to vector<16xf32>
    %91 = vector.shape_cast %90 : vector<16xf32> to vector<16x1xf32>
    %cst_54 = arith.constant 1.000000e-24 : f32
    %92 = vector.broadcast %cst_54 : f32 to vector<16x1xf32>
    %93 = arith.maximumf %91, %92 : vector<16x1xf32>
    %94 = math.rsqrt %93 : vector<16x1xf32>
    %95 = vector.broadcast %94 : vector<16x1xf32> to vector<16x128xf32>
    %96 = arith.mulf %88, %95 : vector<16x128xf32>
    %c1_55 = arith.constant 1 : index
    %c0_56 = arith.constant 0 : index
    %c0_57 = arith.constant 0 : index
    %97 = vector.load %arg11[%c1_55, %c0_56, %c0_57] : memref<5x128x128xf32, #tpu.memory_space<vmem>>, vector<1x128x128xf32>
    %98 = vector.shape_cast %97 : vector<1x128x128xf32> to vector<128x128xf32>
    %cst_58 = arith.constant dense<0.000000e+00> : vector<16x128xf32>
    %99 = tpu.matmul %96, %98, %cst_58 {dimension_numbers = #tpu.dot_dimension_numbers<[1], [0], [0], [1], [0, 0, 1, 1], [], []>} : vector<16x128xf32>, vector<128x128xf32>, vector<16x128xf32> -> vector<16x128xf32>
    %cst_59 = arith.constant 1.000000e+00 : f32
    %100 = vector.broadcast %cst_59 : f32 to vector<16x1xf32>
    %101 = arith.cmpf oeq, %39, %100 : vector<16x1xf32>
    %102 = arith.extui %101 : vector<16x1xi1> to vector<16x1xi32>
    %103 = arith.sitofp %102 : vector<16x1xi32> to vector<16x1xf32>
    %104 = vector.broadcast %103 : vector<16x1xf32> to vector<16x128xf32>
    %105 = arith.mulf %104, %99 : vector<16x128xf32>
    %106 = arith.addf %76, %105 : vector<16x128xf32>
    %107 = vector.broadcast %103 : vector<16x1xf32> to vector<16x128xf32>
    %108 = arith.mulf %107, %96 : vector<16x128xf32>
    %109 = arith.addf %79, %108 : vector<16x128xf32>
    %110 = vector.extract_strided_slice %47 {offsets = [0, 256], sizes = [16, 128], strides = [1, 1]} : vector<16x640xf32> to vector<16x128xf32>
    %111 = arith.truncf %110 : vector<16x128xf32> to vector<16x128xbf16>
    %c2 = arith.constant 2 : index
    %c0_60 = arith.constant 0 : index
    %c0_61 = arith.constant 0 : index
    %112 = vector.load %arg9[%c2, %c0_60, %c0_61] : memref<5x128x128xbf16, #tpu.memory_space<vmem>>, vector<1x128x128xbf16>
    %113 = vector.shape_cast %112 : vector<1x128x128xbf16> to vector<128x128xbf16>
    %cst_62 = arith.constant dense<0.000000e+00> : vector<16x128xf32>
    %114 = tpu.matmul %111, %113, %cst_62 {dimension_numbers = #tpu.dot_dimension_numbers<[1], [0], [0], [1], [0, 0, 1, 1], [], []>} : vector<16x128xbf16>, vector<128x128xbf16>, vector<16x128xf32> -> vector<16x128xf32>
    %c2_63 = arith.constant 2 : index
    %c0_64 = arith.constant 0 : index
    %c0_65 = arith.constant 0 : index
    %115 = vector.load %arg10[%c2_63, %c0_64, %c0_65] : memref<5x1x128xf32, #tpu.memory_space<vmem>>, vector<1x1x128xf32>
    %116 = vector.shape_cast %115 : vector<1x1x128xf32> to vector<1x128xf32>
    %117 = vector.broadcast %116 : vector<1x128xf32> to vector<16x128xf32>
    %118 = arith.addf %114, %117 : vector<16x128xf32>
    %119 = arith.mulf %118, %118 : vector<16x128xf32>
    %cst_66 = arith.constant dense<0.000000e+00> : vector<16xf32>
    %120 = vector.multi_reduction <add>, %119, %cst_66 [1] : vector<16x128xf32> to vector<16xf32>
    %121 = vector.shape_cast %120 : vector<16xf32> to vector<16x1xf32>
    %cst_67 = arith.constant 1.000000e-24 : f32
    %122 = vector.broadcast %cst_67 : f32 to vector<16x1xf32>
    %123 = arith.maximumf %121, %122 : vector<16x1xf32>
    %124 = math.rsqrt %123 : vector<16x1xf32>
    %125 = vector.broadcast %124 : vector<16x1xf32> to vector<16x128xf32>
    %126 = arith.mulf %118, %125 : vector<16x128xf32>
    %c2_68 = arith.constant 2 : index
    %c0_69 = arith.constant 0 : index
    %c0_70 = arith.constant 0 : index
    %127 = vector.load %arg11[%c2_68, %c0_69, %c0_70] : memref<5x128x128xf32, #tpu.memory_space<vmem>>, vector<1x128x128xf32>
    %128 = vector.shape_cast %127 : vector<1x128x128xf32> to vector<128x128xf32>
    %cst_71 = arith.constant dense<0.000000e+00> : vector<16x128xf32>
    %129 = tpu.matmul %126, %128, %cst_71 {dimension_numbers = #tpu.dot_dimension_numbers<[1], [0], [0], [1], [0, 0, 1, 1], [], []>} : vector<16x128xf32>, vector<128x128xf32>, vector<16x128xf32> -> vector<16x128xf32>
    %cst_72 = arith.constant 2.000000e+00 : f32
    %130 = vector.broadcast %cst_72 : f32 to vector<16x1xf32>
    %131 = arith.cmpf oeq, %39, %130 : vector<16x1xf32>
    %132 = arith.extui %131 : vector<16x1xi1> to vector<16x1xi32>
    %133 = arith.sitofp %132 : vector<16x1xi32> to vector<16x1xf32>
    %134 = vector.broadcast %133 : vector<16x1xf32> to vector<16x128xf32>
    %135 = arith.mulf %134, %129 : vector<16x128xf32>
    %136 = arith.addf %106, %135 : vector<16x128xf32>
    %137 = vector.broadcast %133 : vector<16x1xf32> to vector<16x128xf32>
    %138 = arith.mulf %137, %126 : vector<16x128xf32>
    %139 = arith.addf %109, %138 : vector<16x128xf32>
    %140 = vector.extract_strided_slice %47 {offsets = [0, 384], sizes = [16, 128], strides = [1, 1]} : vector<16x640xf32> to vector<16x128xf32>
    %141 = arith.truncf %140 : vector<16x128xf32> to vector<16x128xbf16>
    %c3 = arith.constant 3 : index
    %c0_73 = arith.constant 0 : index
    %c0_74 = arith.constant 0 : index
    %142 = vector.load %arg9[%c3, %c0_73, %c0_74] : memref<5x128x128xbf16, #tpu.memory_space<vmem>>, vector<1x128x128xbf16>
    %143 = vector.shape_cast %142 : vector<1x128x128xbf16> to vector<128x128xbf16>
    %cst_75 = arith.constant dense<0.000000e+00> : vector<16x128xf32>
    %144 = tpu.matmul %141, %143, %cst_75 {dimension_numbers = #tpu.dot_dimension_numbers<[1], [0], [0], [1], [0, 0, 1, 1], [], []>} : vector<16x128xbf16>, vector<128x128xbf16>, vector<16x128xf32> -> vector<16x128xf32>
    %c3_76 = arith.constant 3 : index
    %c0_77 = arith.constant 0 : index
    %c0_78 = arith.constant 0 : index
    %145 = vector.load %arg10[%c3_76, %c0_77, %c0_78] : memref<5x1x128xf32, #tpu.memory_space<vmem>>, vector<1x1x128xf32>
    %146 = vector.shape_cast %145 : vector<1x1x128xf32> to vector<1x128xf32>
    %147 = vector.broadcast %146 : vector<1x128xf32> to vector<16x128xf32>
    %148 = arith.addf %144, %147 : vector<16x128xf32>
    %149 = arith.mulf %148, %148 : vector<16x128xf32>
    %cst_79 = arith.constant dense<0.000000e+00> : vector<16xf32>
    %150 = vector.multi_reduction <add>, %149, %cst_79 [1] : vector<16x128xf32> to vector<16xf32>
    %151 = vector.shape_cast %150 : vector<16xf32> to vector<16x1xf32>
    %cst_80 = arith.constant 1.000000e-24 : f32
    %152 = vector.broadcast %cst_80 : f32 to vector<16x1xf32>
    %153 = arith.maximumf %151, %152 : vector<16x1xf32>
    %154 = math.rsqrt %153 : vector<16x1xf32>
    %155 = vector.broadcast %154 : vector<16x1xf32> to vector<16x128xf32>
    %156 = arith.mulf %148, %155 : vector<16x128xf32>
    %c3_81 = arith.constant 3 : index
    %c0_82 = arith.constant 0 : index
    %c0_83 = arith.constant 0 : index
    %157 = vector.load %arg11[%c3_81, %c0_82, %c0_83] : memref<5x128x128xf32, #tpu.memory_space<vmem>>, vector<1x128x128xf32>
    %158 = vector.shape_cast %157 : vector<1x128x128xf32> to vector<128x128xf32>
    %cst_84 = arith.constant dense<0.000000e+00> : vector<16x128xf32>
    %159 = tpu.matmul %156, %158, %cst_84 {dimension_numbers = #tpu.dot_dimension_numbers<[1], [0], [0], [1], [0, 0, 1, 1], [], []>} : vector<16x128xf32>, vector<128x128xf32>, vector<16x128xf32> -> vector<16x128xf32>
    %cst_85 = arith.constant 3.000000e+00 : f32
    %160 = vector.broadcast %cst_85 : f32 to vector<16x1xf32>
    %161 = arith.cmpf oeq, %39, %160 : vector<16x1xf32>
    %162 = arith.extui %161 : vector<16x1xi1> to vector<16x1xi32>
    %163 = arith.sitofp %162 : vector<16x1xi32> to vector<16x1xf32>
    %164 = vector.broadcast %163 : vector<16x1xf32> to vector<16x128xf32>
    %165 = arith.mulf %164, %159 : vector<16x128xf32>
    %166 = arith.addf %136, %165 : vector<16x128xf32>
    %167 = vector.broadcast %163 : vector<16x1xf32> to vector<16x128xf32>
    %168 = arith.mulf %167, %156 : vector<16x128xf32>
    %169 = arith.addf %139, %168 : vector<16x128xf32>
    %170 = vector.extract_strided_slice %47 {offsets = [0, 512], sizes = [16, 128], strides = [1, 1]} : vector<16x640xf32> to vector<16x128xf32>
    %171 = arith.truncf %170 : vector<16x128xf32> to vector<16x128xbf16>
    %c4 = arith.constant 4 : index
    %c0_86 = arith.constant 0 : index
    %c0_87 = arith.constant 0 : index
    %172 = vector.load %arg9[%c4, %c0_86, %c0_87] : memref<5x128x128xbf16, #tpu.memory_space<vmem>>, vector<1x128x128xbf16>
    %173 = vector.shape_cast %172 : vector<1x128x128xbf16> to vector<128x128xbf16>
    %cst_88 = arith.constant dense<0.000000e+00> : vector<16x128xf32>
    %174 = tpu.matmul %171, %173, %cst_88 {dimension_numbers = #tpu.dot_dimension_numbers<[1], [0], [0], [1], [0, 0, 1, 1], [], []>} : vector<16x128xbf16>, vector<128x128xbf16>, vector<16x128xf32> -> vector<16x128xf32>
    %c4_89 = arith.constant 4 : index
    %c0_90 = arith.constant 0 : index
    %c0_91 = arith.constant 0 : index
    %175 = vector.load %arg10[%c4_89, %c0_90, %c0_91] : memref<5x1x128xf32, #tpu.memory_space<vmem>>, vector<1x1x128xf32>
    %176 = vector.shape_cast %175 : vector<1x1x128xf32> to vector<1x128xf32>
    %177 = vector.broadcast %176 : vector<1x128xf32> to vector<16x128xf32>
    %178 = arith.addf %174, %177 : vector<16x128xf32>
    %179 = arith.mulf %178, %178 : vector<16x128xf32>
    %cst_92 = arith.constant dense<0.000000e+00> : vector<16xf32>
    %180 = vector.multi_reduction <add>, %179, %cst_92 [1] : vector<16x128xf32> to vector<16xf32>
    %181 = vector.shape_cast %180 : vector<16xf32> to vector<16x1xf32>
    %cst_93 = arith.constant 1.000000e-24 : f32
    %182 = vector.broadcast %cst_93 : f32 to vector<16x1xf32>
    %183 = arith.maximumf %181, %182 : vector<16x1xf32>
    %184 = math.rsqrt %183 : vector<16x1xf32>
    %185 = vector.broadcast %184 : vector<16x1xf32> to vector<16x128xf32>
    %186 = arith.mulf %178, %185 : vector<16x128xf32>
    %c4_94 = arith.constant 4 : index
    %c0_95 = arith.constant 0 : index
    %c0_96 = arith.constant 0 : index
    %187 = vector.load %arg11[%c4_94, %c0_95, %c0_96] : memref<5x128x128xf32, #tpu.memory_space<vmem>>, vector<1x128x128xf32>
    %188 = vector.shape_cast %187 : vector<1x128x128xf32> to vector<128x128xf32>
    %cst_97 = arith.constant dense<0.000000e+00> : vector<16x128xf32>
    %189 = tpu.matmul %186, %188, %cst_97 {dimension_numbers = #tpu.dot_dimension_numbers<[1], [0], [0], [1], [0, 0, 1, 1], [], []>} : vector<16x128xf32>, vector<128x128xf32>, vector<16x128xf32> -> vector<16x128xf32>
    %cst_98 = arith.constant 4.000000e+00 : f32
    %190 = vector.broadcast %cst_98 : f32 to vector<16x1xf32>
    %191 = arith.cmpf oeq, %39, %190 : vector<16x1xf32>
    %192 = arith.extui %191 : vector<16x1xi1> to vector<16x1xi32>
    %193 = arith.sitofp %192 : vector<16x1xi32> to vector<16x1xf32>
    %194 = vector.broadcast %193 : vector<16x1xf32> to vector<16x128xf32>
    %195 = arith.mulf %194, %189 : vector<16x128xf32>
    %196 = arith.addf %166, %195 : vector<16x128xf32>
    %197 = vector.broadcast %193 : vector<16x1xf32> to vector<16x128xf32>
    %198 = arith.mulf %197, %186 : vector<16x128xf32>
    %199 = arith.addf %169, %198 : vector<16x128xf32>
    %c0_99 = arith.constant 0 : index
    %c0_100 = arith.constant 0 : index
    %200 = vector.load %arg14[%c0_99, %c0_100] : memref<16x128xf32, #tpu.memory_space<vmem>>, vector<16x128xf32>
    tpu.vector_store %arg14[%c0_99, %c0_100], %196 {strides = array<i32>} : memref<16x128xf32, #tpu.memory_space<vmem>>, vector<16x128xf32>,
    %c0_101 = arith.constant 0 : index
    %c0_102 = arith.constant 0 : index
    %201 = vector.load %arg15[%c0_101, %c0_102] : memref<16x128xf32, #tpu.memory_space<vmem>>, vector<16x128xf32>
    tpu.vector_store %arg15[%c0_101, %c0_102], %199 {strides = array<i32>} : memref<16x128xf32, #tpu.memory_space<vmem>>, vector<16x128xf32>,
    return
  }
  func.func @transform_0(%arg0: i32) -> (i32, i32) {
    %c0_i32 = arith.constant 0 : i32
    %c0_i32_0 = arith.constant 0 : i32
    return %arg0, %c0_i32 : i32, i32
  }
  func.func @transform_1(%arg0: i32) -> (i32, i32) {
    %c0_i32 = arith.constant 0 : i32
    %c0_i32_0 = arith.constant 0 : i32
    %c0_i32_1 = arith.constant 0 : i32
    return %c0_i32, %c0_i32_0 : i32, i32
  }
  func.func @transform_2(%arg0: i32) -> (i32, i32) {
    %c0_i32 = arith.constant 0 : i32
    %c0_i32_0 = arith.constant 0 : i32
    %c0_i32_1 = arith.constant 0 : i32
    return %c0_i32, %c0_i32_0 : i32, i32
  }
  func.func @transform_3(%arg0: i32) -> (i32, i32) {
    %c0_i32 = arith.constant 0 : i32
    %c0_i32_0 = arith.constant 0 : i32
    %c0_i32_1 = arith.constant 0 : i32
    return %c0_i32, %c0_i32_0 : i32, i32
  }
  func.func @transform_4(%arg0: i32) -> (i32, i32) {
    %c0_i32 = arith.constant 0 : i32
    %c0_i32_0 = arith.constant 0 : i32
    %c0_i32_1 = arith.constant 0 : i32
    return %c0_i32, %c0_i32_0 : i32, i32
  }
  func.func @transform_5(%arg0: i32) -> (i32, i32) {
    %c0_i32 = arith.constant 0 : i32
    %c0_i32_0 = arith.constant 0 : i32
    %c0_i32_1 = arith.constant 0 : i32
    return %c0_i32, %c0_i32_0 : i32, i32
  }
  func.func @transform_6(%arg0: i32) -> (i32, i32) {
    %c0_i32 = arith.constant 0 : i32
    %c0_i32_0 = arith.constant 0 : i32
    %c0_i32_1 = arith.constant 0 : i32
    return %c0_i32, %c0_i32_0 : i32, i32
  }
  func.func @transform_7(%arg0: i32) -> (i32, i32) {
    %c0_i32 = arith.constant 0 : i32
    %c0_i32_0 = arith.constant 0 : i32
    %c0_i32_1 = arith.constant 0 : i32
    return %c0_i32, %c0_i32_0 : i32, i32
  }
  func.func @transform_8(%arg0: i32) -> (i32, i32, i32) {
    %c0_i32 = arith.constant 0 : i32
    %c0_i32_0 = arith.constant 0 : i32
    %c0_i32_1 = arith.constant 0 : i32
    %c0_i32_2 = arith.constant 0 : i32
    return %c0_i32, %c0_i32_0, %c0_i32_1 : i32, i32, i32
  }
  func.func @transform_9(%arg0: i32) -> (i32, i32, i32) {
    %c0_i32 = arith.constant 0 : i32
    %c0_i32_0 = arith.constant 0 : i32
    %c0_i32_1 = arith.constant 0 : i32
    %c0_i32_2 = arith.constant 0 : i32
    return %c0_i32, %c0_i32_0, %c0_i32_1 : i32, i32, i32
  }
  func.func @transform_10(%arg0: i32) -> (i32, i32, i32) {
    %c0_i32 = arith.constant 0 : i32
    %c0_i32_0 = arith.constant 0 : i32
    %c0_i32_1 = arith.constant 0 : i32
    %c0_i32_2 = arith.constant 0 : i32
    return %c0_i32, %c0_i32_0, %c0_i32_1 : i32, i32, i32
  }
  func.func @transform_11(%arg0: i32) -> (i32, i32) {
    %c0_i32 = arith.constant 0 : i32
    %c0_i32_0 = arith.constant 0 : i32
    return %arg0, %c0_i32 : i32, i32
  }
  func.func @transform_12(%arg0: i32) -> (i32, i32) {
    %c0_i32 = arith.constant 0 : i32
    %c0_i32_0 = arith.constant 0 : i32
    return %arg0, %c0_i32 : i32, i32
  }
  func.func @transform_13(%arg0: i32) -> (i32, i32) {
    %c0_i32 = arith.constant 0 : i32
    %c0_i32_0 = arith.constant 0 : i32
    return %arg0, %c0_i32 : i32, i32
  }
  func.func @transform_14(%arg0: i32) -> (i32, i32) {
    %c0_i32 = arith.constant 0 : i32
    %c0_i32_0 = arith.constant 0 : i32
    return %arg0, %c0_i32 : i32, i32
  }
}

</mosaic_0001>

<bundles_post_ra>
// kernel: tpu_custom_call.1
= control target key start
LH: loop header
LB: loop body
LE: loop exit
PB: predicated region body
PF: predicated region fallthrough
CT: control target
= control target key end

     0   :  { %20 = vsyncpa [#allocation3], 0  ;;  %s4060_s0 = inlined_call_operand.hbm [shape: bf16[16,64], index: 0, kind: input, shape index: {}]   ;;  %s4061_s1 = inlined_call_operand.hbm [shape: bf16[64,128], index: 1, kind: input, shape index: {}]   ;;  %s4062_s2 = inlined_call_operand.hbm [shape: f32[1,128], index: 2, kind: input, shape index: {}]   ;;  %s4063_s3 = inlined_call_operand.hbm [shape: bf16[128,128], index: 3, kind: input, shape index: {}]   ;;  %s4064_s4 = inlined_call_operand.hbm [shape: f32[1,128], index: 4, kind: input, shape index: {}]   ;;  %s4065_s5 = inlined_call_operand.hbm [shape: f32[128,128], index: 5, kind: input, shape index: {}]   ;;  %s4066_s6 = inlined_call_operand.hbm [shape: bf16[128,640], index: 6, kind: input, shape index: {}]   ;;  %s4067_s7 = inlined_call_operand.hbm [shape: f32[1,640], index: 7, kind: input, shape index: {}]   ;;  %s4068_s8 = inlined_call_operand.hbm [shape: bf16[5,128,128], index: 8, kind: input, shape index: {}]   ;;  %s4069_s9 = inlined_call_operand.hbm [shape: f32[5,1,128], index: 9, kind: input, shape index: {}]   ;;  %s4070_s10 = inlined_call_operand.hbm [shape: f32[5,128,128], index: 10, kind: input, shape index: {}]   ;;  %s4071_s11 = inlined_call_operand.hbm [shape: f32[16,128], index: 11, kind: output, shape index: {0}]   ;;  %s4072_s12 = inlined_call_operand.hbm [shape: f32[16,128], index: 12, kind: output, shape index: {1}]   ;;  %s4073_s13 = inlined_call_operand.hbm [shape: f32[16,128], index: 13, kind: output, shape index: {2}]   ;;  %s4074_s14 = inlined_call_operand.hbm [shape: f32[16,128], index: 14, kind: output, shape index: {3}]  }
   0x1   :  { %21 = vsyncpa [#allocation6], 0 }
   0x2   :  { %22 = vsyncpa [#allocation9], 0 }
   0x3   :  { %23 = vsyncpa [#allocation12], 0 }
   0x4   :  { %24 = vsyncpa [#allocation15], 0 }
   0x5   :  { %25 = vsyncpa [#allocation18], 0 }
   0x6   :  { %26 = vsyncpa [#allocation4], 0 }
   0x7   :  { %27 = vsyncpa [#allocation22], 0 }
   0x8   :  { %28 = vsyncpa [#allocation25], 0  ;;  %s3524_s29 = smov [#allocation5]   ;;  %s3525_s15 = smov [#allocation8]  }
   0x9   :  { %s46_s30 = sshll.u32 %s3524_s29, 4  ;;  %s68_s16 = sshll.u32 %s3525_s15, 4  ;;  %s47_s30 = int_to_ptr.vmem [resolvable:$true] %s46_s30  ;;  %s3625_s16 = int_to_ptr.vmem [resolvable:$true] %s68_s16 }
   0xa   :  { %s3176_s19 = scalar_lea.hbm %s4061_s1, 512 }
   0xb   :  { %p3177_p0 = scmp.ne.s32.totalorder %s4061_s1, %s3176_s19  ;;  %p3180_p1 = scmp.lt.u32.totalorder %s3176_s19, %s4061_s1 }
   0xd   :  { %p3182_p2 = pnand %p3180_p1, %p3177_p0 }
   0xf   :  { %3185 = shalt.err (!%p3182_p2)
}
  0x10   :  { %s3186_s24 = scalar_lea.vmem %s47_s30, 512  ;;  %p3191_p4 = scmp.lt.s32.totalorder %s47_s30, %s47_s30 }
  0x11   :  { %p3187_p3 = scmp.ne.s32.totalorder %s47_s30, %s3186_s24  ;;  %p3192_p5 = scmp.lt.s32.totalorder %s3186_s24, %s3186_s24 }
  0x13   :  { %p3193_p6 = por %p3192_p5, %p3191_p4 }
  0x15   :  { %p3194_p7 = pnand %p3193_p6, %p3187_p3 }
  0x17   :  { %3197 = shalt.err (!%p3194_p7)
}
  0x18   :  { %s3526_s25 = smov 64   ;;  %s3527_s26 = smov 4  }
  0x19   :  { %52 = dma.hbm_to_vmem [thread:$0]  %s4061_s1, 512, %s47_s30, [#allocation6], %s3526_s25, %s3526_s25, %s3527_s26  }
  0x1a   :  { %s3198_s17 = scalar_lea.hbm %s4063_s3, 1024 }
  0x1b   :  { %p3199_p8 = scmp.ne.s32.totalorder %s4063_s3, %s3198_s17  ;;  %p3202_p9 = scmp.lt.u32.totalorder %s3198_s17, %s4063_s3 }
  0x1d   :  { %p3204_p10 = pnand %p3202_p9, %p3199_p8 }
  0x1f   :  { %3207 = shalt.err (!%p3204_p10)
}
  0x20   :  { %s3208_s22 = scalar_lea.vmem %s3625_s16, 1024  ;;  %p3213_p12 = scmp.lt.s32.totalorder %s3625_s16, %s3625_s16 }
  0x21   :  { %p3209_p11 = scmp.ne.s32.totalorder %s3625_s16, %s3208_s22  ;;  %p3214_p13 = scmp.lt.s32.totalorder %s3208_s22, %s3208_s22 }
  0x23   :  { %p3215_p0 = por %p3214_p13, %p3213_p12 }
  0x25   :  { %p3216_p1 = pnand %p3215_p0, %p3209_p11 }
  0x27   :  { %3219 = shalt.err (!%p3216_p1)
}
  0x28   :  { %74 = dma.hbm_to_vmem [thread:$0]  %s4063_s3, 1024, %s3625_s16, [#allocation9], %s3526_s25, %s3526_s25, %s3527_s26  }
  0x29   :  { %s3528_s23 = smov [#allocation11]   ;;  %s3220_s29 = scalar_lea.hbm %s4065_s5, 2048 }
  0x2a   :  { %s90_s24 = sshll.u32 %s3528_s23, 4  ;;  %p3221_p2 = scmp.ne.s32.totalorder %s4065_s5, %s3220_s29  ;;  %s91_s24 = int_to_ptr.vmem [resolvable:$true] %s90_s24 }
  0x2b   :  { %p3224_p3 = scmp.lt.u32.totalorder %s3220_s29, %s4065_s5 }
  0x2d   :  { %p3226_p4 = pnand %p3224_p3, %p3221_p2 }
  0x2f   :  { %3229 = shalt.err (!%p3226_p4)
}
  0x30   :  { %s3230_s20 = scalar_lea.vmem %s91_s24, 2048  ;;  %p3235_p6 = scmp.lt.s32.totalorder %s91_s24, %s91_s24 }
  0x31   :  { %p3231_p5 = scmp.ne.s32.totalorder %s91_s24, %s3230_s20  ;;  %p3236_p7 = scmp.lt.s32.totalorder %s3230_s20, %s3230_s20 }
  0x33   :  { %p3237_p8 = por %p3236_p7, %p3235_p6 }
  0x35   :  { %p3238_p9 = pnand %p3237_p8, %p3231_p5 }
  0x37   :  { %3241 = shalt.err (!%p3238_p9)
}
  0x38   :  { %s3529_s3 = smov 128   ;;  %s3530_s16 = smov 8  }
  0x39   :  { %96 = dma.hbm_to_vmem [thread:$0]  %s4065_s5, 2048, %s91_s24, [#allocation12], %s3529_s3, %s3529_s3, %s3530_s16  }
  0x3a   :  { %s3531_s1 = smov [#allocation14]   ;;  %s3532_s23 = smov [#allocation17]  }
  0x3b   :  { %s115_s30 = sshll.u32 %s3531_s1, 4  ;;  %s136_s27 = sshll.u32 %s3532_s23, 4  ;;  %s116_s30 = int_to_ptr.vmem [resolvable:$true] %s115_s30  ;;  %s137_s27 = int_to_ptr.vmem [resolvable:$true] %s136_s27 }
  0x3c   :  { %s3242_s15 = scalar_lea.hbm %s4067_s7, 80 }
  0x3d   :  { %p3243_p10 = scmp.ne.s32.totalorder %s4067_s7, %s3242_s15  ;;  %p3246_p11 = scmp.lt.u32.totalorder %s3242_s15, %s4067_s7 }
  0x3f   :  { %p3248_p12 = pnand %p3246_p11, %p3243_p10 }
  0x41   :  { %3251 = shalt.err (!%p3248_p12)
}
  0x42   :  { %s3252_s5 = scalar_lea.vmem %s116_s30, 80  ;;  %s3256_s24 = scalar_lea.vmem %s116_s30, 96 }
  0x43   :  { %p3253_p13 = scmp.ne.s32.totalorder %s116_s30, %s3252_s5  ;;  %p3257_p0 = scmp.lt.s32.totalorder %s116_s30, %s116_s30 }
  0x44   :  { %p3258_p1 = scmp.lt.s32.totalorder %s3256_s24, %s3252_s5 }
  0x46   :  { %p3259_p2 = por %p3258_p1, %p3257_p0 }
  0x48   :  { %p3260_p3 = pnand %p3259_p2, %p3253_p13 }
  0x4a   :  { %3263 = shalt.err (!%p3260_p3)
}
  0x4b   :  { %118 = dma.hbm_to_vmem [thread:$0]  %s4067_s7, 80, %s116_s30, [#allocation15]  }
  0x4c   :  { %s3264_s28 = scalar_lea.hbm %s4069_s9, 80 }
  0x4d   :  { %p3265_p4 = scmp.ne.s32.totalorder %s4069_s9, %s3264_s28  ;;  %p3268_p5 = scmp.lt.u32.totalorder %s3264_s28, %s4069_s9 }
  0x4f   :  { %p3270_p6 = pnand %p3268_p5, %p3265_p4 }
  0x51   :  { %3273 = shalt.err (!%p3270_p6)
}
  0x52   :  { %s3274_s19 = scalar_lea.vmem %s137_s27, 80  ;;  %s3278_s20 = scalar_lea.vmem %s137_s27, 96 }
  0x53   :  { %p3275_p7 = scmp.ne.s32.totalorder %s137_s27, %s3274_s19  ;;  %p3279_p8 = scmp.lt.s32.totalorder %s137_s27, %s137_s27 }
  0x54   :  { %p3280_p9 = scmp.lt.s32.totalorder %s3278_s20, %s3274_s19 }
  0x56   :  { %p3281_p10 = por %p3280_p9, %p3279_p8 }
  0x58   :  { %p3282_p11 = pnand %p3281_p10, %p3275_p7 }
  0x5a   :  { %3285 = shalt.err (!%p3282_p11)
}
  0x5b   :  { %s3533_s7 = smov 16   ;;  %s3534_s30 = smov 1  }
  0x5c   :  { %142 = dma.hbm_to_vmem [thread:$0]  %s4069_s9, 80, %s137_s27, [#allocation18], %s3533_s7, %s3533_s7, %s3534_s30  }
  0x5d   :  { %s3535_s21 = smov [#allocation2]   ;;  %s3536_s1 = smov [#allocation7]  }
  0x5e   :  { %s34_s22 = sshll.u32 %s3535_s21, 4  ;;  %s59_s23 = sshll.u32 %s3536_s1, 4  ;;  %s35_s22 = int_to_ptr.vmem [resolvable:$true] %s34_s22  ;;  %s60_s23 = int_to_ptr.vmem [resolvable:$true] %s59_s23 }
  0x5f   :  { %s3286_s15 = scalar_lea.hbm %s4060_s0, 128 }
  0x60   :  { %p3287_p12 = scmp.ne.s32.totalorder %s4060_s0, %s3286_s15  ;;  %p3290_p13 = scmp.lt.u32.totalorder %s3286_s15, %s4060_s0 }
  0x62   :  { %p3292_p0 = pnand %p3290_p13, %p3287_p12 }
  0x64   :  { %3295 = shalt.err (!%p3292_p0)
}
  0x65   :  { %s3296_s9 = scalar_lea.vmem %s35_s22, 128  ;;  %p3301_p2 = scmp.lt.s32.totalorder %s35_s22, %s35_s22 }
  0x66   :  { %p3297_p1 = scmp.ne.s32.totalorder %s35_s22, %s3296_s9  ;;  %p3302_p3 = scmp.lt.s32.totalorder %s3296_s9, %s3296_s9 }
  0x68   :  { %p3303_p4 = por %p3302_p3, %p3301_p2 }
  0x6a   :  { %p3304_p5 = pnand %p3303_p4, %p3297_p1 }
  0x6c   :  { %3307 = shalt.err (!%p3304_p5)
}
  0x6d   :  { %40 = dma.hbm_to_vmem [thread:$0]  %s4060_s0, 128, %s35_s22, [#allocation3], %s3526_s25, %s3526_s25, %s3527_s26  }
  0x6e   :  { %s3308_s24 = scalar_lea.hbm %s4062_s2, 16 }
  0x6f   :  { %p3309_p6 = scmp.ne.s32.totalorder %s4062_s2, %s3308_s24  ;;  %p3312_p7 = scmp.lt.u32.totalorder %s3308_s24, %s4062_s2 }
  0x71   :  { %p3314_p8 = pnand %p3312_p7, %p3309_p6 }
  0x73   :  { %3317 = shalt.err (!%p3314_p8)
}
  0x74   :  { %s3318_s15 = scalar_lea.vmem %s60_s23, 16  ;;  %s3322_s17 = scalar_lea.vmem %s60_s23, 32 }
  0x75   :  { %p3319_p9 = scmp.ne.s32.totalorder %s60_s23, %s3318_s15  ;;  %p3323_p10 = scmp.lt.s32.totalorder %s60_s23, %s60_s23 }
  0x76   :  { %p3324_p11 = scmp.lt.s32.totalorder %s3322_s17, %s3318_s15 }
  0x78   :  { %p3325_p12 = por %p3324_p11, %p3323_p10 }
  0x7a   :  { %p3326_p13 = pnand %p3325_p12, %p3319_p9 }
  0x7c   :  { %3329 = shalt.err (!%p3326_p13)
}
  0x7d   :  { %62 = dma.hbm_to_vmem [thread:$0]  %s4062_s2, 16, %s60_s23, [#allocation6]  }
  0x7e   :  { %s3537_s18 = smov [#allocation10]   ;;  %s3538_s20 = smov [#allocation13]  }
  0x7f   :  { %s81_s19 = sshll.u32 %s3537_s18, 4  ;;  %s102_s9 = sshll.u32 %s3538_s20, 4  ;;  %s82_s19 = int_to_ptr.vmem [resolvable:$true] %s81_s19  ;;  %s103_s9 = int_to_ptr.vmem [resolvable:$true] %s102_s9 }
  0x80   :  { %s3330_s30 = scalar_lea.hbm %s4064_s4, 16 }
  0x81   :  { %p3331_p0 = scmp.ne.s32.totalorder %s4064_s4, %s3330_s30  ;;  %p3334_p1 = scmp.lt.u32.totalorder %s3330_s30, %s4064_s4 }
  0x83   :  { %p3336_p2 = pnand %p3334_p1, %p3331_p0 }
  0x85   :  { %3339 = shalt.err (!%p3336_p2)
}
  0x86   :  { %s3340_s2 = scalar_lea.vmem %s82_s19, 16  ;;  %s3344_s23 = scalar_lea.vmem %s82_s19, 32 }
  0x87   :  { %p3341_p3 = scmp.ne.s32.totalorder %s82_s19, %s3340_s2  ;;  %p3345_p4 = scmp.lt.s32.totalorder %s82_s19, %s82_s19 }
  0x88   :  { %p3346_p5 = scmp.lt.s32.totalorder %s3344_s23, %s3340_s2 }
  0x8a   :  { %p3347_p6 = por %p3346_p5, %p3345_p4 }
  0x8c   :  { %p3348_p7 = pnand %p3347_p6, %p3341_p3 }
  0x8e   :  { %3351 = shalt.err (!%p3348_p7)
}
  0x8f   :  { %84 = dma.hbm_to_vmem [thread:$0]  %s4064_s4, 16, %s82_s19, [#allocation9]  }
  0x90   :  { %s3352_s0 = scalar_lea.hbm %s4066_s6, 5120 }
  0x91   :  { %p3353_p8 = scmp.ne.s32.totalorder %s4066_s6, %s3352_s0  ;;  %p3356_p9 = scmp.lt.u32.totalorder %s3352_s0, %s4066_s6 }
  0x93   :  { %p3358_p10 = pnand %p3356_p9, %p3353_p8 }
  0x95   :  { %3361 = shalt.err (!%p3358_p10)
}
  0x96   :  { %s3362_s7 = scalar_lea.vmem %s103_s9, 5120  ;;  %p3367_p12 = scmp.lt.s32.totalorder %s103_s9, %s103_s9 }
  0x97   :  { %p3363_p11 = scmp.ne.s32.totalorder %s103_s9, %s3362_s7  ;;  %p3368_p13 = scmp.lt.s32.totalorder %s3362_s7, %s3362_s7 }
  0x99   :  { %p3369_p0 = por %p3368_p13, %p3367_p12 }
  0x9b   :  { %p3370_p1 = pnand %p3369_p0, %p3363_p11 }
  0x9d   :  { %3373 = shalt.err (!%p3370_p1)
}
  0x9e   :  { %s3539_s4 = smov 320   ;;  %s3540_s19 = smov 20  }
  0x9f   :  { %108 = dma.hbm_to_vmem [thread:$0]  %s4066_s6, 5120, %s103_s9, [#allocation12], %s3539_s4, %s3539_s4, %s3540_s19  }
  0xa0   :  { %s3541_s24 = smov [#allocation16]   ;;  %s3542_s1 = smov [#allocation19]  }
  0xa1   :  { %s124_s21 = sshll.u32 %s3541_s24, 4  ;;  %s148_s2 = sshll.u32 %s3542_s1, 4  ;;  %s125_s21 = int_to_ptr.vmem [resolvable:$true] %s124_s21  ;;  %s149_s2 = int_to_ptr.vmem [resolvable:$true] %s148_s2 }
  0xa2   :  { %s3374_s29 = scalar_lea.hbm %s4068_s8, 5120 }
  0xa3   :  { %p3375_p2 = scmp.ne.s32.totalorder %s4068_s8, %s3374_s29  ;;  %p3378_p3 = scmp.lt.u32.totalorder %s3374_s29, %s4068_s8 }
  0xa5   :  { %p3380_p4 = pnand %p3378_p3, %p3375_p2 }
  0xa7   :  { %3383 = shalt.err (!%p3380_p4)
}
  0xa8   :  { %s3384_s6 = scalar_lea.vmem %s125_s21, 5120  ;;  %p3389_p6 = scmp.lt.s32.totalorder %s125_s21, %s125_s21 }
  0xa9   :  { %p3385_p5 = scmp.ne.s32.totalorder %s125_s21, %s3384_s6  ;;  %p3390_p7 = scmp.lt.s32.totalorder %s3384_s6, %s3384_s6 }
  0xab   :  { %p3391_p8 = por %p3390_p7, %p3389_p6 }
  0xad   :  { %p3392_p9 = pnand %p3391_p8, %p3385_p5 }
  0xaf   :  { %3395 = shalt.err (!%p3392_p9)
}
  0xb0   :  { %130 = dma.hbm_to_vmem [thread:$0]  %s4068_s8, 5120, %s125_s21, [#allocation15], %s3526_s25, %s3526_s25, %s3527_s26  }
  0xb1   :  { %s3396_s7 = scalar_lea.hbm %s4070_s10, 10240 }
  0xb2   :  { %p3397_p10 = scmp.ne.s32.totalorder %s4070_s10, %s3396_s7  ;;  %p3400_p11 = scmp.lt.u32.totalorder %s3396_s7, %s4070_s10 }
  0xb4   :  { %p3402_p12 = pnand %p3400_p11, %p3397_p10 }
  0xb6   :  { %3405 = shalt.err (!%p3402_p12)
}
  0xb7   :  { %s3406_s24 = scalar_lea.vmem %s149_s2, 10240  ;;  %p3411_p0 = scmp.lt.s32.totalorder %s149_s2, %s149_s2 }
  0xb8   :  { %p3407_p13 = scmp.ne.s32.totalorder %s149_s2, %s3406_s24  ;;  %p3412_p1 = scmp.lt.s32.totalorder %s3406_s24, %s3406_s24 }
  0xba   :  { %p3413_p2 = por %p3412_p1, %p3411_p0 }
  0xbc   :  { %p3414_p3 = pnand %p3413_p2, %p3407_p13 }
  0xbe   :  { %3417 = shalt.err (!%p3414_p3)
}
  0xbf   :  { %154 = dma.hbm_to_vmem [thread:$0]  %s4070_s10, 10240, %s149_s2, [#allocation18], %s3529_s3, %s3529_s3, %s3530_s16  }
  0xc0   :  { %3506 = dma.done.wait [#allocation3], 128  }
  0xc1   :  { %3507 = vsyncadd [#allocation3], 4294967168 }
  0xc2   :  { %3508 = dma.done.wait [#allocation6], 528  }
  0xc3   :  { %3509 = vsyncadd [#allocation6], 4294966768 }
  0xc4   :  { %3510 = dma.done.wait [#allocation9], 1040  }
  0xc5   :  { %3511 = vsyncadd [#allocation9], 4294966256 }
  0xc6   :  { %3512 = dma.done.wait [#allocation12], 7168  }
  0xc7   :  { %3513 = vsyncadd [#allocation12], 4294960128 }
  0xc8   :  { %3514 = dma.done.wait [#allocation15], 5200  }
  0xc9   :  { %3515 = vsyncadd [#allocation15], 4294962096 }
  0xca   :  { %3516 = dma.done.wait [#allocation18], 10320  }
  0xcb   :  { %3517 = vsyncadd [#allocation18], 4294956976  ;;  %v3543_v0 = vmov 0.0   ;;  %vm3544_vm0 = vmmov 0   ;;  %v3043_v1 = vld [vmem:[#allocation5] sm:$0xff]   ;;  %v3044_v2 = vld [vmem:[#allocation5 + $0x8] sm:$0xff]  }
  0xcc   :  { %2463 = vmatprep.subr.bf16.mxu0 %v3543_v0  ;;  %2471 = vmatprep.mubr.msk.bf16.mxu0 %vm3544_vm0, %v3543_v0  ;;  %v3048_v3 = vld [vmem:[#allocation8] sm:$0xff]   ;;  %v3045_v4 = vld [vmem:[#allocation5 + $0x10] sm:$0xff]   ;;  %v3046_v6 = vld [vmem:[#allocation5 + $0x18] sm:$0xff]   ;;  %vm235_vm1 = vcmask 523264   ;;  %s3546_s10 = smov [#allocation21]   ;;  %s3547_s21 = smov [#allocation20]  }
  0xcd   :  { %2475 = vmatprep.subr.bf16.mxu1 %v3543_v0  ;;  %2491 = vmatprep.mubr.msk.bf16.mxu1 %vm3544_vm0, %v3543_v0  ;;  %v3049_v5 = vld [vmem:[#allocation8 + $0x8] sm:$0xff]   ;;  %v3047_v7 = vld [vmem:[#allocation2] sm:$0xff]   ;;  %v3052_v10 = vld [vmem:[#allocation8 + $0x20] sm:$0xff]   ;;  %s2124_s26 = sshll.u32 %s3546_s10, 4  ;;  %s2112_s1 = sshll.u32 %s3547_s21, 4  ;;  %s2125_s26 = int_to_ptr.vmem [resolvable:$true] %s2124_s26  ;;  %s3969_s1 = int_to_ptr.vmem [resolvable:$true] %s2112_s1 }
  0xce   :  { %2464 = vmatpush3.bf16.msra.mxu0 %v3043_v1  ;;  %2476 = vmatpush3.bf16.msra.mxu1 %v3048_v3  ;;  %v3050_v8 = vld [vmem:[#allocation8 + $0x10] sm:$0xff]   ;;  %v3051_v9 = vld [vmem:[#allocation8 + $0x18] sm:$0xff]   ;;  %v3053_v11 = vld [vmem:[#allocation8 + $0x28] sm:$0xff]   ;;  %s3418_s2 = scalar_lea.vmem %s2125_s26, 256  ;;  %p3423_p5 = scmp.lt.s32.totalorder %s2125_s26, %s2125_s26 }
  0xcf   :  { %2465 = vmatprep.subr.bf16.mxu0 %v3543_v0  ;;  %2477 = vmatprep.subr.bf16.mxu1 %v3543_v0  ;;  %v3054_v12 = vld [vmem:[#allocation8 + $0x30] sm:$0xff]   ;;  %v3055_v13 = vld [vmem:[#allocation8 + $0x38] sm:$0xff]   ;;  %v407_v24 = vld [vmem:[#allocation11] sm:$0xff]  ;;  %p3419_p4 = scmp.ne.s32.totalorder %s2125_s26, %s3418_s2  ;;  %p3424_p6 = scmp.lt.s32.totalorder %s3418_s2, %s3418_s2 }
  0xd0   :  { %v2176_v14 = vld [vmem:[#allocation7] ss:$0 sm:$0xff]  ;;  %v408_v25 = vld [vmem:[#allocation11 + $0x8] sm:$0xff]  ;;  %v3056_v26 = vld [vmem:[#allocation13] ss:$20 sps:$4 sm:$0xff]  }
  0xd1   :  { %v2825_v27 = vpack.c.bf16 %v408_v25, %v407_v24  ;;  %v3058_v28 = vld [vmem:[#allocation13 + $0x4] ss:$20 sps:$4 sm:$0xff]   ;;  %v409_v29 = vld [vmem:[#allocation11 + $0x10] sm:$0xff]  ;;  %v3061_v32 = vld [vmem:[#allocation13 + $0x2c] ss:$20 sps:$4 sm:$0xff]   ;;  %p3425_p7 = por %p3424_p6, %p3423_p5 }
  0xd2   :  { %2466 = vmatpush3.bf16.msra.mxu0 %v3044_v2  ;;  %2478 = vmatpush3.bf16.msra.mxu1 %v3049_v5  ;;  %v410_v30 = vld [vmem:[#allocation11 + $0x18] sm:$0xff]  ;;  %v411_v33 = vld [vmem:[#allocation11 + $0x20] sm:$0xff]  ;;  %v412_v34 = vld [vmem:[#allocation11 + $0x28] sm:$0xff] }
  0xd3   :  { %2467 = vmatprep.subr.bf16.mxu0 %v3543_v0  ;;  %2479 = vmatprep.subr.bf16.mxu1 %v3543_v0  ;;  %v2829_v31 = vpack.c.bf16 %v410_v30, %v409_v29  ;;  %v3059_v35 = vld [vmem:[#allocation13 + $0x28] ss:$20 sps:$4 sm:$0xff]   ;;  %v2833_v36 = vpack.c.bf16 %v412_v34, %v411_v33  ;;  %v413_v38 = vld [vmem:[#allocation11 + $0x30] sm:$0xff]  ;;  %v3065_v52 = vld [vmem:[#allocation13 + $0x78] ss:$20 sps:$4 sm:$0xff]   ;;  %p3426_p8 = pnand %p3425_p7, %p3419_p4 }
  0xd4   :  { %v3064_v37 = vld [vmem:[#allocation13 + $0x54] ss:$20 sps:$4 sm:$0xff]   ;;  %v414_v39 = vld [vmem:[#allocation11 + $0x38] sm:$0xff]  ;;  %v3062_v40 = vld [vmem:[#allocation13 + $0x50] ss:$20 sps:$4 sm:$0xff]  }
  0xd5   :  { %v2837_v41 = vpack.c.bf16 %v414_v39, %v413_v38  ;;  %v2183_v42 = vld [vmem:[#allocation10] ss:$0 sm:$0xff]  ;;  %v415_v53 = vld [vmem:[#allocation11 + $0x40] sm:$0xff]  ;;  %v416_v54 = vld [vmem:[#allocation11 + $0x48] sm:$0xff] }
  0xd6   :  { %2468 = vmatpush3.bf16.msra.mxu0 %v3045_v4  ;;  %2480 = vmatpush3.bf16.msra.mxu1 %v3050_v8  ;;  %v3067_v51 = vld [vmem:[#allocation13 + $0x7c] ss:$20 sps:$4 sm:$0xff]   ;;  %v2841_v55 = vpack.c.bf16 %v416_v54, %v415_v53  ;;  %v3070_v56 = vld [vmem:[#allocation13 + $0xa4] ss:$20 sps:$4 sm:$0xff]   ;;  %v3068_v57 = vld [vmem:[#allocation13 + $0xa0] ss:$20 sps:$4 sm:$0xff]  }
  0xd7   :  { %2469 = vmatprep.subr.bf16.mxu0 %v3543_v0  ;;  %2481 = vmatprep.subr.bf16.mxu1 %v3543_v0  ;;  %v417_v58 = vld [vmem:[#allocation11 + $0x50] sm:$0xff]  ;;  %v418_v59 = vld [vmem:[#allocation11 + $0x58] sm:$0xff]  ;;  %v3073_v62 = vld [vmem:[#allocation13 + $0xcc] ss:$20 sps:$4 sm:$0xff]  }
  0xd8   :  { %v2845_v60 = vpack.c.bf16 %v418_v59, %v417_v58  ;;  %v3071_v61 = vld [vmem:[#allocation13 + $0xc8] ss:$20 sps:$4 sm:$0xff]   ;;  %v419_v63 = vld [vmem:[#allocation11 + $0x60] sm:$0xff]  ;;  %v421_v4 = vld [vmem:[#allocation11 + $0x70] sm:$0xff] }
  0xd9   :  { %v420_v1 = vld [vmem:[#allocation11 + $0x68] sm:$0xff]  ;;  %v422_v5 = vld [vmem:[#allocation11 + $0x78] sm:$0xff]  ;;  %v3084_v24 = vld [vmem:[#allocation13 + $0x30] ss:$20 sps:$4 sm:$0xff]  }
  0xda   :  { %2470 = vmatpush3.bf16.msra.mxu0 %v3046_v6  ;;  %2482 = vmatpush3.bf16.msra.mxu1 %v3051_v9  ;;  %v3076_v2 = vld [vmem:[#allocation13 + $0xf4] ss:$20 sps:$4 sm:$0xff]   ;;  %v2849_v3 = vpack.c.bf16 %v420_v1, %v419_v63  ;;  %v3074_v6 = vld [vmem:[#allocation13 + $0xf0] ss:$20 sps:$4 sm:$0xff]   ;;  %v3077_v9 = vld [vmem:[#allocation13 + $0x118] ss:$20 sps:$4 sm:$0xff]  }
  0xdb   :  { %2483 = vmatprep.subr.bf16.mxu1 %v3543_v0  ;;  %2826 = vmatprep.subr.bf16.mxu0 %v2825_v27  ;;  %v3079_v8 = vld [vmem:[#allocation13 + $0x11c] ss:$20 sps:$4 sm:$0xff]   ;;  %v3091_v29 = vld [vmem:[#allocation13 + $0x60] ss:$20 sps:$4 sm:$0xff]   ;;  %v3103_v38 = vld [vmem:[#allocation13 + $0xd8] ss:$20 sps:$4 sm:$0xff]  }
  0xdc   :  { %v3090_v25 = vld [vmem:[#allocation13 + $0x5c] ss:$20 sps:$4 sm:$0xff]   ;;  %v3092_v30 = vld [vmem:[#allocation13 + $0x80] ss:$20 sps:$4 sm:$0xff]   ;;  %v3104_v39 = vld [vmem:[#allocation13 + $0xf8] ss:$20 sps:$4 sm:$0xff]  }
  0xdd   :  { %2472 = vmatmul.mubr.msk.bf16.vlgmr.msra.gmra.mrb[0].mxu0 %vm235_vm1, %v3047_v7  ;;  %v2853_v7 = vpack.c.bf16 %v422_v5, %v421_v4  ;;  %v3096_v33 = vld [vmem:[#allocation13 + $0xa8] ss:$20 sps:$4 sm:$0xff]  }
  0xde   :  { %2484 = vmatpush3.bf16.msra.mxu1 %v3052_v10  ;;  %2828 = vmatpush3.bf16.msra.mxu0 %v2825_v27  ;;  %v3082_v10 = vld [vmem:[#allocation13 + $0xc] ss:$20 sps:$4 sm:$0xff]   ;;  %v3102_v34 = vld [vmem:[#allocation13 + $0xd4] ss:$20 sps:$4 sm:$0xff]  }
  0xdf   :  { %2485 = vmatprep.subr.bf16.mxu1 %v3543_v0  ;;  %2830 = vmatprep.subr.bf16.mxu0 %v2829_v31  ;;  %v3088_v27 = vld [vmem:[#allocation13 + $0x58] ss:$20 sps:$4 sm:$0xff]  }
  0xe2   :  { %2486 = vmatpush3.bf16.msra.mxu1 %v3053_v11  ;;  %2832 = vmatpush3.bf16.msra.mxu0 %v2829_v31  ;;  %v3545_v11 = vmov 0   ;;  %v3098_v31 = vld [vmem:[#allocation13 + $0xac] ss:$20 sps:$4 sm:$0xff]  }
  0xe3   :  { %2487 = vmatprep.subr.bf16.mxu1 %v3543_v0  ;;  %2834 = vmatprep.subr.bf16.mxu0 %v2833_v36 }
  0xe6   :  { %2488 = vmatpush3.bf16.msra.mxu1 %v3054_v12  ;;  %2836 = vmatpush3.bf16.msra.mxu0 %v2833_v36  ;;  %v3100_v36 = vld [vmem:[#allocation13 + $0xd0] ss:$20 sps:$4 sm:$0xff]  }
  0xe7   :  { %2489 = vmatprep.subr.bf16.mxu1 %v3543_v0  ;;  %2838 = vmatprep.subr.bf16.mxu0 %v2837_v41 }
  0xea   :  { %2490 = vmatpush3.bf16.msra.mxu1 %v3055_v13  ;;  %2840 = vmatpush3.bf16.msra.mxu0 %v2837_v41  ;;  %v3107_v41 = vld [vmem:[#allocation13 + $0x100] ss:$20 sps:$4 sm:$0xff]  }
  0xeb   :  { %804 = vmatprep.subr.bf16.mxu1 %v3058_v28  ;;  %2842 = vmatprep.subr.bf16.mxu0 %v2841_v55  ;;  %v3094_v28 = vld [vmem:[#allocation13 + $0x84] ss:$20 sps:$4 sm:$0xff]  }
  0xee   :  { %2844 = vmatpush3.bf16.msra.mxu0 %v2841_v55  ;;  %v569_v55 = vld [vmem:[#allocation14] sm:$0x1f] }
  0xef   :  { %2846 = vmatprep.subr.bf16.mxu0 %v2845_v60 }
  0xf2   :  { %2848 = vmatpush3.bf16.msra.mxu0 %v2845_v60 }
  0xf3   :  { %2850 = vmatprep.subr.bf16.mxu0 %v2849_v3 }
  0xf6   :  { %2852 = vmatpush3.bf16.msra.mxu0 %v2849_v3 }
  0xf7   :  { %2854 = vmatprep.subr.bf16.mxu0 %v2853_v7 }
  0xfa   :  { %2856 = vmatpush3.bf16.msra.mxu0 %v2853_v7 }
  0xfb   :  { %847 = vmatprep.subr.bf16.mxu0 %v3082_v10 }
 0x1b0   :  { %v273_v15 = vpop.f32.mrb[0].mxu0 }
 0x1b1   :  { %v274_v16 = vadd.f32 %v2176_v14, %v273_v15  ;;  %v2473_v17 = vpop.f32.mrb[1].mxu0 }
 0x1b2   :  { %v276_v18 = vpop.f32.mrb[2].mxu0 }
 0x1b3   :  { %v277_v19 = vadd.f32 %v2176_v14, %v276_v18  ;;  %v2474_v20 = vpop.f32.mrb[3].mxu0  ;;  %v280_v21 = vmax.f32 %v274_v16, 0.0 }
 0x1b5   :  { %v281_v22 = vmax.f32 %v277_v19, 0.0  ;;  %v3080_v19 = vld [vmem:[#allocation13 + $0x8] ss:$20 sps:$4 sm:$0xff]  }
 0x1b7   :  { %v282_v23 = vpack.c.bf16 %v281_v22, %v280_v21  ;;  %v3086_v21 = vld [vmem:[#allocation13 + $0x34] ss:$20 sps:$4 sm:$0xff]   ;;  %v3083_v22 = vld [vmem:[#allocation13 + $0x10] ss:$20 sps:$4 sm:$0xff]  }
 0x1b9   :  { %2492 = vmatmul.mubr.bf16.vlgmr.msra.gmra.mrb[0].mxu1 %v282_v23 }
 0x1ba   :  { %805 = vmatpush1.bf16.msra.mxu1 %v3056_v26  ;;  %836 = vmatprep.mubr.bf16.mxu1 %v3545_v11  ;;  %v3087_v26 = vld [vmem:[#allocation13 + $0x38] ss:$20 sps:$4 sm:$0xff]  }
 0x1bb   :  { %806 = vmatprep.subr.bf16.mxu1 %v3061_v32  ;;  %v3095_v32 = vld [vmem:[#allocation13 + $0x88] ss:$20 sps:$4 sm:$0xff]  }
 0x1be   :  { %807 = vmatpush1.bf16.msra.mxu1 %v3059_v35  ;;  %v3099_v35 = vld [vmem:[#allocation13 + $0xb0] ss:$20 sps:$4 sm:$0xff]  }
 0x1bf   :  { %808 = vmatprep.subr.bf16.mxu1 %v3064_v37  ;;  %v3106_v37 = vld [vmem:[#allocation13 + $0xfc] ss:$20 sps:$4 sm:$0xff]  }
 0x1c2   :  { %809 = vmatpush1.bf16.msra.mxu1 %v3062_v40  ;;  %v3110_v40 = vld [vmem:[#allocation13 + $0x124] ss:$20 sps:$4 sm:$0xff]  }
 0x1c3   :  { %810 = vmatprep.subr.bf16.mxu1 %v3067_v51  ;;  %v3119_v51 = vld [vmem:[#allocation16 + $0x38] sm:$0xff]  }
 0x1c6   :  { %811 = vmatpush1.bf16.msra.mxu1 %v3065_v52  ;;  %v502_v52 = vlaneseq }
 0x1c7   :  { %812 = vmatprep.subr.bf16.mxu1 %v3070_v56 }
 0x1c8   :  { %v572_v53 = vshrl.u32 %v502_v52, 7 }
 0x1ca   :  { %813 = vmatpush1.bf16.msra.mxu1 %v3068_v57  ;;  %v581_v54 = vsub.s32 2, %v572_v53  ;;  %v585_v56 = vsub.s32 3, %v572_v53  ;;  %v589_v58 = vsub.s32 4, %v572_v53 }
 0x1cb   :  { %814 = vmatprep.subr.bf16.mxu1 %v3073_v62  ;;  %v577_v62 = vsub.s32 1, %v572_v53 }
 0x1cc   :  { %v582_v57 = vrot.slane %v569_v55, %v581_v54  ;;  %v586_v59 = vrot.slane %v569_v55, %v585_v56  ;;  %v590_v60 = vrot.slane %v569_v55, %v589_v58  ;;  %v3132_v54 = vld [vmem:[#allocation16 + $0xa0] sm:$0xff]   ;;  %v3134_v56 = vld [vmem:[#allocation16 + $0xb0] sm:$0xff]  }
 0x1cd   :  { %v3136_v58 = vld [vmem:[#allocation16 + $0xc0] sm:$0xff]  }
 0x1ce   :  { %815 = vmatpush1.bf16.msra.mxu1 %v3071_v61  ;;  %v573_v61 = vsub.s32 0, %v572_v53  ;;  %v3131_v53 = vld [vmem:[#allocation16 + $0x98] sm:$0xff]  }
 0x1cf   :  { %816 = vmatprep.subr.bf16.mxu1 %v3076_v2  ;;  %v578_v2 = vrot.slane %v569_v55, %v577_v62  ;;  %v3140_v62 = vld [vmem:[#allocation16 + $0xe0] sm:$0xff]  }
 0x1d0   :  { %v574_v63 = vrot.slane %v569_v55, %v573_v61  ;;  %v3133_v55 = vld [vmem:[#allocation16 + $0xa8] sm:$0xff]   ;;  %v3139_v61 = vld [vmem:[#allocation16 + $0xd8] sm:$0xff]  }
 0x1d2   :  { %817 = vmatpush1.bf16.msra.mxu1 %v3074_v6 }
 0x1d3   :  { %818 = vmatprep.subr.bf16.mxu1 %v3079_v8 }
 0x1d6   :  { %819 = vmatpush1.bf16.msra.mxu1 %v3077_v9 }
 0x1d7   :  { %2530 = vmatprep.subr.bf16.mxu1 %v3543_v0 }
 0x28c   :  { %v388_v43 = vpop.f32.mrb[0].mxu1 }
 0x28d   :  { %v389_v44 = vadd.f32 %v2183_v42, %v388_v43  ;;  %v2493_v45 = vpop.f32.mrb[1].mxu1  ;;  %v3111_v43 = vld [vmem:[#allocation13 + $0x128] ss:$20 sps:$4 sm:$0xff]  }
 0x28e   :  { %v391_v46 = vpop.f32.mrb[2].mxu1  ;;  %v3113_v45 = vld [vmem:[#allocation16 + $0x8] sm:$0xff]  }
 0x28f   :  { %v3798_v47 = vadd.f32 %v2183_v42, %v391_v46  ;;  %v2494_v48 = vpop.f32.mrb[3].mxu1  ;;  %v395_v49 = vmul.f32 %v389_v44, %v389_v44  ;;  %v3108_v42 = vld [vmem:[#allocation13 + $0x120] ss:$20 sps:$4 sm:$0xff]  }
 0x290   :  { %v3114_v46 = vld [vmem:[#allocation16 + $0x10] sm:$0xff]   ;;  %v3116_v48 = vld [vmem:[#allocation16 + $0x20] sm:$0xff]  }
 0x291   :  { %397 = vadd.xlane.f32.xlu0 %v395_v49  ;;  %v396_v50 = vmul.f32 %v3798_v47, %v3798_v47  ;;  %v3117_v49 = vld [vmem:[#allocation16 + $0x28] sm:$0xff]  }
 0x295   :  { %399 = vadd.xlane.f32.xlu0 %v396_v50  ;;  %v3118_v50 = vld [vmem:[#allocation16 + $0x30] sm:$0xff]  }
 0x31e   :  { %v398_v12 = vpop.xlane.xlu0 %397 }
 0x31f   :  { %v401_v13 = vmax.f32 %v398_v12, 1e-24 }
 0x321   :  { %3152 = vrsqrt.f32 %v401_v13 }
 0x322   :  { %v400_v14 = vpop.xlane.xlu0 %399 }
 0x323   :  { %v402_v15 = vmax.f32 %v400_v14, 1e-24 }
 0x325   :  { %3154 = vrsqrt.f32 %v402_v15 }
 0x32b   :  { %v3153_v16 = vpop.eup %3152 }
 0x32c   :  { %v405_v17 = vmul.f32 %v3153_v16, %v389_v44  ;;  %v3112_v44 = vld [vmem:[#allocation16] sm:$0xff]  }
 0x32d   :  { %v3120_v16 = vld [vmem:[#allocation16 + $0x40] sm:$0xff]  }
 0x32e   :  { %2527 = vmatprep.mubr.f32.mxu0 %v405_v17  ;;  %500 = vst [vmem:[#allocation21] sm:$0xff] %v405_v17 }
 0x32f   :  { %v3155_v18 = vpop.eup %3154 }
 0x330   :  { %v406_v20 = vmul.f32 %v3155_v18, %v3798_v47  ;;  %v3115_v47 = vld [vmem:[#allocation16 + $0x18] sm:$0xff]  }
 0x332   :  { %2528 = vmatmul.mubr.f32.vlgmr.msra.gmra.mrb[4].mxu0 %v406_v20  ;;  %501 = vst [vmem:[#allocation21 + $0x8] sm:$0xff] %v406_v20  ;;  %v520_v23 = vpack.c.bf16 %v406_v20, %v405_v17  ;;  %v3122_v20 = vld [vmem:[#allocation16 + $0x50] sm:$0xff]  }
 0x333   :  { %848 = vmatpush1.bf16.msra.mxu0 %v3080_v19  ;;  %879 = vmatprep.mubr.bf16.mxu0 %v3545_v11  ;;  %v3121_v19 = vld [vmem:[#allocation16 + $0x48] sm:$0xff]  }
 0x334   :  { %837 = vmatmul.mubr.bf16.vlgmr.msra.gmra.mrb[4].mxu1 %v520_v23  ;;  %849 = vmatprep.subr.bf16.mxu0 %v3086_v21  ;;  %v3123_v21 = vld [vmem:[#allocation16 + $0x58] sm:$0xff]  }
 0x335   :  { %2531 = vmatpush3.bf16.msra.mxu1 %v3083_v22  ;;  %2546 = vmatprep.mubr.msk.bf16.mxu1 %vm3544_vm0, %v3543_v0  ;;  %v3124_v22 = vld [vmem:[#allocation16 + $0x60] sm:$0xff]  }
 0x336   :  { %2532 = vmatprep.subr.bf16.mxu1 %v3543_v0 }
 0x337   :  { %850 = vmatpush1.bf16.msra.mxu0 %v3084_v24 }
 0x338   :  { %851 = vmatprep.subr.bf16.mxu0 %v3090_v25  ;;  %v3126_v25 = vld [vmem:[#allocation16 + $0x70] sm:$0xff]  }
 0x339   :  { %2533 = vmatpush3.bf16.msra.mxu1 %v3087_v26 }
 0x33a   :  { %2534 = vmatprep.subr.bf16.mxu1 %v3543_v0 }
 0x33b   :  { %852 = vmatpush1.bf16.msra.mxu0 %v3088_v27 }
 0x33c   :  { %853 = vmatprep.subr.bf16.mxu0 %v3094_v28 }
 0x33d   :  { %2535 = vmatpush3.bf16.msra.mxu1 %v3091_v29 }
 0x33e   :  { %2536 = vmatprep.subr.bf16.mxu1 %v3543_v0 }
 0x33f   :  { %854 = vmatpush1.bf16.msra.mxu0 %v3092_v30 }
 0x340   :  { %855 = vmatprep.subr.bf16.mxu0 %v3098_v31 }
 0x341   :  { %2537 = vmatpush3.bf16.msra.mxu1 %v3095_v32 }
 0x342   :  { %2538 = vmatprep.subr.bf16.mxu1 %v3543_v0 }
 0x343   :  { %856 = vmatpush1.bf16.msra.mxu0 %v3096_v33 }
 0x344   :  { %857 = vmatprep.subr.bf16.mxu0 %v3102_v34 }
 0x345   :  { %2539 = vmatpush3.bf16.msra.mxu1 %v3099_v35 }
 0x346   :  { %2540 = vmatprep.subr.bf16.mxu1 %v3543_v0 }
 0x347   :  { %858 = vmatpush1.bf16.msra.mxu0 %v3100_v36 }
 0x348   :  { %859 = vmatprep.subr.bf16.mxu0 %v3106_v37  ;;  %v3127_v37 = vld [vmem:[#allocation16 + $0x78] sm:$0xff]  }
 0x349   :  { %2541 = vmatpush3.bf16.msra.mxu1 %v3103_v38 }
 0x34a   :  { %2542 = vmatprep.subr.bf16.mxu1 %v3543_v0 }
 0x34b   :  { %860 = vmatpush1.bf16.msra.mxu0 %v3104_v39 }
 0x34c   :  { %861 = vmatprep.subr.bf16.mxu0 %v3110_v40 }
 0x34d   :  { %2543 = vmatpush3.bf16.msra.mxu1 %v3107_v41 }
 0x34e   :  { %2544 = vmatprep.subr.bf16.mxu1 %v3543_v0 }
 0x34f   :  { %862 = vmatpush1.bf16.msra.mxu0 %v3108_v42 }
 0x350   :  { %2550 = vmatprep.subr.bf16.mxu0 %v3543_v0 }
 0x351   :  { %2545 = vmatpush3.bf16.msra.mxu1 %v3111_v43 }
 0x352   :  { %880 = vmatmul.mubr.bf16.vlgmr.msra.gmra.mrb[8].mxu0 %v520_v23 }
 0x353   :  { %2551 = vmatpush3.bf16.msra.mxu0 %v3112_v44  ;;  %2566 = vmatprep.mubr.msk.bf16.mxu0 %vm3544_vm0, %v3543_v0 }
 0x354   :  { %2547 = vmatmul.mubr.bf16.vlgmr.msra.gmra.mrb[8].mxu1 %v520_v23  ;;  %2552 = vmatprep.subr.bf16.mxu0 %v3543_v0  ;;  %v3125_v23 = vld [vmem:[#allocation16 + $0x68] sm:$0xff]  }
 0x357   :  { %2553 = vmatpush3.bf16.msra.mxu0 %v3113_v45 }
 0x358   :  { %2554 = vmatprep.subr.bf16.mxu0 %v3543_v0 }
 0x35b   :  { %2555 = vmatpush3.bf16.msra.mxu0 %v3114_v46 }
 0x35c   :  { %2556 = vmatprep.subr.bf16.mxu0 %v3543_v0 }
 0x35f   :  { %2557 = vmatpush3.bf16.msra.mxu0 %v3115_v47 }
 0x360   :  { %2558 = vmatprep.subr.bf16.mxu0 %v3543_v0 }
 0x363   :  { %2559 = vmatpush3.bf16.msra.mxu0 %v3116_v48  ;;  %v3128_v48 = vld [vmem:[#allocation16 + $0x80] sm:$0xff]  }
 0x364   :  { %2560 = vmatprep.subr.bf16.mxu0 %v3543_v0 }
 0x367   :  { %2561 = vmatpush3.bf16.msra.mxu0 %v3117_v49 }
 0x368   :  { %2562 = vmatprep.subr.bf16.mxu0 %v3543_v0 }
 0x36b   :  { %2563 = vmatpush3.bf16.msra.mxu0 %v3118_v50  ;;  %v3129_v50 = vld [vmem:[#allocation16 + $0x88] sm:$0xff]  }
 0x36c   :  { %2564 = vmatprep.subr.bf16.mxu0 %v3543_v0 }
 0x36f   :  { %2565 = vmatpush3.bf16.msra.mxu0 %v3119_v51  ;;  %v3130_v51 = vld [vmem:[#allocation16 + $0x90] sm:$0xff]  }
 0x370   :  { %2605 = vmatprep.subr.bf16.mxu0 %v3543_v0 }
 0x405   :  { %v3825_v1 = vpop.f32.mrb[4].mxu0 }
 0x406   :  { %499 = vst [vmem:[#allocation20 + $0x8] sm:$0xff] %v3825_v1  ;;  %v3828_v3 = vpop.f32.mrb[5].mxu0 }
 0x407   :  { %498 = vst [vmem:[#allocation20] sm:$0xff] %v3828_v3  ;;  %v838_v4 = vpop.f32.mrb[4].mxu1 }
 0x408   :  { %v839_v5 = vadd.f32 %v838_v4, %v574_v63  ;;  %v840_v6 = vpop.f32.mrb[5].mxu1  ;;  %v3143_v4 = vld [vmem:[#allocation16 + $0xf8] sm:$0xff]  }
 0x409   :  { %v841_v7 = vadd.f32 %v840_v6, %v578_v2  ;;  %v842_v8 = vpop.f32.mrb[6].mxu1  ;;  %v3145_v6 = vld [vmem:[#allocation16 + $0x108] sm:$0xff]  }
 0x40a   :  { %v843_v9 = vadd.f32 %v842_v8, %v574_v63  ;;  %v844_v10 = vpop.f32.mrb[7].mxu1  ;;  %v931_v12 = vmax.f32 %v839_v5, 0.0  ;;  %v3141_v63 = vld [vmem:[#allocation16 + $0xe8] sm:$0xff]   ;;  %v3144_v5 = vld [vmem:[#allocation16 + $0x100] sm:$0xff]   ;;  %v3147_v8 = vld [vmem:[#allocation16 + $0x118] sm:$0xff]  }
 0x40b   :  { %v845_v11 = vadd.f32 %v844_v10, %v578_v2  ;;  %v932_v14 = vmax.f32 %v841_v7, 0.0  ;;  %v3142_v2 = vld [vmem:[#allocation16 + $0xf0] sm:$0xff]   ;;  %v3149_v10 = vld [vmem:[#allocation16 + $0x128] sm:$0xff]  }
 0x40c   :  { %v936_v13 = vmax.f32 %v843_v9, 0.0  ;;  %v3146_v7 = vld [vmem:[#allocation16 + $0x110] sm:$0xff]   ;;  %v3148_v9 = vld [vmem:[#allocation16 + $0x120] sm:$0xff]  }
 0x40d   :  { %v937_v15 = vmax.f32 %v845_v11, 0.0  ;;  %v3150_v11 = vld [vmem:[#allocation16 + $0x130] sm:$0xff]  }
 0x40e   :  { %v941_v17 = vpack.c.bf16 %v936_v13, %v931_v12  ;;  %v3151_v12 = vld [vmem:[#allocation16 + $0x138] sm:$0xff]   ;;  %v2232_v13 = vld [vmem:[#allocation17] ss:$0 sm:$0xff] }
 0x40f   :  { %v1171_v18 = vpack.c.bf16 %v937_v15, %v932_v14 }
 0x410   :  { %2567 = vmatmul.mubr.bf16.vlgmr.msra.gmra.mrb[12].mxu0 %v941_v17 }
 0x411   :  { %2606 = vmatpush3.bf16.msra.mxu0 %v3120_v16  ;;  %2621 = vmatprep.mubr.msk.bf16.mxu0 %vm3544_vm0, %v3543_v0 }
 0x412   :  { %2607 = vmatprep.subr.bf16.mxu0 %v3543_v0 }
 0x415   :  { %2608 = vmatpush3.bf16.msra.mxu0 %v3121_v19 }
 0x416   :  { %2609 = vmatprep.subr.bf16.mxu0 %v3543_v0 }
 0x419   :  { %2610 = vmatpush3.bf16.msra.mxu0 %v3122_v20 }
 0x41a   :  { %2611 = vmatprep.subr.bf16.mxu0 %v3543_v0 }
 0x41d   :  { %2612 = vmatpush3.bf16.msra.mxu0 %v3123_v21  ;;  %v1066_v21 = vld [vmem:[#allocation19] sm:$0xff] }
 0x41e   :  { %2613 = vmatprep.subr.bf16.mxu0 %v3543_v0 }
 0x421   :  { %2614 = vmatpush3.bf16.msra.mxu0 %v3124_v22  ;;  %v1067_v22 = vld [vmem:[#allocation19 + $0x8] sm:$0xff] }
 0x422   :  { %2615 = vmatprep.subr.bf16.mxu0 %v3543_v0 }
 0x425   :  { %v881_v24 = vpop.f32.mrb[8].mxu0  ;;  %2616 = vmatpush3.bf16.msra.mxu0 %v3125_v23  ;;  %v2857_v23 = vpack.c.bf16 %v1067_v22, %v1066_v21 }
 0x426   :  { %v882_v26 = vadd.f32 %v881_v24, %v582_v57  ;;  %v883_v27 = vpop.f32.mrb[9].mxu0  ;;  %2617 = vmatprep.subr.bf16.mxu0 %v3543_v0 }
 0x427   :  { %v884_v28 = vadd.f32 %v883_v27, %v586_v59  ;;  %v885_v29 = vpop.f32.mrb[10].mxu0  ;;  %v924_v30 = vpop.f32.mrb[8].mxu1  ;;  %2858 = vmatprep.subr.bf16.mxu1 %v2857_v23 }
 0x428   :  { %v886_v31 = vadd.f32 %v885_v29, %v582_v57  ;;  %v925_v32 = vadd.f32 %v924_v30, %v590_v60  ;;  %v887_v33 = vpop.f32.mrb[11].mxu0  ;;  %v2548_v34 = vpop.f32.mrb[9].mxu1  ;;  %v933_v38 = vmax.f32 %v882_v26, 0.0  ;;  %v3135_v57 = vld [vmem:[#allocation16 + $0xb8] sm:$0xff]   ;;  %2860 = vmatpush3.bf16.msra.mxu1 %v2857_v23  ;;  %v1071_v29 = vld [vmem:[#allocation19 + $0x28] sm:$0xff] }
 0x429   :  { %v888_v35 = vadd.f32 %v887_v33, %v586_v59  ;;  %v927_v36 = vpop.f32.mrb[10].mxu1  ;;  %2618 = vmatpush3.bf16.msra.mxu0 %v3126_v25  ;;  %v934_v42 = vmax.f32 %v884_v28, 0.0  ;;  %v3137_v59 = vld [vmem:[#allocation16 + $0xc8] sm:$0xff]   ;;  %v1068_v25 = vld [vmem:[#allocation19 + $0x10] sm:$0xff]  ;;  %v1069_v26 = vld [vmem:[#allocation19 + $0x18] sm:$0xff] }
 0x42a   :  { %v938_v39 = vmax.f32 %v886_v31, 0.0  ;;  %v928_v40 = vadd.f32 %v927_v36, %v590_v60  ;;  %v2549_v41 = vpop.f32.mrb[11].mxu1  ;;  %2619 = vmatprep.subr.bf16.mxu0 %v3543_v0  ;;  %v935_v45 = vmax.f32 %v925_v32, 0.0  ;;  %v3138_v60 = vld [vmem:[#allocation16 + $0xd0] sm:$0xff]   ;;  %v2861_v27 = vpack.c.bf16 %v1069_v26, %v1068_v25  ;;  %v1070_v28 = vld [vmem:[#allocation19 + $0x20] sm:$0xff]  ;;  %v1073_v32 = vld [vmem:[#allocation19 + $0x38] sm:$0xff] }
 0x42b   :  { %v939_v43 = vmax.f32 %v888_v35, 0.0  ;;  %v1072_v30 = vld [vmem:[#allocation19 + $0x30] sm:$0xff]  ;;  %v2865_v31 = vpack.c.bf16 %v1071_v29, %v1070_v28  ;;  %v1074_v34 = vld [vmem:[#allocation19 + $0x40] sm:$0xff]  ;;  %v1075_v35 = vld [vmem:[#allocation19 + $0x48] sm:$0xff] }
 0x42c   :  { %v1404_v44 = vpack.c.bf16 %v938_v39, %v933_v38  ;;  %v940_v46 = vmax.f32 %v928_v40, 0.0  ;;  %2862 = vmatprep.subr.bf16.mxu1 %v2861_v27  ;;  %v2869_v33 = vpack.c.bf16 %v1073_v32, %v1072_v30  ;;  %v2873_v36 = vpack.c.bf16 %v1075_v35, %v1074_v34  ;;  %v1077_v38 = vld [vmem:[#allocation19 + $0x58] sm:$0xff]  ;;  %v1078_v40 = vld [vmem:[#allocation19 + $0x60] sm:$0xff]  ;;  %v1079_v41 = vld [vmem:[#allocation19 + $0x68] sm:$0xff] }
 0x42d   :  { %v1637_v47 = vpack.c.bf16 %v939_v43, %v934_v42  ;;  %2620 = vmatpush3.bf16.msra.mxu0 %v3127_v37  ;;  %2864 = vmatpush3.bf16.msra.mxu1 %v2861_v27  ;;  %v1076_v37 = vld [vmem:[#allocation19 + $0x50] sm:$0xff]  ;;  %v2881_v43 = vpack.c.bf16 %v1079_v41, %v1078_v40  ;;  %v1304_v40 = vld [vmem:[#allocation19 + $0xa8] sm:$0xff] }
 0x42e   :  { %v3840_v49 = vpack.c.bf16 %v940_v46, %v935_v45  ;;  %2660 = vmatprep.subr.bf16.mxu0 %v3543_v0  ;;  %2866 = vmatprep.subr.bf16.mxu1 %v2865_v31  ;;  %v2877_v39 = vpack.c.bf16 %v1077_v38, %v1076_v37  ;;  %v1080_v42 = vld [vmem:[#allocation19 + $0x70] sm:$0xff]  ;;  %v2243_v46 = vld [vmem:[#allocation17 + $0x1] ss:$0 sm:$0xff] }
 0x430   :  { %2622 = vmatmul.mubr.bf16.vlgmr.msra.gmra.mrb[16].mxu0 %v1171_v18 }
 0x431   :  { %2661 = vmatpush3.bf16.msra.mxu0 %v3128_v48  ;;  %2676 = vmatprep.mubr.msk.bf16.mxu0 %vm3544_vm0, %v3543_v0 }
 0x432   :  { %2662 = vmatprep.subr.bf16.mxu0 %v3543_v0  ;;  %2868 = vmatpush3.bf16.msra.mxu1 %v2865_v31 }
 0x433   :  { %2870 = vmatprep.subr.bf16.mxu1 %v2869_v33 }
 0x435   :  { %2663 = vmatpush3.bf16.msra.mxu0 %v3129_v50 }
 0x436   :  { %2664 = vmatprep.subr.bf16.mxu0 %v3543_v0  ;;  %2872 = vmatpush3.bf16.msra.mxu1 %v2869_v33 }
 0x437   :  { %2874 = vmatprep.subr.bf16.mxu1 %v2873_v36 }
 0x439   :  { %2665 = vmatpush3.bf16.msra.mxu0 %v3130_v51  ;;  %v1299_v51 = vld [vmem:[#allocation19 + $0x80] sm:$0xff] }
 0x43a   :  { %2666 = vmatprep.subr.bf16.mxu0 %v3543_v0  ;;  %2876 = vmatpush3.bf16.msra.mxu1 %v2873_v36  ;;  %v1301_v36 = vld [vmem:[#allocation19 + $0x90] sm:$0xff] }
 0x43b   :  { %2878 = vmatprep.subr.bf16.mxu1 %v2877_v39 }
 0x43d   :  { %2667 = vmatpush3.bf16.msra.mxu0 %v3131_v53  ;;  %v1300_v53 = vld [vmem:[#allocation19 + $0x88] sm:$0xff] }
 0x43e   :  { %2668 = vmatprep.subr.bf16.mxu0 %v3543_v0  ;;  %2880 = vmatpush3.bf16.msra.mxu1 %v2877_v39  ;;  %v1303_v39 = vld [vmem:[#allocation19 + $0xa0] sm:$0xff] }
 0x43f   :  { %2882 = vmatprep.subr.bf16.mxu1 %v2881_v43  ;;  %v2897_v41 = vpack.c.bf16 %v1304_v40, %v1303_v39  ;;  %v1547_v39 = vld [vmem:[#allocation19 + $0x178] sm:$0xff] }
 0x441   :  { %2669 = vmatpush3.bf16.msra.mxu0 %v3132_v54 }
 0x442   :  { %2670 = vmatprep.subr.bf16.mxu0 %v3543_v0  ;;  %2884 = vmatpush3.bf16.msra.mxu1 %v2881_v43  ;;  %v1306_v43 = vld [vmem:[#allocation19 + $0xb8] sm:$0xff] }
 0x445   :  { %2671 = vmatpush3.bf16.msra.mxu0 %v3133_v55 }
 0x446   :  { %2672 = vmatprep.subr.bf16.mxu0 %v3543_v0 }
 0x449   :  { %2673 = vmatpush3.bf16.msra.mxu0 %v3134_v56 }
 0x44a   :  { %2674 = vmatprep.subr.bf16.mxu0 %v3543_v0 }
 0x44d   :  { %2675 = vmatpush3.bf16.msra.mxu0 %v3135_v57  ;;  %v2889_v57 = vpack.c.bf16 %v1300_v53, %v1299_v51 }
 0x44e   :  { %2715 = vmatprep.subr.bf16.mxu0 %v3543_v0 }
 0x450   :  { %2677 = vmatmul.mubr.bf16.vlgmr.msra.gmra.mrb[20].mxu0 %v1404_v44  ;;  %v1081_v44 = vld [vmem:[#allocation19 + $0x78] sm:$0xff] }
 0x451   :  { %2716 = vmatpush3.bf16.msra.mxu0 %v3136_v58  ;;  %2731 = vmatprep.mubr.msk.bf16.mxu0 %vm3544_vm0, %v3543_v0  ;;  %v2885_v45 = vpack.c.bf16 %v1081_v44, %v1080_v42  ;;  %v1305_v42 = vld [vmem:[#allocation19 + $0xb0] sm:$0xff]  ;;  %v1307_v44 = vld [vmem:[#allocation19 + $0xc0] sm:$0xff] }
 0x452   :  { %2717 = vmatprep.subr.bf16.mxu0 %v3543_v0 }
 0x453   :  { %2886 = vmatprep.subr.bf16.mxu1 %v2885_v45 }
 0x454   :  { %2888 = vmatpush3.bf16.msra.mxu1 %v2885_v45  ;;  %v1308_v45 = vld [vmem:[#allocation19 + $0xc8] sm:$0xff] }
 0x455   :  { %2718 = vmatpush3.bf16.msra.mxu0 %v3137_v59  ;;  %2890 = vmatprep.subr.bf16.mxu1 %v2889_v57  ;;  %v2254_v59 = vld [vmem:[#allocation17 + $0x2] ss:$0 sm:$0xff] }
 0x456   :  { %2719 = vmatprep.subr.bf16.mxu0 %v3543_v0 }
 0x459   :  { %2720 = vmatpush3.bf16.msra.mxu0 %v3138_v60 }
 0x45a   :  { %2721 = vmatprep.subr.bf16.mxu0 %v3543_v0 }
 0x45d   :  { %2722 = vmatpush3.bf16.msra.mxu0 %v3139_v61 }
 0x45e   :  { %2723 = vmatprep.subr.bf16.mxu0 %v3543_v0 }
 0x461   :  { %2724 = vmatpush3.bf16.msra.mxu0 %v3140_v62 }
 0x462   :  { %2725 = vmatprep.subr.bf16.mxu0 %v3543_v0 }
 0x465   :  { %2726 = vmatpush3.bf16.msra.mxu0 %v3141_v63 }
 0x466   :  { %2727 = vmatprep.subr.bf16.mxu0 %v3543_v0 }
 0x469   :  { %2728 = vmatpush3.bf16.msra.mxu0 %v3142_v2 }
 0x46a   :  { %2729 = vmatprep.subr.bf16.mxu0 %v3543_v0 }
 0x46d   :  { %2730 = vmatpush3.bf16.msra.mxu0 %v3143_v4 }
 0x46e   :  { %2770 = vmatprep.subr.bf16.mxu0 %v3543_v0 }
 0x470   :  { %2732 = vmatmul.mubr.bf16.vlgmr.msra.gmra.mrb[24].mxu0 %v1637_v47 }
 0x471   :  { %2771 = vmatpush3.bf16.msra.mxu0 %v3144_v5  ;;  %2786 = vmatprep.mubr.msk.bf16.mxu0 %vm3544_vm0, %v3543_v0 }
 0x472   :  { %2772 = vmatprep.subr.bf16.mxu0 %v3543_v0 }
 0x475   :  { %2773 = vmatpush3.bf16.msra.mxu0 %v3145_v6 }
 0x476   :  { %2774 = vmatprep.subr.bf16.mxu0 %v3543_v0 }
 0x479   :  { %2775 = vmatpush3.bf16.msra.mxu0 %v3146_v7  ;;  %v2265_v7 = vld [vmem:[#allocation17 + $0x3] ss:$0 sm:$0xff] }
 0x47a   :  { %2776 = vmatprep.subr.bf16.mxu0 %v3543_v0 }
 0x47d   :  { %2777 = vmatpush3.bf16.msra.mxu0 %v3147_v8 }
 0x47e   :  { %2778 = vmatprep.subr.bf16.mxu0 %v3543_v0 }
 0x481   :  { %2779 = vmatpush3.bf16.msra.mxu0 %v3148_v9 }
 0x482   :  { %2780 = vmatprep.subr.bf16.mxu0 %v3543_v0 }
 0x485   :  { %2781 = vmatpush3.bf16.msra.mxu0 %v3149_v10 }
 0x486   :  { %2782 = vmatprep.subr.bf16.mxu0 %v3543_v0 }
 0x489   :  { %2783 = vmatpush3.bf16.msra.mxu0 %v3150_v11 }
 0x48a   :  { %2784 = vmatprep.subr.bf16.mxu0 %v3543_v0 }
 0x48d   :  { %2785 = vmatpush3.bf16.msra.mxu0 %v3151_v12 }
 0x490   :  { %2787 = vmatmul.mubr.bf16.vlgmr.msra.gmra.mrb[28].mxu0 %v3840_v49 }
 0x4e3   :  { %v1047_v14 = vpop.f32.mrb[12].mxu0 }
 0x4e4   :  { %v3873_v15 = vadd.f32 %v2232_v13, %v1047_v14  ;;  %v2568_v16 = vpop.f32.mrb[13].mxu0 }
 0x4e5   :  { %v1050_v17 = vpop.f32.mrb[14].mxu0 }
 0x4e6   :  { %v3875_v18 = vadd.f32 %v2232_v13, %v1050_v17  ;;  %v2569_v19 = vpop.f32.mrb[15].mxu0  ;;  %v1054_v20 = vmul.f32 %v3873_v15, %v3873_v15  ;;  %v503_v17 = vand.u32 127, %v502_v52 }
 0x4e7   :  { %v2276_v19 = vld [vmem:[#allocation17 + $0x4] ss:$0 sm:$0xff] }
 0x4e8   :  { %1056 = vadd.xlane.f32.xlu1 %v1054_v20  ;;  %v1055_v24 = vmul.f32 %v3875_v18, %v3875_v18  ;;  %v3908_v23 = vcvt.s32.f32 %v503_v17  ;;  %v1537_v17 = vld [vmem:[#allocation19 + $0x128] sm:$0xff] }
 0x4ea   :  { %vm505_vm2 = vcmp.lt.f32.partialorder %v3908_v23, 5.0 }
 0x4eb   :  { %v3918_v52 = vsel %vm505_vm2, %v3828_v3, -inf  ;;  %v3922_v29 = vsel %vm505_vm2, %v3825_v1, -inf  ;;  %v1302_v3 = vld [vmem:[#allocation19 + $0x98] sm:$0xff] }
 0x4ec   :  { %1058 = vadd.xlane.f32.xlu1 %v1055_v24  ;;  %v2893_v38 = vpack.c.bf16 %v1302_v3, %v1301_v36  ;;  %v1544_v36 = vld [vmem:[#allocation19 + $0x160] sm:$0xff]  ;;  %v1545_v3 = vld [vmem:[#allocation19 + $0x168] sm:$0xff] }
 0x503   :  { %v1279_v47 = vpop.f32.mrb[16].mxu0 }
 0x504   :  { %v3881_v48 = vadd.f32 %v2243_v46, %v1279_v47  ;;  %v2623_v49 = vpop.f32.mrb[17].mxu0  ;;  %v1310_v47 = vld [vmem:[#allocation19 + $0xd8] sm:$0xff] }
 0x505   :  { %v1282_v50 = vpop.f32.mrb[18].mxu0 }
 0x506   :  { %v3883_v54 = vadd.f32 %v2243_v46, %v1282_v50  ;;  %v2624_v55 = vpop.f32.mrb[19].mxu0  ;;  %v1286_v56 = vmul.f32 %v3881_v48, %v3881_v48  ;;  %v2905_v46 = vpack.c.bf16 %v1308_v45, %v1307_v44 }
 0x508   :  { %1288 = vadd.xlane.f32.xlu0 %v1286_v56  ;;  %v1287_v58 = vmul.f32 %v3883_v54, %v3883_v54  ;;  %v1311_v56 = vld [vmem:[#allocation19 + $0xe0] sm:$0xff] }
 0x50a   :  { %1290 = vadd.xlane.f32.xlu1 %v1287_v58 }
 0x523   :  { %v1512_v60 = vpop.f32.mrb[20].mxu0 }
 0x524   :  { %v3889_v61 = vadd.f32 %v2254_v59, %v1512_v60  ;;  %v2678_v62 = vpop.f32.mrb[21].mxu0  ;;  %v1314_v60 = vld [vmem:[#allocation19 + $0xf8] sm:$0xff] }
 0x525   :  { %v1515_v63 = vpop.f32.mrb[22].mxu0 }
 0x526   :  { %v3891_v2 = vadd.f32 %v2254_v59, %v1515_v63  ;;  %v2679_v4 = vpop.f32.mrb[23].mxu0  ;;  %v1519_v5 = vmul.f32 %v3889_v61, %v3889_v61  ;;  %v1313_v59 = vld [vmem:[#allocation19 + $0xf0] sm:$0xff]  ;;  %v1532_v63 = vld [vmem:[#allocation19 + $0x100] sm:$0xff] }
 0x527   :  { %v2917_v62 = vpack.c.bf16 %v1314_v60, %v1313_v59  ;;  %v1533_v4 = vld [vmem:[#allocation19 + $0x108] sm:$0xff]  ;;  %v1775_v59 = vld [vmem:[#allocation19 + $0x1d0] sm:$0xff]  ;;  %v1776_v60 = vld [vmem:[#allocation19 + $0x1d8] sm:$0xff] }
 0x528   :  { %1521 = vadd.xlane.f32.xlu0 %v1519_v5  ;;  %v1520_v6 = vmul.f32 %v3891_v2, %v3891_v2 }
 0x52a   :  { %1523 = vadd.xlane.f32.xlu1 %v1520_v6 }
 0x543   :  { %v1745_v8 = vpop.f32.mrb[24].mxu0 }
 0x544   :  { %v3897_v9 = vadd.f32 %v2265_v7, %v1745_v8  ;;  %v2733_v10 = vpop.f32.mrb[25].mxu0 }
 0x545   :  { %v1748_v11 = vpop.f32.mrb[26].mxu0  ;;  %v1534_v10 = vld [vmem:[#allocation19 + $0x110] sm:$0xff] }
 0x546   :  { %v3899_v12 = vadd.f32 %v2265_v7, %v1748_v11  ;;  %v2734_v13 = vpop.f32.mrb[27].mxu0  ;;  %v1752_v14 = vmul.f32 %v3897_v9, %v3897_v9  ;;  %v2921_v7 = vpack.c.bf16 %v1533_v4, %v1532_v63  ;;  %v1535_v11 = vld [vmem:[#allocation19 + $0x118] sm:$0xff] }
 0x548   :  { %1754 = vadd.xlane.f32.xlu0 %v1752_v14  ;;  %v1753_v16 = vmul.f32 %v3899_v12, %v3899_v12  ;;  %v2925_v14 = vpack.c.bf16 %v1535_v11, %v1534_v10  ;;  %v1778_v10 = vld [vmem:[#allocation19 + $0x1e8] sm:$0xff] }
 0x54a   :  { %1756 = vadd.xlane.f32.xlu1 %v1753_v16  ;;  %v1536_v16 = vld [vmem:[#allocation19 + $0x120] sm:$0xff] }
 0x563   :  { %v1978_v20 = vpop.f32.mrb[28].mxu0 }
 0x564   :  { %v3906_v21 = vadd.f32 %v2276_v19, %v1978_v20  ;;  %v2788_v22 = vpop.f32.mrb[29].mxu0  ;;  %v1539_v20 = vld [vmem:[#allocation19 + $0x138] sm:$0xff] }
 0x565   :  { %v1981_v24 = vpop.f32.mrb[30].mxu0 }
 0x566   :  { %v3910_v25 = vadd.f32 %v2276_v19, %v1981_v24  ;;  %v2789_v26 = vpop.f32.mrb[31].mxu0  ;;  %v1985_v27 = vmul.f32 %v3906_v21, %v3906_v21  ;;  %v1538_v19 = vld [vmem:[#allocation19 + $0x130] sm:$0xff]  ;;  %v1540_v24 = vld [vmem:[#allocation19 + $0x140] sm:$0xff] }
 0x567   :  { %v2933_v22 = vpack.c.bf16 %v1539_v20, %v1538_v19  ;;  %v1541_v26 = vld [vmem:[#allocation19 + $0x148] sm:$0xff] }
 0x568   :  { %1987 = vadd.xlane.f32.xlu0 %v1985_v27  ;;  %v1986_v28 = vmul.f32 %v3910_v25, %v3910_v25  ;;  %v1542_v27 = vld [vmem:[#allocation19 + $0x150] sm:$0xff]  ;;  %v1999_v19 = vld [vmem:[#allocation19 + $0x208] sm:$0xff] }
 0x56a   :  { %1989 = vadd.xlane.f32.xlu1 %v1986_v28  ;;  %v1543_v28 = vld [vmem:[#allocation19 + $0x158] sm:$0xff] }
 0x56c   :  { %508 = vmax.xlane.f32.xlu0 %v3918_v52 }
 0x56e   :  { %510 = vmax.xlane.f32.xlu1 %v3922_v29 }
 0x575   :  { %v1057_v30 = vpop.xlane.xlu1 %1056 }
 0x576   :  { %v1060_v31 = vmax.f32 %v1057_v30, 1e-24 }
 0x578   :  { %3156 = vrsqrt.f32 %v1060_v31 }
 0x579   :  { %v1059_v32 = vpop.xlane.xlu1 %1058 }
 0x57a   :  { %v1061_v33 = vmax.f32 %v1059_v32, 1e-24 }
 0x57c   :  { %3158 = vrsqrt.f32 %v1061_v33  ;;  %v2941_v33 = vpack.c.bf16 %v1543_v28, %v1542_v27  ;;  %v2001_v27 = vld [vmem:[#allocation19 + $0x218] sm:$0xff] }
 0x582   :  { %v3157_v34 = vpop.eup %3156 }
 0x583   :  { %v3926_v35 = vmul.f32 %v3157_v34, %v3873_v15  ;;  %v2901_v15 = vpack.c.bf16 %v1306_v43, %v1305_v42  ;;  %v1766_v42 = vld [vmem:[#allocation19 + $0x188] sm:$0xff] }
 0x585   :  { %2602 = vmatprep.mubr.f32.mxu1 %v3926_v35 }
 0x586   :  { %v3159_v37 = vpop.eup %3158 }
 0x587   :  { %v3930_v1 = vmul.f32 %v3159_v37, %v3875_v18  ;;  %v1309_v18 = vld [vmem:[#allocation19 + $0xd0] sm:$0xff]  ;;  %v2945_v37 = vpack.c.bf16 %v1545_v3, %v1544_v36  ;;  %v2006_v3 = vld [vmem:[#allocation19 + $0x240] sm:$0xff] }
 0x588   :  { %v2909_v53 = vpack.c.bf16 %v1310_v47, %v1309_v18  ;;  %v1768_v18 = vld [vmem:[#allocation19 + $0x198] sm:$0xff] }
 0x589   :  { %2603 = vmatmul.mubr.f32.vlgmr.msra.gmra.mrb[12].mxu1 %v3930_v1 }
 0x58a   :  { %2892 = vmatpush3.bf16.msra.mxu1 %v2889_v57  ;;  %v1312_v57 = vld [vmem:[#allocation19 + $0xe8] sm:$0xff] }
 0x58b   :  { %2894 = vmatprep.subr.bf16.mxu1 %v2893_v38  ;;  %v2913_v58 = vpack.c.bf16 %v1312_v57, %v1311_v56  ;;  %v1773_v57 = vld [vmem:[#allocation19 + $0x1c0] sm:$0xff] }
 0x58e   :  { %2896 = vmatpush3.bf16.msra.mxu1 %v2893_v38  ;;  %v1546_v38 = vld [vmem:[#allocation19 + $0x170] sm:$0xff] }
 0x58f   :  { %2898 = vmatprep.subr.bf16.mxu1 %v2897_v41  ;;  %v2949_v40 = vpack.c.bf16 %v1547_v39, %v1546_v38  ;;  %v2008_v38 = vld [vmem:[#allocation19 + $0x250] sm:$0xff]  ;;  %v2009_v39 = vld [vmem:[#allocation19 + $0x258] sm:$0xff] }
 0x592   :  { %2900 = vmatpush3.bf16.msra.mxu1 %v2897_v41  ;;  %v1765_v41 = vld [vmem:[#allocation19 + $0x180] sm:$0xff] }
 0x593   :  { %2902 = vmatprep.subr.bf16.mxu1 %v2901_v15  ;;  %v2953_v44 = vpack.c.bf16 %v1766_v42, %v1765_v41 }
 0x595   :  { %v1289_v49 = vpop.xlane.xlu0 %1288 }
 0x596   :  { %v1292_v50 = vmax.f32 %v1289_v49, 1e-24  ;;  %2904 = vmatpush3.bf16.msra.mxu1 %v2901_v15 }
 0x597   :  { %v1291_v51 = vpop.xlane.xlu1 %1290  ;;  %2906 = vmatprep.subr.bf16.mxu1 %v2905_v46 }
 0x598   :  { %3160 = vrsqrt.f32 %v1292_v50  ;;  %v1293_v55 = vmax.f32 %v1291_v51, 1e-24  ;;  %v1769_v50 = vld [vmem:[#allocation19 + $0x1a0] sm:$0xff]  ;;  %v1770_v51 = vld [vmem:[#allocation19 + $0x1a8] sm:$0xff] }
 0x59a   :  { %3162 = vrsqrt.f32 %v1293_v55  ;;  %2908 = vmatpush3.bf16.msra.mxu1 %v2905_v46  ;;  %v1767_v46 = vld [vmem:[#allocation19 + $0x190] sm:$0xff]  ;;  %v1772_v55 = vld [vmem:[#allocation19 + $0x1b8] sm:$0xff] }
 0x59b   :  { %2910 = vmatprep.subr.bf16.mxu1 %v2909_v53  ;;  %v2957_v49 = vpack.c.bf16 %v1768_v18, %v1767_v46  ;;  %v2011_v46 = vld [vmem:[#allocation19 + $0x268] sm:$0xff] }
 0x59e   :  { %2912 = vmatpush3.bf16.msra.mxu1 %v2909_v53  ;;  %v1771_v53 = vld [vmem:[#allocation19 + $0x1b0] sm:$0xff] }
 0x59f   :  { %2914 = vmatprep.subr.bf16.mxu1 %v2913_v58  ;;  %v2965_v56 = vpack.c.bf16 %v1772_v55, %v1771_v53  ;;  %v2013_v53 = vld [vmem:[#allocation19 + $0x278] sm:$0xff] }
 0x5a2   :  { %v3161_v5 = vpop.eup %3160  ;;  %2916 = vmatpush3.bf16.msra.mxu1 %v2913_v58  ;;  %v1774_v58 = vld [vmem:[#allocation19 + $0x1c8] sm:$0xff] }
 0x5a3   :  { %2918 = vmatprep.subr.bf16.mxu1 %v2917_v62  ;;  %v3934_v6 = vmul.f32 %v3161_v5, %v3881_v48  ;;  %v2929_v48 = vpack.c.bf16 %v1537_v17, %v1536_v16  ;;  %v2973_v5 = vpack.c.bf16 %v1776_v60, %v1775_v59  ;;  %v1780_v16 = vld [vmem:[#allocation19 + $0x1f8] sm:$0xff] }
 0x5a4   :  { %v3163_v8 = vpop.eup %3162 }
 0x5a5   :  { %2657 = vmatprep.mubr.f32.mxu1 %v3934_v6  ;;  %v3938_v13 = vmul.f32 %v3163_v8, %v3883_v54  ;;  %v2937_v54 = vpack.c.bf16 %v1541_v26, %v1540_v24  ;;  %v1777_v8 = vld [vmem:[#allocation19 + $0x1e0] sm:$0xff] }
 0x5a6   :  { %2920 = vmatpush3.bf16.msra.mxu1 %v2917_v62  ;;  %v2977_v11 = vpack.c.bf16 %v1778_v10, %v1777_v8 }
 0x5a7   :  { %2922 = vmatprep.subr.bf16.mxu1 %v2921_v7 }
 0x5a9   :  { %2658 = vmatmul.mubr.f32.vlgmr.msra.gmra.mrb[14].mxu1 %v3938_v13 }
 0x5aa   :  { %2924 = vmatpush3.bf16.msra.mxu1 %v2921_v7 }
 0x5ab   :  { %2926 = vmatprep.subr.bf16.mxu1 %v2925_v14 }
 0x5ae   :  { %2928 = vmatpush3.bf16.msra.mxu1 %v2925_v14  ;;  %v1779_v14 = vld [vmem:[#allocation19 + $0x1f0] sm:$0xff] }
 0x5af   :  { %2930 = vmatprep.subr.bf16.mxu1 %v2929_v48  ;;  %v2981_v17 = vpack.c.bf16 %v1780_v16, %v1779_v14 }
 0x5b2   :  { %2932 = vmatpush3.bf16.msra.mxu1 %v2929_v48  ;;  %v1998_v48 = vld [vmem:[#allocation19 + $0x200] sm:$0xff] }
 0x5b3   :  { %2934 = vmatprep.subr.bf16.mxu1 %v2933_v22  ;;  %v2985_v24 = vpack.c.bf16 %v1999_v19, %v1998_v48 }
 0x5b5   :  { %v1522_v30 = vpop.xlane.xlu0 %1521 }
 0x5b6   :  { %v1525_v31 = vmax.f32 %v1522_v30, 1e-24  ;;  %2936 = vmatpush3.bf16.msra.mxu1 %v2933_v22 }
 0x5b7   :  { %v1524_v32 = vpop.xlane.xlu1 %1523  ;;  %2938 = vmatprep.subr.bf16.mxu1 %v2937_v54 }
 0x5b8   :  { %3164 = vrsqrt.f32 %v1525_v31  ;;  %v1526_v34 = vmax.f32 %v1524_v32, 1e-24  ;;  %v2002_v31 = vld [vmem:[#allocation19 + $0x220] sm:$0xff]  ;;  %v2003_v32 = vld [vmem:[#allocation19 + $0x228] sm:$0xff] }
 0x5ba   :  { %3166 = vrsqrt.f32 %v1526_v34  ;;  %2940 = vmatpush3.bf16.msra.mxu1 %v2937_v54  ;;  %v2000_v54 = vld [vmem:[#allocation19 + $0x210] sm:$0xff]  ;;  %v2005_v34 = vld [vmem:[#allocation19 + $0x238] sm:$0xff] }
 0x5bb   :  { %2942 = vmatprep.subr.bf16.mxu1 %v2941_v33  ;;  %v2989_v30 = vpack.c.bf16 %v2001_v27, %v2000_v54 }
 0x5be   :  { %2944 = vmatpush3.bf16.msra.mxu1 %v2941_v33  ;;  %v2004_v33 = vld [vmem:[#allocation19 + $0x230] sm:$0xff] }
 0x5bf   :  { %2946 = vmatprep.subr.bf16.mxu1 %v2945_v37  ;;  %v2997_v36 = vpack.c.bf16 %v2005_v34, %v2004_v33 }
 0x5c2   :  { %v3165_v43 = vpop.eup %3164  ;;  %2948 = vmatpush3.bf16.msra.mxu1 %v2945_v37  ;;  %v2007_v37 = vld [vmem:[#allocation19 + $0x248] sm:$0xff] }
 0x5c3   :  { %2950 = vmatprep.subr.bf16.mxu1 %v2949_v40  ;;  %v3942_v15 = vmul.f32 %v3165_v43, %v3889_v61  ;;  %v2961_v61 = vpack.c.bf16 %v1770_v51, %v1769_v50  ;;  %v3005_v43 = vpack.c.bf16 %v2009_v39, %v2008_v38 }
 0x5c4   :  { %v3167_v45 = vpop.eup %3166 }
 0x5c5   :  { %2712 = vmatprep.mubr.f32.mxu1 %v3942_v15  ;;  %v3946_v47 = vmul.f32 %v3167_v45, %v3891_v2  ;;  %v2969_v2 = vpack.c.bf16 %v1774_v58, %v1773_v57  ;;  %v2010_v45 = vld [vmem:[#allocation19 + $0x260] sm:$0xff] }
 0x5c6   :  { %2952 = vmatpush3.bf16.msra.mxu1 %v2949_v40  ;;  %v3009_v51 = vpack.c.bf16 %v2011_v46, %v2010_v45 }
 0x5c7   :  { %2954 = vmatprep.subr.bf16.mxu1 %v2953_v44 }
 0x5c9   :  { %2713 = vmatmul.mubr.f32.vlgmr.msra.gmra.mrb[16].mxu1 %v3946_v47 }
 0x5ca   :  { %2956 = vmatpush3.bf16.msra.mxu1 %v2953_v44 }
 0x5cb   :  { %2958 = vmatprep.subr.bf16.mxu1 %v2957_v49 }
 0x5ce   :  { %2960 = vmatpush3.bf16.msra.mxu1 %v2957_v49 }
 0x5cf   :  { %2962 = vmatprep.subr.bf16.mxu1 %v2961_v61 }
 0x5d2   :  { %2964 = vmatpush3.bf16.msra.mxu1 %v2961_v61  ;;  %v2012_v61 = vld [vmem:[#allocation19 + $0x270] sm:$0xff] }
 0x5d3   :  { %2966 = vmatprep.subr.bf16.mxu1 %v2965_v56 }
 0x5d5   :  { %v1755_v62 = vpop.xlane.xlu0 %1754 }
 0x5d6   :  { %v1758_v63 = vmax.f32 %v1755_v62, 1e-24  ;;  %2968 = vmatpush3.bf16.msra.mxu1 %v2965_v56  ;;  %v3013_v56 = vpack.c.bf16 %v2013_v53, %v2012_v61 }
 0x5d7   :  { %v1757_v4 = vpop.xlane.xlu1 %1756  ;;  %2970 = vmatprep.subr.bf16.mxu1 %v2969_v2 }
 0x5d8   :  { %3168 = vrsqrt.f32 %v1758_v63  ;;  %v1759_v7 = vmax.f32 %v1757_v4, 1e-24 }
 0x5da   :  { %3170 = vrsqrt.f32 %v1759_v7  ;;  %2972 = vmatpush3.bf16.msra.mxu1 %v2969_v2 }
 0x5db   :  { %2974 = vmatprep.subr.bf16.mxu1 %v2973_v5 }
 0x5de   :  { %2976 = vmatpush3.bf16.msra.mxu1 %v2973_v5 }
 0x5df   :  { %2978 = vmatprep.subr.bf16.mxu1 %v2977_v11 }
 0x5e2   :  { %v3169_v20 = vpop.eup %3168  ;;  %2980 = vmatpush3.bf16.msra.mxu1 %v2977_v11 }
 0x5e3   :  { %2982 = vmatprep.subr.bf16.mxu1 %v2981_v17  ;;  %v3950_v22 = vmul.f32 %v3169_v20, %v3897_v9  ;;  %v2993_v9 = vpack.c.bf16 %v2003_v32, %v2002_v31 }
 0x5e4   :  { %v3171_v26 = vpop.eup %3170 }
 0x5e5   :  { %2767 = vmatprep.mubr.f32.mxu1 %v3950_v22  ;;  %v3954_v28 = vmul.f32 %v3171_v26, %v3899_v12  ;;  %v3001_v12 = vpack.c.bf16 %v2007_v37, %v2006_v3 }
 0x5e6   :  { %2984 = vmatpush3.bf16.msra.mxu1 %v2981_v17 }
 0x5e7   :  { %2986 = vmatprep.subr.bf16.mxu1 %v2985_v24 }
 0x5e9   :  { %2768 = vmatmul.mubr.f32.vlgmr.msra.gmra.mrb[18].mxu1 %v3954_v28 }
 0x5ea   :  { %2988 = vmatpush3.bf16.msra.mxu1 %v2985_v24 }
 0x5eb   :  { %2990 = vmatprep.subr.bf16.mxu1 %v2989_v30 }
 0x5ee   :  { %2992 = vmatpush3.bf16.msra.mxu1 %v2989_v30 }
 0x5ef   :  { %2994 = vmatprep.subr.bf16.mxu1 %v2993_v9 }
 0x5f2   :  { %2996 = vmatpush3.bf16.msra.mxu1 %v2993_v9 }
 0x5f3   :  { %2998 = vmatprep.subr.bf16.mxu1 %v2997_v36 }
 0x5f5   :  { %v1988_v40 = vpop.xlane.xlu0 %1987 }
 0x5f6   :  { %v1991_v41 = vmax.f32 %v1988_v40, 1e-24  ;;  %3000 = vmatpush3.bf16.msra.mxu1 %v2997_v36 }
 0x5f7   :  { %v1990_v42 = vpop.xlane.xlu1 %1989  ;;  %3002 = vmatprep.subr.bf16.mxu1 %v3001_v12 }
 0x5f8   :  { %3172 = vrsqrt.f32 %v1991_v41  ;;  %v1992_v44 = vmax.f32 %v1990_v42, 1e-24 }
 0x5f9   :  { %v509_v18 = vpop.xlane.xlu0 %508 }
 0x5fa   :  { %3174 = vrsqrt.f32 %v1992_v44  ;;  %vm512_vm3 = vcmp.eq.f32.partialorder %v3918_v52, %v509_v18  ;;  %3004 = vmatpush3.bf16.msra.mxu1 %v3001_v12 }
 0x5fb   :  { %v511_v49 = vpop.xlane.xlu1 %510  ;;  %v514_v50 = vsel %vm512_vm3, %v3908_v23, 128.0  ;;  %3006 = vmatprep.subr.bf16.mxu1 %v3005_v43 }
 0x5fc   :  { %vm513_vm4 = vcmp.eq.f32.partialorder %v3922_v29, %v511_v49  ;;  %516 = vmin.xlane.f32.xlu0 %v514_v50 }
 0x5fd   :  { %v515_v55 = vsel %vm513_vm4, %v3908_v23, 128.0 }
 0x5fe   :  { %3008 = vmatpush3.bf16.msra.mxu1 %v3005_v43  ;;  %518 = vmin.xlane.f32.xlu1 %v515_v55 }
 0x5ff   :  { %3010 = vmatprep.subr.bf16.mxu1 %v3009_v51 }
 0x602   :  { %v3173_v57 = vpop.eup %3172  ;;  %3012 = vmatpush3.bf16.msra.mxu1 %v3009_v51 }
 0x603   :  { %3014 = vmatprep.subr.bf16.mxu1 %v3013_v56  ;;  %v3962_v52 = vmul.f32 %v3173_v57, %v3906_v21 }
 0x604   :  { %v3175_v58 = vpop.eup %3174 }
 0x605   :  { %2822 = vmatprep.mubr.f32.mxu1 %v3962_v52  ;;  %v3966_v29 = vmul.f32 %v3175_v58, %v3910_v25 }
 0x606   :  { %3016 = vmatpush3.bf16.msra.mxu1 %v3013_v56 }
 0x609   :  { %2823 = vmatmul.mubr.f32.vlgmr.msra.gmra.mrb[20].mxu1 %v3966_v29 }
 0x65c   :  { %v2604_v23 = vpop.f32.mrb[12].mxu1 }
 0x65d   :  { %v1148_v2 = vpop.f32.mrb[13].mxu1 }
 0x65e   :  { %3429 = shalt.err (!%p3426_p8)
}
 0x65f   :  { %s3430_s29 = scalar_lea.hbm %s4072_s12, 256 }
 0x660   :  { %p3431_p9 = scmp.ne.s32.totalorder %s4072_s12, %s3430_s29  ;;  %p3434_p10 = scmp.lt.u32.totalorder %s3430_s29, %s4072_s12 }
 0x662   :  { %p3436_p11 = pnand %p3434_p10, %p3431_p9 }
 0x664   :  { %3439 = shalt.err (!%p3436_p11)
}
 0x665   :  { %2130 = dma.vmem_to_hbm [thread:$0]  %s2125_s26, 256, %s4072_s12, [#allocation22], %s3529_s3, %s3529_s3, %s3530_s16  }
 0x666   :  { %s3440_s18 = scalar_lea.vmem %s3969_s1, 256  ;;  %p3445_p13 = scmp.lt.s32.totalorder %s3969_s1, %s3969_s1 }
 0x667   :  { %p3441_p12 = scmp.ne.s32.totalorder %s3969_s1, %s3440_s18  ;;  %p3446_p0 = scmp.lt.s32.totalorder %s3440_s18, %s3440_s18 }
 0x669   :  { %p3447_p1 = por %p3446_p0, %p3445_p13 }
 0x66b   :  { %p3448_p2 = pnand %p3447_p1, %p3441_p12 }
 0x66d   :  { %3451 = shalt.err (!%p3448_p2)
}
 0x66e   :  { %s3452_s7 = scalar_lea.hbm %s4071_s11, 256 }
 0x66f   :  { %p3453_p3 = scmp.ne.s32.totalorder %s4071_s11, %s3452_s7  ;;  %p3456_p4 = scmp.lt.u32.totalorder %s3452_s7, %s4071_s11 }
 0x671   :  { %p3458_p5 = pnand %p3456_p4, %p3453_p3 }
 0x673   :  { %3461 = shalt.err (!%p3458_p5)
}
 0x674   :  { %2118 = dma.vmem_to_hbm [thread:$0]  %s3969_s1, 256, %s4071_s11, [#allocation4], %s3529_s3, %s3529_s3, %s3530_s16  }
 0x675   :  { %s3548_s11 = smov [#allocation24]  }
 0x676   :  { %s2148_s8 = sshll.u32 %s3548_s11, 4  ;;  %s2149_s8 = int_to_ptr.vmem [resolvable:$true] %s2148_s8 }
 0x677   :  { %s3462_s25 = scalar_lea.vmem %s2149_s8, 256  ;;  %p3467_p7 = scmp.lt.s32.totalorder %s2149_s8, %s2149_s8 }
 0x678   :  { %p3463_p6 = scmp.ne.s32.totalorder %s2149_s8, %s3462_s25  ;;  %p3468_p8 = scmp.lt.s32.totalorder %s3462_s25, %s3462_s25 }
 0x67a   :  { %p3469_p9 = por %p3468_p8, %p3467_p7 }
 0x67c   :  { %v2659_v21 = vpop.f32.mrb[14].mxu1  ;;  %p3470_p10 = pnand %p3469_p9, %p3463_p6 }
 0x67d   :  { %v1381_v25 = vpop.f32.mrb[15].mxu1 }
 0x689   :  { %v517_v59 = vpop.xlane.xlu0 %516 }
 0x68a   :  { %vm1157_vm5 = vcmp.eq.f32.partialorder %v517_v59, 0.0  ;;  %vm1390_vm6 = vcmp.eq.f32.partialorder %v517_v59, 1.0  ;;  %vm1623_vm7 = vcmp.eq.f32.partialorder %v517_v59, 2.0  ;;  %vm1856_vm8 = vcmp.eq.f32.partialorder %v517_v59, 3.0 }
 0x68b   :  { %v2241_v60 = vsel %vm1157_vm5, 1.0, %v3543_v0  ;;  %v2252_v62 = vsel %vm1390_vm6, 1.0, %v3543_v0  ;;  %v519_v63 = vpop.xlane.xlu1 %518  ;;  %v2263_v4 = vsel %vm1623_vm7, 1.0, %v3543_v0  ;;  %v4010_v5 = vsel %vm1856_vm8, 1.0, %v3543_v0 }
 0x68c   :  { %v1167_v7 = vmul.f32 %v2241_v60, %v3926_v35  ;;  %v1400_v8 = vmul.f32 %v2252_v62, %v3934_v6  ;;  %vm1158_vm9 = vcmp.eq.f32.partialorder %v519_v63, 0.0  ;;  %vm1391_vm10 = vcmp.eq.f32.partialorder %v519_v63, 1.0 }
 0x68d   :  { %v2242_v10 = vsel %vm1158_vm9, 1.0, %v3543_v0  ;;  %v2253_v11 = vsel %vm1391_vm10, 1.0, %v3543_v0  ;;  %vm1624_vm11 = vcmp.eq.f32.partialorder %v519_v63, 2.0  ;;  %v1163_v14 = vmul.f32 %v2241_v60, %v1148_v2 }
 0x68e   :  { %v1168_v16 = vmul.f32 %v2242_v10, %v3930_v1  ;;  %v1401_v17 = vmul.f32 %v2253_v11, %v3938_v13  ;;  %v1164_v48 = vmul.f32 %v2604_v23, %v2242_v10  ;;  %v1397_v19 = vmul.f32 %v2659_v21, %v2253_v11 }
 0x68f   :  { %v2264_v20 = vsel %vm1624_vm11, 1.0, %v3543_v0  ;;  %v1396_v24 = vmul.f32 %v2252_v62, %v1381_v25  ;;  %v1402_v35 = vadd.f32 %v1400_v8, %v1167_v7  ;;  %v1633_v6 = vmul.f32 %v2263_v4, %v3942_v15 }
 0x690   :  { %v1399_v26 = vadd.f32 %v1397_v19, %v1164_v48  ;;  %v1403_v54 = vadd.f32 %v1401_v17, %v1168_v16  ;;  %v1634_v27 = vmul.f32 %v2264_v20, %v3946_v47  ;;  %vm1857_vm12 = vcmp.eq.f32.partialorder %v519_v63, 3.0 }
 0x691   :  { %v1398_v30 = vadd.f32 %v1396_v24, %v1163_v14  ;;  %v1635_v31 = vadd.f32 %v1633_v6, %v1402_v35  ;;  %v2275_v32 = vsel %vm1857_vm12, 1.0, %v3543_v0  ;;  %v1866_v1 = vmul.f32 %v4010_v5, %v3950_v22 }
 0x692   :  { %v1636_v13 = vadd.f32 %v1634_v27, %v1403_v54  ;;  %v1867_v9 = vmul.f32 %v2275_v32, %v3954_v28  ;;  %vm2090_vm13 = vcmp.eq.f32.partialorder %v519_v63, 4.0  ;;  %vm2089_vm14 = vcmp.eq.f32.partialorder %v517_v59, 4.0 }
 0x693   :  { %v1868_v33 = vadd.f32 %v1866_v1, %v1635_v31  ;;  %v2286_v15 = vsel %vm2090_vm13, 1.0, %v3543_v0  ;;  %v2285_v34 = vsel %vm2089_vm14, 1.0, %v3543_v0 }
 0x694   :  { %v1869_v47 = vadd.f32 %v1867_v9, %v1636_v13  ;;  %v2100_v36 = vmul.f32 %v2286_v15, %v3966_v29  ;;  %v2099_v3 = vmul.f32 %v2285_v34, %v3962_v52 }
 0x696   :  { %v2102_v37 = vadd.f32 %v2100_v36, %v1869_v47  ;;  %v2101_v12 = vadd.f32 %v2099_v3, %v1868_v33 }
 0x698   :  { %2106 = vst [vmem:[#allocation24 + $0x8] sm:$0xff] %v2102_v37  ;;  %2105 = vst [vmem:[#allocation24] sm:$0xff] %v2101_v12 }
 0x699   :  { %3473 = shalt.err (!%p3470_p10)
}
 0x69a   :  { %s3474_s21 = scalar_lea.hbm %s4074_s14, 256 }
 0x69b   :  { %p3475_p11 = scmp.ne.s32.totalorder %s4074_s14, %s3474_s21  ;;  %p3478_p12 = scmp.lt.u32.totalorder %s3474_s21, %s4074_s14 }
 0x69d   :  { %p3480_p13 = pnand %p3478_p12, %p3475_p11 }
 0x69f   :  { %3483 = shalt.err (!%p3480_p13)
}
 0x6a0   :  { %2154 = dma.vmem_to_hbm [thread:$0]  %s2149_s8, 256, %s4074_s14, [#allocation25], %s3529_s3, %s3529_s3, %s3530_s16   ;;  %v2714_v0 = vpop.f32.mrb[16].mxu1 }
 0x6a1   :  { %v1630_v22 = vmul.f32 %v2714_v0, %v2264_v20  ;;  %v1614_v28 = vpop.f32.mrb[17].mxu1  ;;  %s3549_s17 = smov [#allocation23]  }
 0x6a2   :  { %v1629_v38 = vmul.f32 %v2263_v4, %v1614_v28  ;;  %s2136_s0 = sshll.u32 %s3549_s17, 4  ;;  %s2137_s0 = int_to_ptr.vmem [resolvable:$true] %s2136_s0 }
 0x6a3   :  { %v1632_v39 = vadd.f32 %v1630_v22, %v1399_v26  ;;  %s3484_s14 = scalar_lea.vmem %s2137_s0, 256  ;;  %p3489_p1 = scmp.lt.s32.totalorder %s2137_s0, %s2137_s0 }
 0x6a4   :  { %v1631_v40 = vadd.f32 %v1629_v38, %v1398_v30  ;;  %p3485_p0 = scmp.ne.s32.totalorder %s2137_s0, %s3484_s14  ;;  %p3490_p2 = scmp.lt.s32.totalorder %s3484_s14, %s3484_s14 }
 0x6a6   :  { %p3491_p3 = por %p3490_p2, %p3489_p1 }
 0x6a8   :  { %p3492_p4 = pnand %p3491_p3, %p3485_p0 }
 0x6bc   :  { %v2769_v41 = vpop.f32.mrb[18].mxu1 }
 0x6bd   :  { %v1863_v42 = vmul.f32 %v2769_v41, %v2275_v32  ;;  %v1847_v43 = vpop.f32.mrb[19].mxu1 }
 0x6be   :  { %v1862_v44 = vmul.f32 %v4010_v5, %v1847_v43 }
 0x6bf   :  { %v1865_v45 = vadd.f32 %v1863_v42, %v1632_v39 }
 0x6c0   :  { %v1864_v46 = vadd.f32 %v1862_v44, %v1631_v40 }
 0x6dc   :  { %v2824_v18 = vpop.f32.mrb[20].mxu1 }
 0x6dd   :  { %v2096_v49 = vmul.f32 %v2824_v18, %v2286_v15  ;;  %v2080_v50 = vpop.f32.mrb[21].mxu1 }
 0x6de   :  { %v2095_v51 = vmul.f32 %v2285_v34, %v2080_v50 }
 0x6df   :  { %v2098_v61 = vadd.f32 %v2096_v49, %v1865_v45 }
 0x6e0   :  { %v2097_v53 = vadd.f32 %v2095_v51, %v1864_v46 }
 0x6e1   :  { %2104 = vst [vmem:[#allocation23 + $0x8] sm:$0xff] %v2098_v61 }
 0x6e2   :  { %2103 = vst [vmem:[#allocation23] sm:$0xff] %v2097_v53 }
 0x6e3   :  { %3495 = shalt.err (!%p3492_p4)
}
 0x6e4   :  { %s3496_s9 = scalar_lea.hbm %s4073_s13, 256 }
 0x6e5   :  { %p3497_p5 = scmp.ne.s32.totalorder %s4073_s13, %s3496_s9  ;;  %p3500_p6 = scmp.lt.u32.totalorder %s3496_s9, %s4073_s13 }
 0x6e7   :  { %p3502_p7 = pnand %p3500_p6, %p3497_p5 }
 0x6e9   :  { %3505 = shalt.err (!%p3502_p7)
}
 0x6ea   :  { %2142 = dma.vmem_to_hbm [thread:$0]  %s2137_s0, 256, %s4073_s13, [#allocation22], %s3529_s3, %s3529_s3, %s3530_s16  }
 0x6eb   :  { %3518 = dma.done.wait [#allocation4], 256  }
 0x6ec   :  { %3519 = vsyncadd [#allocation4], 4294967040 }
 0x6ed   :  { %3520 = dma.done.wait [#allocation22], 512  }
 0x6ee   :  { %3521 = vsyncadd [#allocation22], 4294966784 }
 0x6ef   :  { %3522 = dma.done.wait [#allocation25], 256  }
 0x6f0   :  { %3523 = vsyncadd [#allocation25], 4294967040 }
 0x6f1   :  { %2167 = vsyncpa [#allocation3], 1 }
 0x6f2   :  { %2168 = vsyncpa [#allocation6], 1 }
 0x6f3   :  { %2169 = vsyncpa [#allocation9], 1 }
 0x6f4   :  { %2170 = vsyncpa [#allocation12], 1 }
 0x6f5   :  { %2171 = vsyncpa [#allocation15], 1 }
 0x6f6   :  { %2172 = vsyncpa [#allocation18], 1 }
 0x6f7   :  { %2173 = vsyncpa [#allocation4], 1 }
 0x6f8   :  { %2174 = vsyncpa [#allocation22], 1 }
 0x6f9   :  { %2175 = vsyncpa [#allocation25], 1 }

// kernel: tpu_custom_call.1
= control target key start
LH: loop header
LB: loop body
LE: loop exit
PB: predicated region body
PF: predicated region fallthrough
CT: control target
= control target key end

     0   :  { %20 = vsyncpa [#allocation3], 0  ;;  %s4060_s0 = inlined_call_operand.hbm [shape: bf16[16,64], index: 0, kind: input, shape index: {}]   ;;  %s4061_s1 = inlined_call_operand.hbm [shape: bf16[64,128], index: 1, kind: input, shape index: {}]   ;;  %s4062_s2 = inlined_call_operand.hbm [shape: f32[1,128], index: 2, kind: input, shape index: {}]   ;;  %s4063_s3 = inlined_call_operand.hbm [shape: bf16[128,128], index: 3, kind: input, shape index: {}]   ;;  %s4064_s4 = inlined_call_operand.hbm [shape: f32[1,128], index: 4, kind: input, shape index: {}]   ;;  %s4065_s5 = inlined_call_operand.hbm [shape: f32[128,128], index: 5, kind: input, shape index: {}]   ;;  %s4066_s6 = inlined_call_operand.hbm [shape: bf16[128,640], index: 6, kind: input, shape index: {}]   ;;  %s4067_s7 = inlined_call_operand.hbm [shape: f32[1,640], index: 7, kind: input, shape index: {}]   ;;  %s4068_s8 = inlined_call_operand.hbm [shape: bf16[5,128,128], index: 8, kind: input, shape index: {}]   ;;  %s4069_s9 = inlined_call_operand.hbm [shape: f32[5,1,128], index: 9, kind: input, shape index: {}]   ;;  %s4070_s10 = inlined_call_operand.hbm [shape: f32[5,128,128], index: 10, kind: input, shape index: {}]   ;;  %s4071_s11 = inlined_call_operand.hbm [shape: f32[16,128], index: 11, kind: output, shape index: {0}]   ;;  %s4072_s12 = inlined_call_operand.hbm [shape: f32[16,128], index: 12, kind: output, shape index: {1}]   ;;  %s4073_s13 = inlined_call_operand.hbm [shape: f32[16,128], index: 13, kind: output, shape index: {2}]   ;;  %s4074_s14 = inlined_call_operand.hbm [shape: f32[16,128], index: 14, kind: output, shape index: {3}]  }
   0x1   :  { %21 = vsyncpa [#allocation6], 0 }
   0x2   :  { %22 = vsyncpa [#allocation9], 0 }
   0x3   :  { %23 = vsyncpa [#allocation12], 0 }
   0x4   :  { %24 = vsyncpa [#allocation15], 0 }
   0x5   :  { %25 = vsyncpa [#allocation18], 0 }
   0x6   :  { %26 = vsyncpa [#allocation4], 0 }
   0x7   :  { %27 = vsyncpa [#allocation22], 0 }
   0x8   :  { %28 = vsyncpa [#allocation25], 0  ;;  %s3524_s29 = smov [#allocation5]   ;;  %s3525_s15 = smov [#allocation8]  }
   0x9   :  { %s46_s30 = sshll.u32 %s3524_s29, 4  ;;  %s68_s16 = sshll.u32 %s3525_s15, 4  ;;  %s47_s30 = int_to_ptr.vmem [resolvable:$true] %s46_s30  ;;  %s3625_s16 = int_to_ptr.vmem [resolvable:$true] %s68_s16 }
   0xa   :  { %s3176_s19 = scalar_lea.hbm %s4061_s1, 512 }
   0xb   :  { %p3177_p0 = scmp.ne.s32.totalorder %s4061_s1, %s3176_s19  ;;  %p3180_p1 = scmp.lt.u32.totalorder %s3176_s19, %s4061_s1 }
   0xd   :  { %p3182_p2 = pnand %p3180_p1, %p3177_p0 }
   0xf   :  { %3185 = shalt.err (!%p3182_p2)
}
  0x10   :  { %s3186_s24 = scalar_lea.vmem %s47_s30, 512  ;;  %p3191_p4 = scmp.lt.s32.totalorder %s47_s30, %s47_s30 }
  0x11   :  { %p3187_p3 = scmp.ne.s32.totalorder %s47_s30, %s3186_s24  ;;  %p3192_p5 = scmp.lt.s32.totalorder %s3186_s24, %s3186_s24 }
  0x13   :  { %p3193_p6 = por %p3192_p5, %p3191_p4 }
  0x15   :  { %p3194_p7 = pnand %p3193_p6, %p3187_p3 }
  0x17   :  { %3197 = shalt.err (!%p3194_p7)
}
  0x18   :  { %s3526_s25 = smov 64   ;;  %s3527_s26 = smov 4  }
  0x19   :  { %52 = dma.hbm_to_vmem [thread:$0]  %s4061_s1, 512, %s47_s30, [#allocation6], %s3526_s25, %s3526_s25, %s3527_s26  }
  0x1a   :  { %s3198_s17 = scalar_lea.hbm %s4063_s3, 1024 }
  0x1b   :  { %p3199_p8 = scmp.ne.s32.totalorder %s4063_s3, %s3198_s17  ;;  %p3202_p9 = scmp.lt.u32.totalorder %s3198_s17, %s4063_s3 }
  0x1d   :  { %p3204_p10 = pnand %p3202_p9, %p3199_p8 }
  0x1f   :  { %3207 = shalt.err (!%p3204_p10)
}
  0x20   :  { %s3208_s22 = scalar_lea.vmem %s3625_s16, 1024  ;;  %p3213_p12 = scmp.lt.s32.totalorder %s3625_s16, %s3625_s16 }
  0x21   :  { %p3209_p11 = scmp.ne.s32.totalorder %s3625_s16, %s3208_s22  ;;  %p3214_p13 = scmp.lt.s32.totalorder %s3208_s22, %s3208_s22 }
  0x23   :  { %p3215_p0 = por %p3214_p13, %p3213_p12 }
  0x25   :  { %p3216_p1 = pnand %p3215_p0, %p3209_p11 }
  0x27   :  { %3219 = shalt.err (!%p3216_p1)
}
  0x28   :  { %74 = dma.hbm_to_vmem [thread:$0]  %s4063_s3, 1024, %s3625_s16, [#allocation9], %s3526_s25, %s3526_s25, %s3527_s26  }
  0x29   :  { %s3528_s23 = smov [#allocation11]   ;;  %s3220_s29 = scalar_lea.hbm %s4065_s5, 2048 }
  0x2a   :  { %s90_s24 = sshll.u32 %s3528_s23, 4  ;;  %p3221_p2 = scmp.ne.s32.totalorder %s4065_s5, %s3220_s29  ;;  %s91_s24 = int_to_ptr.vmem [resolvable:$true] %s90_s24 }
  0x2b   :  { %p3224_p3 = scmp.lt.u32.totalorder %s3220_s29, %s4065_s5 }
  0x2d   :  { %p3226_p4 = pnand %p3224_p3, %p3221_p2 }
  0x2f   :  { %3229 = shalt.err (!%p3226_p4)
}
  0x30   :  { %s3230_s20 = scalar_lea.vmem %s91_s24, 2048  ;;  %p3235_p6 = scmp.lt.s32.totalorder %s91_s24, %s91_s24 }
  0x31   :  { %p3231_p5 = scmp.ne.s32.totalorder %s91_s24, %s3230_s20  ;;  %p3236_p7 = scmp.lt.s32.totalorder %s3230_s20, %s3230_s20 }
  0x33   :  { %p3237_p8 = por %p3236_p7, %p3235_p6 }
  0x35   :  { %p3238_p9 = pnand %p3237_p8, %p3231_p5 }
  0x37   :  { %3241 = shalt.err (!%p3238_p9)
}
  0x38   :  { %s3529_s3 = smov 128   ;;  %s3530_s16 = smov 8  }
  0x39   :  { %96 = dma.hbm_to_vmem [thread:$0]  %s4065_s5, 2048, %s91_s24, [#allocation12], %s3529_s3, %s3529_s3, %s3530_s16  }
  0x3a   :  { %s3531_s1 = smov [#allocation14]   ;;  %s3532_s23 = smov [#allocation17]  }
  0x3b   :  { %s115_s30 = sshll.u32 %s3531_s1, 4  ;;  %s136_s27 = sshll.u32 %s3532_s23, 4  ;;  %s116_s30 = int_to_ptr.vmem [resolvable:$true] %s115_s30  ;;  %s137_s27 = int_to_ptr.vmem [resolvable:$true] %s136_s27 }
  0x3c   :  { %s3242_s15 = scalar_lea.hbm %s4067_s7, 80 }
  0x3d   :  { %p3243_p10 = scmp.ne.s32.totalorder %s4067_s7, %s3242_s15  ;;  %p3246_p11 = scmp.lt.u32.totalorder %s3242_s15, %s4067_s7 }
  0x3f   :  { %p3248_p12 = pnand %p3246_p11, %p3243_p10 }
  0x41   :  { %3251 = shalt.err (!%p3248_p12)
}
  0x42   :  { %s3252_s5 = scalar_lea.vmem %s116_s30, 80  ;;  %s3256_s24 = scalar_lea.vmem %s116_s30, 96 }
  0x43   :  { %p3253_p13 = scmp.ne.s32.totalorder %s116_s30, %s3252_s5  ;;  %p3257_p0 = scmp.lt.s32.totalorder %s116_s30, %s116_s30 }
  0x44   :  { %p3258_p1 = scmp.lt.s32.totalorder %s3256_s24, %s3252_s5 }
  0x46   :  { %p3259_p2 = por %p3258_p1, %p3257_p0 }
  0x48   :  { %p3260_p3 = pnand %p3259_p2, %p3253_p13 }
  0x4a   :  { %3263 = shalt.err (!%p3260_p3)
}
  0x4b   :  { %118 = dma.hbm_to_vmem [thread:$0]  %s4067_s7, 80, %s116_s30, [#allocation15]  }
  0x4c   :  { %s3264_s28 = scalar_lea.hbm %s4069_s9, 80 }
  0x4d   :  { %p3265_p4 = scmp.ne.s32.totalorder %s4069_s9, %s3264_s28  ;;  %p3268_p5 = scmp.lt.u32.totalorder %s3264_s28, %s4069_s9 }
  0x4f   :  { %p3270_p6 = pnand %p3268_p5, %p3265_p4 }
  0x51   :  { %3273 = shalt.err (!%p3270_p6)
}
  0x52   :  { %s3274_s19 = scalar_lea.vmem %s137_s27, 80  ;;  %s3278_s20 = scalar_lea.vmem %s137_s27, 96 }
  0x53   :  { %p3275_p7 = scmp.ne.s32.totalorder %s137_s27, %s3274_s19  ;;  %p3279_p8 = scmp.lt.s32.totalorder %s137_s27, %s137_s27 }
  0x54   :  { %p3280_p9 = scmp.lt.s32.totalorder %s3278_s20, %s3274_s19 }
  0x56   :  { %p3281_p10 = por %p3280_p9, %p3279_p8 }
  0x58   :  { %p3282_p11 = pnand %p3281_p10, %p3275_p7 }
  0x5a   :  { %3285 = shalt.err (!%p3282_p11)
}
  0x5b   :  { %s3533_s7 = smov 16   ;;  %s3534_s30 = smov 1  }
  0x5c   :  { %142 = dma.hbm_to_vmem [thread:$0]  %s4069_s9, 80, %s137_s27, [#allocation18], %s3533_s7, %s3533_s7, %s3534_s30  }
  0x5d   :  { %s3535_s21 = smov [#allocation2]   ;;  %s3536_s1 = smov [#allocation7]  }
  0x5e   :  { %s34_s22 = sshll.u32 %s3535_s21, 4  ;;  %s59_s23 = sshll.u32 %s3536_s1, 4  ;;  %s35_s22 = int_to_ptr.vmem [resolvable:$true] %s34_s22  ;;  %s60_s23 = int_to_ptr.vmem [resolvable:$true] %s59_s23 }
  0x5f   :  { %s3286_s15 = scalar_lea.hbm %s4060_s0, 128 }
  0x60   :  { %p3287_p12 = scmp.ne.s32.totalorder %s4060_s0, %s3286_s15  ;;  %p3290_p13 = scmp.lt.u32.totalorder %s3286_s15, %s4060_s0 }
  0x62   :  { %p3292_p0 = pnand %p3290_p13, %p3287_p12 }
  0x64   :  { %3295 = shalt.err (!%p3292_p0)
}
  0x65   :  { %s3296_s9 = scalar_lea.vmem %s35_s22, 128  ;;  %p3301_p2 = scmp.lt.s32.totalorder %s35_s22, %s35_s22 }
  0x66   :  { %p3297_p1 = scmp.ne.s32.totalorder %s35_s22, %s3296_s9  ;;  %p3302_p3 = scmp.lt.s32.totalorder %s3296_s9, %s3296_s9 }
  0x68   :  { %p3303_p4 = por %p3302_p3, %p3301_p2 }
  0x6a   :  { %p3304_p5 = pnand %p3303_p4, %p3297_p1 }
  0x6c   :  { %3307 = shalt.err (!%p3304_p5)
}
  0x6d   :  { %40 = dma.hbm_to_vmem [thread:$0]  %s4060_s0, 128, %s35_s22, [#allocation3], %s3526_s25, %s3526_s25, %s3527_s26  }
  0x6e   :  { %s3308_s24 = scalar_lea.hbm %s4062_s2, 16 }
  0x6f   :  { %p3309_p6 = scmp.ne.s32.totalorder %s4062_s2, %s3308_s24  ;;  %p3312_p7 = scmp.lt.u32.totalorder %s3308_s24, %s4062_s2 }
  0x71   :  { %p3314_p8 = pnand %p3312_p7, %p3309_p6 }
  0x73   :  { %3317 = shalt.err (!%p3314_p8)
}
  0x74   :  { %s3318_s15 = scalar_lea.vmem %s60_s23, 16  ;;  %s3322_s17 = scalar_lea.vmem %s60_s23, 32 }
  0x75   :  { %p3319_p9 = scmp.ne.s32.totalorder %s60_s23, %s3318_s15  ;;  %p3323_p10 = scmp.lt.s32.totalorder %s60_s23, %s60_s23 }
  0x76   :  { %p3324_p11 = scmp.lt.s32.totalorder %s3322_s17, %s3318_s15 }
  0x78   :  { %p3325_p12 = por %p3324_p11, %p3323_p10 }
  0x7a   :  { %p3326_p13 = pnand %p3325_p12, %p3319_p9 }
  0x7c   :  { %3329 = shalt.err (!%p3326_p13)
}
  0x7d   :  { %62 = dma.hbm_to_vmem [thread:$0]  %s4062_s2, 16, %s60_s23, [#allocation6]  }
  0x7e   :  { %s3537_s18 = smov [#allocation10]   ;;  %s3538_s20 = smov [#allocation13]  }
  0x7f   :  { %s81_s19 = sshll.u32 %s3537_s18, 4  ;;  %s102_s9 = sshll.u32 %s3538_s20, 4  ;;  %s82_s19 = int_to_ptr.vmem [resolvable:$true] %s81_s19  ;;  %s103_s9 = int_to_ptr.vmem [resolvable:$true] %s102_s9 }
  0x80   :  { %s3330_s30 = scalar_lea.hbm %s4064_s4, 16 }
  0x81   :  { %p3331_p0 = scmp.ne.s32.totalorder %s4064_s4, %s3330_s30  ;;  %p3334_p1 = scmp.lt.u32.totalorder %s3330_s30, %s4064_s4 }
  0x83   :  { %p3336_p2 = pnand %p3334_p1, %p3331_p0 }
  0x85   :  { %3339 = shalt.err (!%p3336_p2)
}
  0x86   :  { %s3340_s2 = scalar_lea.vmem %s82_s19, 16  ;;  %s3344_s23 = scalar_lea.vmem %s82_s19, 32 }
  0x87   :  { %p3341_p3 = scmp.ne.s32.totalorder %s82_s19, %s3340_s2  ;;  %p3345_p4 = scmp.lt.s32.totalorder %s82_s19, %s82_s19 }
  0x88   :  { %p3346_p5 = scmp.lt.s32.totalorder %s3344_s23, %s3340_s2 }
  0x8a   :  { %p3347_p6 = por %p3346_p5, %p3345_p4 }
  0x8c   :  { %p3348_p7 = pnand %p3347_p6, %p3341_p3 }
  0x8e   :  { %3351 = shalt.err (!%p3348_p7)
}
  0x8f   :  { %84 = dma.hbm_to_vmem [thread:$0]  %s4064_s4, 16, %s82_s19, [#allocation9]  }
  0x90   :  { %s3352_s0 = scalar_lea.hbm %s4066_s6, 5120 }
  0x91   :  { %p3353_p8 = scmp.ne.s32.totalorder %s4066_s6, %s3352_s0  ;;  %p3356_p9 = scmp.lt.u32.totalorder %s3352_s0, %s4066_s6 }
  0x93   :  { %p3358_p10 = pnand %p3356_p9, %p3353_p8 }
  0x95   :  { %3361 = shalt.err (!%p3358_p10)
}
  0x96   :  { %s3362_s7 = scalar_lea.vmem %s103_s9, 5120  ;;  %p3367_p12 = scmp.lt.s32.totalorder %s103_s9, %s103_s9 }
  0x97   :  { %p3363_p11 = scmp.ne.s32.totalorder %s103_s9, %s3362_s7  ;;  %p3368_p13 = scmp.lt.s32.totalorder %s3362_s7, %s3362_s7 }
  0x99   :  { %p3369_p0 = por %p3368_p13, %p3367_p12 }
  0x9b   :  { %p3370_p1 = pnand %p3369_p0, %p3363_p11 }
  0x9d   :  { %3373 = shalt.err (!%p3370_p1)
}
  0x9e   :  { %s3539_s4 = smov 320   ;;  %s3540_s19 = smov 20  }
  0x9f   :  { %108 = dma.hbm_to_vmem [thread:$0]  %s4066_s6, 5120, %s103_s9, [#allocation12], %s3539_s4, %s3539_s4, %s3540_s19  }
  0xa0   :  { %s3541_s24 = smov [#allocation16]   ;;  %s3542_s1 = smov [#allocation19]  }
  0xa1   :  { %s124_s21 = sshll.u32 %s3541_s24, 4  ;;  %s148_s2 = sshll.u32 %s3542_s1, 4  ;;  %s125_s21 = int_to_ptr.vmem [resolvable:$true] %s124_s21  ;;  %s149_s2 = int_to_ptr.vmem [resolvable:$true] %s148_s2 }
  0xa2   :  { %s3374_s29 = scalar_lea.hbm %s4068_s8, 5120 }
  0xa3   :  { %p3375_p2 = scmp.ne.s32.totalorder %s4068_s8, %s3374_s29  ;;  %p3378_p3 = scmp.lt.u32.totalorder %s3374_s29, %s4068_s8 }
  0xa5   :  { %p3380_p4 = pnand %p3378_p3, %p3375_p2 }
  0xa7   :  { %3383 = shalt.err (!%p3380_p4)
}
  0xa8   :  { %s3384_s6 = scalar_lea.vmem %s125_s21, 5120  ;;  %p3389_p6 = scmp.lt.s32.totalorder %s125_s21, %s125_s21 }
  0xa9   :  { %p3385_p5 = scmp.ne.s32.totalorder %s125_s21, %s3384_s6  ;;  %p3390_p7 = scmp.lt.s32.totalorder %s3384_s6, %s3384_s6 }
  0xab   :  { %p3391_p8 = por %p3390_p7, %p3389_p6 }
  0xad   :  { %p3392_p9 = pnand %p3391_p8, %p3385_p5 }
  0xaf   :  { %3395 = shalt.err (!%p3392_p9)
}
  0xb0   :  { %130 = dma.hbm_to_vmem [thread:$0]  %s4068_s8, 5120, %s125_s21, [#allocation15], %s3526_s25, %s3526_s25, %s3527_s26  }
  0xb1   :  { %s3396_s7 = scalar_lea.hbm %s4070_s10, 10240 }
  0xb2   :  { %p3397_p10 = scmp.ne.s32.totalorder %s4070_s10, %s3396_s7  ;;  %p3400_p11 = scmp.lt.u32.totalorder %s3396_s7, %s4070_s10 }
  0xb4   :  { %p3402_p12 = pnand %p3400_p11, %p3397_p10 }
  0xb6   :  { %3405 = shalt.err (!%p3402_p12)
}
  0xb7   :  { %s3406_s24 = scalar_lea.vmem %s149_s2, 10240  ;;  %p3411_p0 = scmp.lt.s32.totalorder %s149_s2, %s149_s2 }
  0xb8   :  { %p3407_p13 = scmp.ne.s32.totalorder %s149_s2, %s3406_s24  ;;  %p3412_p1 = scmp.lt.s32.totalorder %s3406_s24, %s3406_s24 }
  0xba   :  { %p3413_p2 = por %p3412_p1, %p3411_p0 }
  0xbc   :  { %p3414_p3 = pnand %p3413_p2, %p3407_p13 }
  0xbe   :  { %3417 = shalt.err (!%p3414_p3)
}
  0xbf   :  { %154 = dma.hbm_to_vmem [thread:$0]  %s4070_s10, 10240, %s149_s2, [#allocation18], %s3529_s3, %s3529_s3, %s3530_s16  }
  0xc0   :  { %3506 = dma.done.wait [#allocation3], 128  }
  0xc1   :  { %3507 = vsyncadd [#allocation3], 4294967168 }
  0xc2   :  { %3508 = dma.done.wait [#allocation6], 528  }
  0xc3   :  { %3509 = vsyncadd [#allocation6], 4294966768 }
  0xc4   :  { %3510 = dma.done.wait [#allocation9], 1040  }
  0xc5   :  { %3511 = vsyncadd [#allocation9], 4294966256 }
  0xc6   :  { %3512 = dma.done.wait [#allocation12], 7168  }
  0xc7   :  { %3513 = vsyncadd [#allocation12], 4294960128 }
  0xc8   :  { %3514 = dma.done.wait [#allocation15], 5200  }
  0xc9   :  { %3515 = vsyncadd [#allocation15], 4294962096 }
  0xca   :  { %3516 = dma.done.wait [#allocation18], 10320  }
  0xcb   :  { %3517 = vsyncadd [#allocation18], 4294956976  ;;  %v3543_v0 = vmov 0.0   ;;  %vm3544_vm0 = vmmov 0   ;;  %v3043_v1 = vld [vmem:[#allocation5] sm:$0xff]   ;;  %v3044_v2 = vld [vmem:[#allocation5 + $0x8] sm:$0xff]  }
  0xcc   :  { %2463 = vmatprep.subr.bf16.mxu0 %v3543_v0  ;;  %2471 = vmatprep.mubr.msk.bf16.mxu0 %vm3544_vm0, %v3543_v0  ;;  %v3048_v3 = vld [vmem:[#allocation8] sm:$0xff]   ;;  %v3045_v4 = vld [vmem:[#allocation5 + $0x10] sm:$0xff]   ;;  %v3046_v6 = vld [vmem:[#allocation5 + $0x18] sm:$0xff]   ;;  %vm235_vm1 = vcmask 523264   ;;  %s3546_s10 = smov [#allocation21]   ;;  %s3547_s21 = smov [#allocation20]  }
  0xcd   :  { %2475 = vmatprep.subr.bf16.mxu1 %v3543_v0  ;;  %2491 = vmatprep.mubr.msk.bf16.mxu1 %vm3544_vm0, %v3543_v0  ;;  %v3049_v5 = vld [vmem:[#allocation8 + $0x8] sm:$0xff]   ;;  %v3047_v7 = vld [vmem:[#allocation2] sm:$0xff]   ;;  %v3052_v10 = vld [vmem:[#allocation8 + $0x20] sm:$0xff]   ;;  %s2124_s26 = sshll.u32 %s3546_s10, 4  ;;  %s2112_s1 = sshll.u32 %s3547_s21, 4  ;;  %s2125_s26 = int_to_ptr.vmem [resolvable:$true] %s2124_s26  ;;  %s3969_s1 = int_to_ptr.vmem [resolvable:$true] %s2112_s1 }
  0xce   :  { %2464 = vmatpush3.bf16.msra.mxu0 %v3043_v1  ;;  %2476 = vmatpush3.bf16.msra.mxu1 %v3048_v3  ;;  %v3050_v8 = vld [vmem:[#allocation8 + $0x10] sm:$0xff]   ;;  %v3051_v9 = vld [vmem:[#allocation8 + $0x18] sm:$0xff]   ;;  %v3053_v11 = vld [vmem:[#allocation8 + $0x28] sm:$0xff]   ;;  %s3418_s2 = scalar_lea.vmem %s2125_s26, 256  ;;  %p3423_p5 = scmp.lt.s32.totalorder %s2125_s26, %s2125_s26 }
  0xcf   :  { %2465 = vmatprep.subr.bf16.mxu0 %v3543_v0  ;;  %2477 = vmatprep.subr.bf16.mxu1 %v3543_v0  ;;  %v3054_v12 = vld [vmem:[#allocation8 + $0x30] sm:$0xff]   ;;  %v3055_v13 = vld [vmem:[#allocation8 + $0x38] sm:$0xff]   ;;  %v407_v24 = vld [vmem:[#allocation11] sm:$0xff]  ;;  %p3419_p4 = scmp.ne.s32.totalorder %s2125_s26, %s3418_s2  ;;  %p3424_p6 = scmp.lt.s32.totalorder %s3418_s2, %s3418_s2 }
  0xd0   :  { %v2176_v14 = vld [vmem:[#allocation7] ss:$0 sm:$0xff]  ;;  %v408_v25 = vld [vmem:[#allocation11 + $0x8] sm:$0xff]  ;;  %v3056_v26 = vld [vmem:[#allocation13] ss:$20 sps:$4 sm:$0xff]  }
  0xd1   :  { %v2825_v27 = vpack.c.bf16 %v408_v25, %v407_v24  ;;  %v3058_v28 = vld [vmem:[#allocation13 + $0x4] ss:$20 sps:$4 sm:$0xff]   ;;  %v409_v29 = vld [vmem:[#allocation11 + $0x10] sm:$0xff]  ;;  %v3061_v32 = vld [vmem:[#allocation13 + $0x2c] ss:$20 sps:$4 sm:$0xff]   ;;  %p3425_p7 = por %p3424_p6, %p3423_p5 }
  0xd2   :  { %2466 = vmatpush3.bf16.msra.mxu0 %v3044_v2  ;;  %2478 = vmatpush3.bf16.msra.mxu1 %v3049_v5  ;;  %v410_v30 = vld [vmem:[#allocation11 + $0x18] sm:$0xff]  ;;  %v411_v33 = vld [vmem:[#allocation11 + $0x20] sm:$0xff]  ;;  %v412_v34 = vld [vmem:[#allocation11 + $0x28] sm:$0xff] }
  0xd3   :  { %2467 = vmatprep.subr.bf16.mxu0 %v3543_v0  ;;  %2479 = vmatprep.subr.bf16.mxu1 %v3543_v0  ;;  %v2829_v31 = vpack.c.bf16 %v410_v30, %v409_v29  ;;  %v3059_v35 = vld [vmem:[#allocation13 + $0x28] ss:$20 sps:$4 sm:$0xff]   ;;  %v2833_v36 = vpack.c.bf16 %v412_v34, %v411_v33  ;;  %v413_v38 = vld [vmem:[#allocation11 + $0x30] sm:$0xff]  ;;  %v3065_v52 = vld [vmem:[#allocation13 + $0x78] ss:$20 sps:$4 sm:$0xff]   ;;  %p3426_p8 = pnand %p3425_p7, %p3419_p4 }
  0xd4   :  { %v3064_v37 = vld [vmem:[#allocation13 + $0x54] ss:$20 sps:$4 sm:$0xff]   ;;  %v414_v39 = vld [vmem:[#allocation11 + $0x38] sm:$0xff]  ;;  %v3062_v40 = vld [vmem:[#allocation13 + $0x50] ss:$20 sps:$4 sm:$0xff]  }
  0xd5   :  { %v2837_v41 = vpack.c.bf16 %v414_v39, %v413_v38  ;;  %v2183_v42 = vld [vmem:[#allocation10] ss:$0 sm:$0xff]  ;;  %v415_v53 = vld [vmem:[#allocation11 + $0x40] sm:$0xff]  ;;  %v416_v54 = vld [vmem:[#allocation11 + $0x48] sm:$0xff] }
  0xd6   :  { %2468 = vmatpush3.bf16.msra.mxu0 %v3045_v4  ;;  %2480 = vmatpush3.bf16.msra.mxu1 %v3050_v8  ;;  %v3067_v51 = vld [vmem:[#allocation13 + $0x7c] ss:$20 sps:$4 sm:$0xff]   ;;  %v2841_v55 = vpack.c.bf16 %v416_v54, %v415_v53  ;;  %v3070_v56 = vld [vmem:[#allocation13 + $0xa4] ss:$20 sps:$4 sm:$0xff]   ;;  %v3068_v57 = vld [vmem:[#allocation13 + $0xa0] ss:$20 sps:$4 sm:$0xff]  }
  0xd7   :  { %2469 = vmatprep.subr.bf16.mxu0 %v3543_v0  ;;  %2481 = vmatprep.subr.bf16.mxu1 %v3543_v0  ;;  %v417_v58 = vld [vmem:[#allocation11 + $0x50] sm:$0xff]  ;;  %v418_v59 = vld [vmem:[#allocation11 + $0x58] sm:$0xff]  ;;  %v3073_v62 = vld [vmem:[#allocation13 + $0xcc] ss:$20 sps:$4 sm:$0xff]  }
  0xd8   :  { %v2845_v60 = vpack.c.bf16 %v418_v59, %v417_v58  ;;  %v3071_v61 = vld [vmem:[#allocation13 + $0xc8] ss:$20 sps:$4 sm:$0xff]   ;;  %v419_v63 = vld [vmem:[#allocation11 + $0x60] sm:$0xff]  ;;  %v421_v4 = vld [vmem:[#allocation11 + $0x70] sm:$0xff] }
  0xd9   :  { %v420_v1 = vld [vmem:[#allocation11 + $0x68] sm:$0xff]  ;;  %v422_v5 = vld [vmem:[#allocation11 + $0x78] sm:$0xff]  ;;  %v3084_v24 = vld [vmem:[#allocation13 + $0x30] ss:$20 sps:$4 sm:$0xff]  }
  0xda   :  { %2470 = vmatpush3.bf16.msra.mxu0 %v3046_v6  ;;  %2482 = vmatpush3.bf16.msra.mxu1 %v3051_v9  ;;  %v3076_v2 = vld [vmem:[#allocation13 + $0xf4] ss:$20 sps:$4 sm:$0xff]   ;;  %v2849_v3 = vpack.c.bf16 %v420_v1, %v419_v63  ;;  %v3074_v6 = vld [vmem:[#allocation13 + $0xf0] ss:$20 sps:$4 sm:$0xff]   ;;  %v3077_v9 = vld [vmem:[#allocation13 + $0x118] ss:$20 sps:$4 sm:$0xff]  }
  0xdb   :  { %2483 = vmatprep.subr.bf16.mxu1 %v3543_v0  ;;  %2826 = vmatprep.subr.bf16.mxu0 %v2825_v27  ;;  %v3079_v8 = vld [vmem:[#allocation13 + $0x11c] ss:$20 sps:$4 sm:$0xff]   ;;  %v3091_v29 = vld [vmem:[#allocation13 + $0x60] ss:$20 sps:$4 sm:$0xff]   ;;  %v3103_v38 = vld [vmem:[#allocation13 + $0xd8] ss:$20 sps:$4 sm:$0xff]  }
  0xdc   :  { %v3090_v25 = vld [vmem:[#allocation13 + $0x5c] ss:$20 sps:$4 sm:$0xff]   ;;  %v3092_v30 = vld [vmem:[#allocation13 + $0x80] ss:$20 sps:$4 sm:$0xff]   ;;  %v3104_v39 = vld [vmem:[#allocation13 + $0xf8] ss:$20 sps:$4 sm:$0xff]  }
  0xdd   :  { %2472 = vmatmul.mubr.msk.bf16.vlgmr.msra.gmra.mrb[0].mxu0 %vm235_vm1, %v3047_v7  ;;  %v2853_v7 = vpack.c.bf16 %v422_v5, %v421_v4  ;;  %v3096_v33 = vld [vmem:[#allocation13 + $0xa8] ss:$20 sps:$4 sm:$0xff]  }
  0xde   :  { %2484 = vmatpush3.bf16.msra.mxu1 %v3052_v10  ;;  %2828 = vmatpush3.bf16.msra.mxu0 %v2825_v27  ;;  %v3082_v10 = vld [vmem:[#allocation13 + $0xc] ss:$20 sps:$4 sm:$0xff]   ;;  %v3102_v34 = vld [vmem:[#allocation13 + $0xd4] ss:$20 sps:$4 sm:$0xff]  }
  0xdf   :  { %2485 = vmatprep.subr.bf16.mxu1 %v3543_v0  ;;  %2830 = vmatprep.subr.bf16.mxu0 %v2829_v31  ;;  %v3088_v27 = vld [vmem:[#allocation13 + $0x58] ss:$20 sps:$4 sm:$0xff]  }
  0xe2   :  { %2486 = vmatpush3.bf16.msra.mxu1 %v3053_v11  ;;  %2832 = vmatpush3.bf16.msra.mxu0 %v2829_v31  ;;  %v3545_v11 = vmov 0   ;;  %v3098_v31 = vld [vmem:[#allocation13 + $0xac] ss:$20 sps:$4 sm:$0xff]  }
  0xe3   :  { %2487 = vmatprep.subr.bf16.mxu1 %v3543_v0  ;;  %2834 = vmatprep.subr.bf16.mxu0 %v2833_v36 }
  0xe6   :  { %2488 = vmatpush3.bf16.msra.mxu1 %v3054_v12  ;;  %2836 = vmatpush3.bf16.msra.mxu0 %v2833_v36  ;;  %v3100_v36 = vld [vmem:[#allocation13 + $0xd0] ss:$20 sps:$4 sm:$0xff]  }
  0xe7   :  { %2489 = vmatprep.subr.bf16.mxu1 %v3543_v0  ;;  %2838 = vmatprep.subr.bf16.mxu0 %v2837_v41 }
  0xea   :  { %2490 = vmatpush3.bf16.msra.mxu1 %v3055_v13  ;;  %2840 = vmatpush3.bf16.msra.mxu0 %v2837_v41  ;;  %v3107_v41 = vld [vmem:[#allocation13 + $0x100] ss:$20 sps:$4 sm:$0xff]  }
  0xeb   :  { %804 = vmatprep.subr.bf16.mxu1 %v3058_v28  ;;  %2842 = vmatprep.subr.bf16.mxu0 %v2841_v55  ;;  %v3094_v28 = vld [vmem:[#allocation13 + $0x84] ss:$20 sps:$4 sm:$0xff]  }
  0xee   :  { %2844 = vmatpush3.bf16.msra.mxu0 %v2841_v55  ;;  %v569_v55 = vld [vmem:[#allocation14] sm:$0x1f] }
  0xef   :  { %2846 = vmatprep.subr.bf16.mxu0 %v2845_v60 }
  0xf2   :  { %2848 = vmatpush3.bf16.msra.mxu0 %v2845_v60 }
  0xf3   :  { %2850 = vmatprep.subr.bf16.mxu0 %v2849_v3 }
  0xf6   :  { %2852 = vmatpush3.bf16.msra.mxu0 %v2849_v3 }
  0xf7   :  { %2854 = vmatprep.subr.bf16.mxu0 %v2853_v7 }
  0xfa   :  { %2856 = vmatpush3.bf16.msra.mxu0 %v2853_v7 }
  0xfb   :  { %847 = vmatprep.subr.bf16.mxu0 %v3082_v10 }
 0x1b0   :  { %v273_v15 = vpop.f32.mrb[0].mxu0 }
 0x1b1   :  { %v274_v16 = vadd.f32 %v2176_v14, %v273_v15  ;;  %v2473_v17 = vpop.f32.mrb[1].mxu0 }
 0x1b2   :  { %v276_v18 = vpop.f32.mrb[2].mxu0 }
 0x1b3   :  { %v277_v19 = vadd.f32 %v2176_v14, %v276_v18  ;;  %v2474_v20 = vpop.f32.mrb[3].mxu0  ;;  %v280_v21 = vmax.f32 %v274_v16, 0.0 }
 0x1b5   :  { %v281_v22 = vmax.f32 %v277_v19, 0.0  ;;  %v3080_v19 = vld [vmem:[#allocation13 + $0x8] ss:$20 sps:$4 sm:$0xff]  }
 0x1b7   :  { %v282_v23 = vpack.c.bf16 %v281_v22, %v280_v21  ;;  %v3086_v21 = vld [vmem:[#allocation13 + $0x34] ss:$20 sps:$4 sm:$0xff]   ;;  %v3083_v22 = vld [vmem:[#allocation13 + $0x10] ss:$20 sps:$4 sm:$0xff]  }
 0x1b9   :  { %2492 = vmatmul.mubr.bf16.vlgmr.msra.gmra.mrb[0].mxu1 %v282_v23 }
 0x1ba   :  { %805 = vmatpush1.bf16.msra.mxu1 %v3056_v26  ;;  %836 = vmatprep.mubr.bf16.mxu1 %v3545_v11  ;;  %v3087_v26 = vld [vmem:[#allocation13 + $0x38] ss:$20 sps:$4 sm:$0xff]  }
 0x1bb   :  { %806 = vmatprep.subr.bf16.mxu1 %v3061_v32  ;;  %v3095_v32 = vld [vmem:[#allocation13 + $0x88] ss:$20 sps:$4 sm:$0xff]  }
 0x1be   :  { %807 = vmatpush1.bf16.msra.mxu1 %v3059_v35  ;;  %v3099_v35 = vld [vmem:[#allocation13 + $0xb0] ss:$20 sps:$4 sm:$0xff]  }
 0x1bf   :  { %808 = vmatprep.subr.bf16.mxu1 %v3064_v37  ;;  %v3106_v37 = vld [vmem:[#allocation13 + $0xfc] ss:$20 sps:$4 sm:$0xff]  }
 0x1c2   :  { %809 = vmatpush1.bf16.msra.mxu1 %v3062_v40  ;;  %v3110_v40 = vld [vmem:[#allocation13 + $0x124] ss:$20 sps:$4 sm:$0xff]  }
 0x1c3   :  { %810 = vmatprep.subr.bf16.mxu1 %v3067_v51  ;;  %v3119_v51 = vld [vmem:[#allocation16 + $0x38] sm:$0xff]  }
 0x1c6   :  { %811 = vmatpush1.bf16.msra.mxu1 %v3065_v52  ;;  %v502_v52 = vlaneseq }
 0x1c7   :  { %812 = vmatprep.subr.bf16.mxu1 %v3070_v56 }
 0x1c8   :  { %v572_v53 = vshrl.u32 %v502_v52, 7 }
 0x1ca   :  { %813 = vmatpush1.bf16.msra.mxu1 %v3068_v57  ;;  %v581_v54 = vsub.s32 2, %v572_v53  ;;  %v585_v56 = vsub.s32 3, %v572_v53  ;;  %v589_v58 = vsub.s32 4, %v572_v53 }
 0x1cb   :  { %814 = vmatprep.subr.bf16.mxu1 %v3073_v62  ;;  %v577_v62 = vsub.s32 1, %v572_v53 }
 0x1cc   :  { %v582_v57 = vrot.slane %v569_v55, %v581_v54  ;;  %v586_v59 = vrot.slane %v569_v55, %v585_v56  ;;  %v590_v60 = vrot.slane %v569_v55, %v589_v58  ;;  %v3132_v54 = vld [vmem:[#allocation16 + $0xa0] sm:$0xff]   ;;  %v3134_v56 = vld [vmem:[#allocation16 + $0xb0] sm:$0xff]  }
 0x1cd   :  { %v3136_v58 = vld [vmem:[#allocation16 + $0xc0] sm:$0xff]  }
 0x1ce   :  { %815 = vmatpush1.bf16.msra.mxu1 %v3071_v61  ;;  %v573_v61 = vsub.s32 0, %v572_v53  ;;  %v3131_v53 = vld [vmem:[#allocation16 + $0x98] sm:$0xff]  }
 0x1cf   :  { %816 = vmatprep.subr.bf16.mxu1 %v3076_v2  ;;  %v578_v2 = vrot.slane %v569_v55, %v577_v62  ;;  %v3140_v62 = vld [vmem:[#allocation16 + $0xe0] sm:$0xff]  }
 0x1d0   :  { %v574_v63 = vrot.slane %v569_v55, %v573_v61  ;;  %v3133_v55 = vld [vmem:[#allocation16 + $0xa8] sm:$0xff]   ;;  %v3139_v61 = vld [vmem:[#allocation16 + $0xd8] sm:$0xff]  }
 0x1d2   :  { %817 = vmatpush1.bf16.msra.mxu1 %v3074_v6 }
 0x1d3   :  { %818 = vmatprep.subr.bf16.mxu1 %v3079_v8 }
 0x1d6   :  { %819 = vmatpush1.bf16.msra.mxu1 %v3077_v9 }
 0x1d7   :  { %2530 = vmatprep.subr.bf16.mxu1 %v3543_v0 }
 0x28c   :  { %v388_v43 = vpop.f32.mrb[0].mxu1 }
 0x28d   :  { %v389_v44 = vadd.f32 %v2183_v42, %v388_v43  ;;  %v2493_v45 = vpop.f32.mrb[1].mxu1  ;;  %v3111_v43 = vld [vmem:[#allocation13 + $0x128] ss:$20 sps:$4 sm:$0xff]  }
 0x28e   :  { %v391_v46 = vpop.f32.mrb[2].mxu1  ;;  %v3113_v45 = vld [vmem:[#allocation16 + $0x8] sm:$0xff]  }
 0x28f   :  { %v3798_v47 = vadd.f32 %v2183_v42, %v391_v46  ;;  %v2494_v48 = vpop.f32.mrb[3].mxu1  ;;  %v395_v49 = vmul.f32 %v389_v44, %v389_v44  ;;  %v3108_v42 = vld [vmem:[#allocation13 + $0x120] ss:$20 sps:$4 sm:$0xff]  }
 0x290   :  { %v3114_v46 = vld [vmem:[#allocation16 + $0x10] sm:$0xff]   ;;  %v3116_v48 = vld [vmem:[#allocation16 + $0x20] sm:$0xff]  }
 0x291   :  { %397 = vadd.xlane.f32.xlu0 %v395_v49  ;;  %v396_v50 = vmul.f32 %v3798_v47, %v3798_v47  ;;  %v3117_v49 = vld [vmem:[#allocation16 + $0x28] sm:$0xff]  }
 0x295   :  { %399 = vadd.xlane.f32.xlu0 %v396_v50  ;;  %v3118_v50 = vld [vmem:[#allocation16 + $0x30] sm:$0xff]  }
 0x31e   :  { %v398_v12 = vpop.xlane.xlu0 %397 }
 0x31f   :  { %v401_v13 = vmax.f32 %v398_v12, 1e-24 }
 0x321   :  { %3152 = vrsqrt.f32 %v401_v13 }
 0x322   :  { %v400_v14 = vpop.xlane.xlu0 %399 }
 0x323   :  { %v402_v15 = vmax.f32 %v400_v14, 1e-24 }
 0x325   :  { %3154 = vrsqrt.f32 %v402_v15 }
 0x32b   :  { %v3153_v16 = vpop.eup %3152 }
 0x32c   :  { %v405_v17 = vmul.f32 %v3153_v16, %v389_v44  ;;  %v3112_v44 = vld [vmem:[#allocation16] sm:$0xff]  }
 0x32d   :  { %v3120_v16 = vld [vmem:[#allocation16 + $0x40] sm:$0xff]  }
 0x32e   :  { %2527 = vmatprep.mubr.f32.mxu0 %v405_v17  ;;  %500 = vst [vmem:[#allocation21] sm:$0xff] %v405_v17 }
 0x32f   :  { %v3155_v18 = vpop.eup %3154 }
 0x330   :  { %v406_v20 = vmul.f32 %v3155_v18, %v3798_v47  ;;  %v3115_v47 = vld [vmem:[#allocation16 + $0x18] sm:$0xff]  }
 0x332   :  { %2528 = vmatmul.mubr.f32.vlgmr.msra.gmra.mrb[4].mxu0 %v406_v20  ;;  %501 = vst [vmem:[#allocation21 + $0x8] sm:$0xff] %v406_v20  ;;  %v520_v23 = vpack.c.bf16 %v406_v20, %v405_v17  ;;  %v3122_v20 = vld [vmem:[#allocation16 + $0x50] sm:$0xff]  }
 0x333   :  { %848 = vmatpush1.bf16.msra.mxu0 %v3080_v19  ;;  %879 = vmatprep.mubr.bf16.mxu0 %v3545_v11  ;;  %v3121_v19 = vld [vmem:[#allocation16 + $0x48] sm:$0xff]  }
 0x334   :  { %837 = vmatmul.mubr.bf16.vlgmr.msra.gmra.mrb[4].mxu1 %v520_v23  ;;  %849 = vmatprep.subr.bf16.mxu0 %v3086_v21  ;;  %v3123_v21 = vld [vmem:[#allocation16 + $0x58] sm:$0xff]  }
 0x335   :  { %2531 = vmatpush3.bf16.msra.mxu1 %v3083_v22  ;;  %2546 = vmatprep.mubr.msk.bf16.mxu1 %vm3544_vm0, %v3543_v0  ;;  %v3124_v22 = vld [vmem:[#allocation16 + $0x60] sm:$0xff]  }
 0x336   :  { %2532 = vmatprep.subr.bf16.mxu1 %v3543_v0 }
 0x337   :  { %850 = vmatpush1.bf16.msra.mxu0 %v3084_v24 }
 0x338   :  { %851 = vmatprep.subr.bf16.mxu0 %v3090_v25  ;;  %v3126_v25 = vld [vmem:[#allocation16 + $0x70] sm:$0xff]  }
 0x339   :  { %2533 = vmatpush3.bf16.msra.mxu1 %v3087_v26 }
 0x33a   :  { %2534 = vmatprep.subr.bf16.mxu1 %v3543_v0 }
 0x33b   :  { %852 = vmatpush1.bf16.msra.mxu0 %v3088_v27 }
 0x33c   :  { %853 = vmatprep.subr.bf16.mxu0 %v3094_v28 }
 0x33d   :  { %2535 = vmatpush3.bf16.msra.mxu1 %v3091_v29 }
 0x33e   :  { %2536 = vmatprep.subr.bf16.mxu1 %v3543_v0 }
 0x33f   :  { %854 = vmatpush1.bf16.msra.mxu0 %v3092_v30 }
 0x340   :  { %855 = vmatprep.subr.bf16.mxu0 %v3098_v31 }
 0x341   :  { %2537 = vmatpush3.bf16.msra.mxu1 %v3095_v32 }
 0x342   :  { %2538 = vmatprep.subr.bf16.mxu1 %v3543_v0 }
 0x343   :  { %856 = vmatpush1.bf16.msra.mxu0 %v3096_v33 }
 0x344   :  { %857 = vmatprep.subr.bf16.mxu0 %v3102_v34 }
 0x345   :  { %2539 = vmatpush3.bf16.msra.mxu1 %v3099_v35 }
 0x346   :  { %2540 = vmatprep.subr.bf16.mxu1 %v3543_v0 }
 0x347   :  { %858 = vmatpush1.bf16.msra.mxu0 %v3100_v36 }
 0x348   :  { %859 = vmatprep.subr.bf16.mxu0 %v3106_v37  ;;  %v3127_v37 = vld [vmem:[#allocation16 + $0x78] sm:$0xff]  }
 0x349   :  { %2541 = vmatpush3.bf16.msra.mxu1 %v3103_v38 }
 0x34a   :  { %2542 = vmatprep.subr.bf16.mxu1 %v3543_v0 }
 0x34b   :  { %860 = vmatpush1.bf16.msra.mxu0 %v3104_v39 }
 0x34c   :  { %861 = vmatprep.subr.bf16.mxu0 %v3110_v40 }
 0x34d   :  { %2543 = vmatpush3.bf16.msra.mxu1 %v3107_v41 }
 0x34e   :  { %2544 = vmatprep.subr.bf16.mxu1 %v3543_v0 }
 0x34f   :  { %862 = vmatpush1.bf16.msra.mxu0 %v3108_v42 }
 0x350   :  { %2550 = vmatprep.subr.bf16.mxu0 %v3543_v0 }
 0x351   :  { %2545 = vmatpush3.bf16.msra.mxu1 %v3111_v43 }
 0x352   :  { %880 = vmatmul.mubr.bf16.vlgmr.msra.gmra.mrb[8].mxu0 %v520_v23 }
 0x353   :  { %2551 = vmatpush3.bf16.msra.mxu0 %v3112_v44  ;;  %2566 = vmatprep.mubr.msk.bf16.mxu0 %vm3544_vm0, %v3543_v0 }
 0x354   :  { %2547 = vmatmul.mubr.bf16.vlgmr.msra.gmra.mrb[8].mxu1 %v520_v23  ;;  %2552 = vmatprep.subr.bf16.mxu0 %v3543_v0  ;;  %v3125_v23 = vld [vmem:[#allocation16 + $0x68] sm:$0xff]  }
 0x357   :  { %2553 = vmatpush3.bf16.msra.mxu0 %v3113_v45 }
 0x358   :  { %2554 = vmatprep.subr.bf16.mxu0 %v3543_v0 }
 0x35b   :  { %2555 = vmatpush3.bf16.msra.mxu0 %v3114_v46 }
 0x35c   :  { %2556 = vmatprep.subr.bf16.mxu0 %v3543_v0 }
 0x35f   :  { %2557 = vmatpush3.bf16.msra.mxu0 %v3115_v47 }
 0x360   :  { %2558 = vmatprep.subr.bf16.mxu0 %v3543_v0 }
 0x363   :  { %2559 = vmatpush3.bf16.msra.mxu0 %v3116_v48  ;;  %v3128_v48 = vld [vmem:[#allocation16 + $0x80] sm:$0xff]  }
 0x364   :  { %2560 = vmatprep.subr.bf16.mxu0 %v3543_v0 }
 0x367   :  { %2561 = vmatpush3.bf16.msra.mxu0 %v3117_v49 }
 0x368   :  { %2562 = vmatprep.subr.bf16.mxu0 %v3543_v0 }
 0x36b   :  { %2563 = vmatpush3.bf16.msra.mxu0 %v3118_v50  ;;  %v3129_v50 = vld [vmem:[#allocation16 + $0x88] sm:$0xff]  }
 0x36c   :  { %2564 = vmatprep.subr.bf16.mxu0 %v3543_v0 }
 0x36f   :  { %2565 = vmatpush3.bf16.msra.mxu0 %v3119_v51  ;;  %v3130_v51 = vld [vmem:[#allocation16 + $0x90] sm:$0xff]  }
 0x370   :  { %2605 = vmatprep.subr.bf16.mxu0 %v3543_v0 }
 0x405   :  { %v3825_v1 = vpop.f32.mrb[4].mxu0 }
 0x406   :  { %499 = vst [vmem:[#allocation20 + $0x8] sm:$0xff] %v3825_v1  ;;  %v3828_v3 = vpop.f32.mrb[5].mxu0 }
 0x407   :  { %498 = vst [vmem:[#allocation20] sm:$0xff] %v3828_v3  ;;  %v838_v4 = vpop.f32.mrb[4].mxu1 }
 0x408   :  { %v839_v5 = vadd.f32 %v838_v4, %v574_v63  ;;  %v840_v6 = vpop.f32.mrb[5].mxu1  ;;  %v3143_v4 = vld [vmem:[#allocation16 + $0xf8] sm:$0xff]  }
 0x409   :  { %v841_v7 = vadd.f32 %v840_v6, %v578_v2  ;;  %v842_v8 = vpop.f32.mrb[6].mxu1  ;;  %v3145_v6 = vld [vmem:[#allocation16 + $0x108] sm:$0xff]  }
 0x40a   :  { %v843_v9 = vadd.f32 %v842_v8, %v574_v63  ;;  %v844_v10 = vpop.f32.mrb[7].mxu1  ;;  %v931_v12 = vmax.f32 %v839_v5, 0.0  ;;  %v3141_v63 = vld [vmem:[#allocation16 + $0xe8] sm:$0xff]   ;;  %v3144_v5 = vld [vmem:[#allocation16 + $0x100] sm:$0xff]   ;;  %v3147_v8 = vld [vmem:[#allocation16 + $0x118] sm:$0xff]  }
 0x40b   :  { %v845_v11 = vadd.f32 %v844_v10, %v578_v2  ;;  %v932_v14 = vmax.f32 %v841_v7, 0.0  ;;  %v3142_v2 = vld [vmem:[#allocation16 + $0xf0] sm:$0xff]   ;;  %v3149_v10 = vld [vmem:[#allocation16 + $0x128] sm:$0xff]  }
 0x40c   :  { %v936_v13 = vmax.f32 %v843_v9, 0.0  ;;  %v3146_v7 = vld [vmem:[#allocation16 + $0x110] sm:$0xff]   ;;  %v3148_v9 = vld [vmem:[#allocation16 + $0x120] sm:$0xff]  }
 0x40d   :  { %v937_v15 = vmax.f32 %v845_v11, 0.0  ;;  %v3150_v11 = vld [vmem:[#allocation16 + $0x130] sm:$0xff]  }
 0x40e   :  { %v941_v17 = vpack.c.bf16 %v936_v13, %v931_v12  ;;  %v3151_v12 = vld [vmem:[#allocation16 + $0x138] sm:$0xff]   ;;  %v2232_v13 = vld [vmem:[#allocation17] ss:$0 sm:$0xff] }
 0x40f   :  { %v1171_v18 = vpack.c.bf16 %v937_v15, %v932_v14 }
 0x410   :  { %2567 = vmatmul.mubr.bf16.vlgmr.msra.gmra.mrb[12].mxu0 %v941_v17 }
 0x411   :  { %2606 = vmatpush3.bf16.msra.mxu0 %v3120_v16  ;;  %2621 = vmatprep.mubr.msk.bf16.mxu0 %vm3544_vm0, %v3543_v0 }
 0x412   :  { %2607 = vmatprep.subr.bf16.mxu0 %v3543_v0 }
 0x415   :  { %2608 = vmatpush3.bf16.msra.mxu0 %v3121_v19 }
 0x416   :  { %2609 = vmatprep.subr.bf16.mxu0 %v3543_v0 }
 0x419   :  { %2610 = vmatpush3.bf16.msra.mxu0 %v3122_v20 }
 0x41a   :  { %2611 = vmatprep.subr.bf16.mxu0 %v3543_v0 }
 0x41d   :  { %2612 = vmatpush3.bf16.msra.mxu0 %v3123_v21  ;;  %v1066_v21 = vld [vmem:[#allocation19] sm:$0xff] }
 0x41e   :  { %2613 = vmatprep.subr.bf16.mxu0 %v3543_v0 }
 0x421   :  { %2614 = vmatpush3.bf16.msra.mxu0 %v3124_v22  ;;  %v1067_v22 = vld [vmem:[#allocation19 + $0x8] sm:$0xff] }
 0x422   :  { %2615 = vmatprep.subr.bf16.mxu0 %v3543_v0 }
 0x425   :  { %v881_v24 = vpop.f32.mrb[8].mxu0  ;;  %2616 = vmatpush3.bf16.msra.mxu0 %v3125_v23  ;;  %v2857_v23 = vpack.c.bf16 %v1067_v22, %v1066_v21 }
 0x426   :  { %v882_v26 = vadd.f32 %v881_v24, %v582_v57  ;;  %v883_v27 = vpop.f32.mrb[9].mxu0  ;;  %2617 = vmatprep.subr.bf16.mxu0 %v3543_v0 }
 0x427   :  { %v884_v28 = vadd.f32 %v883_v27, %v586_v59  ;;  %v885_v29 = vpop.f32.mrb[10].mxu0  ;;  %v924_v30 = vpop.f32.mrb[8].mxu1  ;;  %2858 = vmatprep.subr.bf16.mxu1 %v2857_v23 }
 0x428   :  { %v886_v31 = vadd.f32 %v885_v29, %v582_v57  ;;  %v925_v32 = vadd.f32 %v924_v30, %v590_v60  ;;  %v887_v33 = vpop.f32.mrb[11].mxu0  ;;  %v2548_v34 = vpop.f32.mrb[9].mxu1  ;;  %v933_v38 = vmax.f32 %v882_v26, 0.0  ;;  %v3135_v57 = vld [vmem:[#allocation16 + $0xb8] sm:$0xff]   ;;  %2860 = vmatpush3.bf16.msra.mxu1 %v2857_v23  ;;  %v1071_v29 = vld [vmem:[#allocation19 + $0x28] sm:$0xff] }
 0x429   :  { %v888_v35 = vadd.f32 %v887_v33, %v586_v59  ;;  %v927_v36 = vpop.f32.mrb[10].mxu1  ;;  %2618 = vmatpush3.bf16.msra.mxu0 %v3126_v25  ;;  %v934_v42 = vmax.f32 %v884_v28, 0.0  ;;  %v3137_v59 = vld [vmem:[#allocation16 + $0xc8] sm:$0xff]   ;;  %v1068_v25 = vld [vmem:[#allocation19 + $0x10] sm:$0xff]  ;;  %v1069_v26 = vld [vmem:[#allocation19 + $0x18] sm:$0xff] }
 0x42a   :  { %v938_v39 = vmax.f32 %v886_v31, 0.0  ;;  %v928_v40 = vadd.f32 %v927_v36, %v590_v60  ;;  %v2549_v41 = vpop.f32.mrb[11].mxu1  ;;  %2619 = vmatprep.subr.bf16.mxu0 %v3543_v0  ;;  %v935_v45 = vmax.f32 %v925_v32, 0.0  ;;  %v3138_v60 = vld [vmem:[#allocation16 + $0xd0] sm:$0xff]   ;;  %v2861_v27 = vpack.c.bf16 %v1069_v26, %v1068_v25  ;;  %v1070_v28 = vld [vmem:[#allocation19 + $0x20] sm:$0xff]  ;;  %v1073_v32 = vld [vmem:[#allocation19 + $0x38] sm:$0xff] }
 0x42b   :  { %v939_v43 = vmax.f32 %v888_v35, 0.0  ;;  %v1072_v30 = vld [vmem:[#allocation19 + $0x30] sm:$0xff]  ;;  %v2865_v31 = vpack.c.bf16 %v1071_v29, %v1070_v28  ;;  %v1074_v34 = vld [vmem:[#allocation19 + $0x40] sm:$0xff]  ;;  %v1075_v35 = vld [vmem:[#allocation19 + $0x48] sm:$0xff] }
 0x42c   :  { %v1404_v44 = vpack.c.bf16 %v938_v39, %v933_v38  ;;  %v940_v46 = vmax.f32 %v928_v40, 0.0  ;;  %2862 = vmatprep.subr.bf16.mxu1 %v2861_v27  ;;  %v2869_v33 = vpack.c.bf16 %v1073_v32, %v1072_v30  ;;  %v2873_v36 = vpack.c.bf16 %v1075_v35, %v1074_v34  ;;  %v1077_v38 = vld [vmem:[#allocation19 + $0x58] sm:$0xff]  ;;  %v1078_v40 = vld [vmem:[#allocation19 + $0x60] sm:$0xff]  ;;  %v1079_v41 = vld [vmem:[#allocation19 + $0x68] sm:$0xff] }
 0x42d   :  { %v1637_v47 = vpack.c.bf16 %v939_v43, %v934_v42  ;;  %2620 = vmatpush3.bf16.msra.mxu0 %v3127_v37  ;;  %2864 = vmatpush3.bf16.msra.mxu1 %v2861_v27  ;;  %v1076_v37 = vld [vmem:[#allocation19 + $0x50] sm:$0xff]  ;;  %v2881_v43 = vpack.c.bf16 %v1079_v41, %v1078_v40  ;;  %v1304_v40 = vld [vmem:[#allocation19 + $0xa8] sm:$0xff] }
 0x42e   :  { %v3840_v49 = vpack.c.bf16 %v940_v46, %v935_v45  ;;  %2660 = vmatprep.subr.bf16.mxu0 %v3543_v0  ;;  %2866 = vmatprep.subr.bf16.mxu1 %v2865_v31  ;;  %v2877_v39 = vpack.c.bf16 %v1077_v38, %v1076_v37  ;;  %v1080_v42 = vld [vmem:[#allocation19 + $0x70] sm:$0xff]  ;;  %v2243_v46 = vld [vmem:[#allocation17 + $0x1] ss:$0 sm:$0xff] }
 0x430   :  { %2622 = vmatmul.mubr.bf16.vlgmr.msra.gmra.mrb[16].mxu0 %v1171_v18 }
 0x431   :  { %2661 = vmatpush3.bf16.msra.mxu0 %v3128_v48  ;;  %2676 = vmatprep.mubr.msk.bf16.mxu0 %vm3544_vm0, %v3543_v0 }
 0x432   :  { %2662 = vmatprep.subr.bf16.mxu0 %v3543_v0  ;;  %2868 = vmatpush3.bf16.msra.mxu1 %v2865_v31 }
 0x433   :  { %2870 = vmatprep.subr.bf16.mxu1 %v2869_v33 }
 0x435   :  { %2663 = vmatpush3.bf16.msra.mxu0 %v3129_v50 }
 0x436   :  { %2664 = vmatprep.subr.bf16.mxu0 %v3543_v0  ;;  %2872 = vmatpush3.bf16.msra.mxu1 %v2869_v33 }
 0x437   :  { %2874 = vmatprep.subr.bf16.mxu1 %v2873_v36 }
 0x439   :  { %2665 = vmatpush3.bf16.msra.mxu0 %v3130_v51  ;;  %v1299_v51 = vld [vmem:[#allocation19 + $0x80] sm:$0xff] }
 0x43a   :  { %2666 = vmatprep.subr.bf16.mxu0 %v3543_v0  ;;  %2876 = vmatpush3.bf16.msra.mxu1 %v2873_v36  ;;  %v1301_v36 = vld [vmem:[#allocation19 + $0x90] sm:$0xff] }
 0x43b   :  { %2878 = vmatprep.subr.bf16.mxu1 %v2877_v39 }
 0x43d   :  { %2667 = vmatpush3.bf16.msra.mxu0 %v3131_v53  ;;  %v1300_v53 = vld [vmem:[#allocation19 + $0x88] sm:$0xff] }
 0x43e   :  { %2668 = vmatprep.subr.bf16.mxu0 %v3543_v0  ;;  %2880 = vmatpush3.bf16.msra.mxu1 %v2877_v39  ;;  %v1303_v39 = vld [vmem:[#allocation19 + $0xa0] sm:$0xff] }
 0x43f   :  { %2882 = vmatprep.subr.bf16.mxu1 %v2881_v43  ;;  %v2897_v41 = vpack.c.bf16 %v1304_v40, %v1303_v39  ;;  %v1547_v39 = vld [vmem:[#allocation19 + $0x178] sm:$0xff] }
 0x441   :  { %2669 = vmatpush3.bf16.msra.mxu0 %v3132_v54 }
 0x442   :  { %2670 = vmatprep.subr.bf16.mxu0 %v3543_v0  ;;  %2884 = vmatpush3.bf16.msra.mxu1 %v2881_v43  ;;  %v1306_v43 = vld [vmem:[#allocation19 + $0xb8] sm:$0xff] }
 0x445   :  { %2671 = vmatpush3.bf16.msra.mxu0 %v3133_v55 }
 0x446   :  { %2672 = vmatprep.subr.bf16.mxu0 %v3543_v0 }
 0x449   :  { %2673 = vmatpush3.bf16.msra.mxu0 %v3134_v56 }
 0x44a   :  { %2674 = vmatprep.subr.bf16.mxu0 %v3543_v0 }
 0x44d   :  { %2675 = vmatpush3.bf16.msra.mxu0 %v3135_v57  ;;  %v2889_v57 = vpack.c.bf16 %v1300_v53, %v1299_v51 }
 0x44e   :  { %2715 = vmatprep.subr.bf16.mxu0 %v3543_v0 }
 0x450   :  { %2677 = vmatmul.mubr.bf16.vlgmr.msra.gmra.mrb[20].mxu0 %v1404_v44  ;;  %v1081_v44 = vld [vmem:[#allocation19 + $0x78] sm:$0xff] }
 0x451   :  { %2716 = vmatpush3.bf16.msra.mxu0 %v3136_v58  ;;  %2731 = vmatprep.mubr.msk.bf16.mxu0 %vm3544_vm0, %v3543_v0  ;;  %v2885_v45 = vpack.c.bf16 %v1081_v44, %v1080_v42  ;;  %v1305_v42 = vld [vmem:[#allocation19 + $0xb0] sm:$0xff]  ;;  %v1307_v44 = vld [vmem:[#allocation19 + $0xc0] sm:$0xff] }
 0x452   :  { %2717 = vmatprep.subr.bf16.mxu0 %v3543_v0 }
 0x453   :  { %2886 = vmatprep.subr.bf16.mxu1 %v2885_v45 }
 0x454   :  { %2888 = vmatpush3.bf16.msra.mxu1 %v2885_v45  ;;  %v1308_v45 = vld [vmem:[#allocation19 + $0xc8] sm:$0xff] }
 0x455   :  { %2718 = vmatpush3.bf16.msra.mxu0 %v3137_v59  ;;  %2890 = vmatprep.subr.bf16.mxu1 %v2889_v57  ;;  %v2254_v59 = vld [vmem:[#allocation17 + $0x2] ss:$0 sm:$0xff] }
 0x456   :  { %2719 = vmatprep.subr.bf16.mxu0 %v3543_v0 }
 0x459   :  { %2720 = vmatpush3.bf16.msra.mxu0 %v3138_v60 }
 0x45a   :  { %2721 = vmatprep.subr.bf16.mxu0 %v3543_v0 }
 0x45d   :  { %2722 = vmatpush3.bf16.msra.mxu0 %v3139_v61 }
 0x45e   :  { %2723 = vmatprep.subr.bf16.mxu0 %v3543_v0 }
 0x461   :  { %2724 = vmatpush3.bf16.msra.mxu0 %v3140_v62 }
 0x462   :  { %2725 = vmatprep.subr.bf16.mxu0 %v3543_v0 }
 0x465   :  { %2726 = vmatpush3.bf16.msra.mxu0 %v3141_v63 }
 0x466   :  { %2727 = vmatprep.subr.bf16.mxu0 %v3543_v0 }
 0x469   :  { %2728 = vmatpush3.bf16.msra.mxu0 %v3142_v2 }
 0x46a   :  { %2729 = vmatprep.subr.bf16.mxu0 %v3543_v0 }
 0x46d   :  { %2730 = vmatpush3.bf16.msra.mxu0 %v3143_v4 }
 0x46e   :  { %2770 = vmatprep.subr.bf16.mxu0 %v3543_v0 }
 0x470   :  { %2732 = vmatmul.mubr.bf16.vlgmr.msra.gmra.mrb[24].mxu0 %v1637_v47 }
 0x471   :  { %2771 = vmatpush3.bf16.msra.mxu0 %v3144_v5  ;;  %2786 = vmatprep.mubr.msk.bf16.mxu0 %vm3544_vm0, %v3543_v0 }
 0x472   :  { %2772 = vmatprep.subr.bf16.mxu0 %v3543_v0 }
 0x475   :  { %2773 = vmatpush3.bf16.msra.mxu0 %v3145_v6 }
 0x476   :  { %2774 = vmatprep.subr.bf16.mxu0 %v3543_v0 }
 0x479   :  { %2775 = vmatpush3.bf16.msra.mxu0 %v3146_v7  ;;  %v2265_v7 = vld [vmem:[#allocation17 + $0x3] ss:$0 sm:$0xff] }
 0x47a   :  { %2776 = vmatprep.subr.bf16.mxu0 %v3543_v0 }
 0x47d   :  { %2777 = vmatpush3.bf16.msra.mxu0 %v3147_v8 }
 0x47e   :  { %2778 = vmatprep.subr.bf16.mxu0 %v3543_v0 }
 0x481   :  { %2779 = vmatpush3.bf16.msra.mxu0 %v3148_v9 }
 0x482   :  { %2780 = vmatprep.subr.bf16.mxu0 %v3543_v0 }
 0x485   :  { %2781 = vmatpush3.bf16.msra.mxu0 %v3149_v10 }
 0x486   :  { %2782 = vmatprep.subr.bf16.mxu0 %v3543_v0 }
 0x489   :  { %2783 = vmatpush3.bf16.msra.mxu0 %v3150_v11 }
 0x48a   :  { %2784 = vmatprep.subr.bf16.mxu0 %v3543_v0 }
 0x48d   :  { %2785 = vmatpush3.bf16.msra.mxu0 %v3151_v12 }
 0x490   :  { %2787 = vmatmul.mubr.bf16.vlgmr.msra.gmra.mrb[28].mxu0 %v3840_v49 }
 0x4e3   :  { %v1047_v14 = vpop.f32.mrb[12].mxu0 }
 0x4e4   :  { %v3873_v15 = vadd.f32 %v2232_v13, %v1047_v14  ;;  %v2568_v16 = vpop.f32.mrb[13].mxu0 }
 0x4e5   :  { %v1050_v17 = vpop.f32.mrb[14].mxu0 }
 0x4e6   :  { %v3875_v18 = vadd.f32 %v2232_v13, %v1050_v17  ;;  %v2569_v19 = vpop.f32.mrb[15].mxu0  ;;  %v1054_v20 = vmul.f32 %v3873_v15, %v3873_v15  ;;  %v503_v17 = vand.u32 127, %v502_v52 }
 0x4e7   :  { %v2276_v19 = vld [vmem:[#allocation17 + $0x4] ss:$0 sm:$0xff] }
 0x4e8   :  { %1056 = vadd.xlane.f32.xlu1 %v1054_v20  ;;  %v1055_v24 = vmul.f32 %v3875_v18, %v3875_v18  ;;  %v3908_v23 = vcvt.s32.f32 %v503_v17  ;;  %v1537_v17 = vld [vmem:[#allocation19 + $0x128] sm:$0xff] }
 0x4ea   :  { %vm505_vm2 = vcmp.lt.f32.partialorder %v3908_v23, 5.0 }
 0x4eb   :  { %v3918_v52 = vsel %vm505_vm2, %v3828_v3, -inf  ;;  %v3922_v29 = vsel %vm505_vm2, %v3825_v1, -inf  ;;  %v1302_v3 = vld [vmem:[#allocation19 + $0x98] sm:$0xff] }
 0x4ec   :  { %1058 = vadd.xlane.f32.xlu1 %v1055_v24  ;;  %v2893_v38 = vpack.c.bf16 %v1302_v3, %v1301_v36  ;;  %v1544_v36 = vld [vmem:[#allocation19 + $0x160] sm:$0xff]  ;;  %v1545_v3 = vld [vmem:[#allocation19 + $0x168] sm:$0xff] }
 0x503   :  { %v1279_v47 = vpop.f32.mrb[16].mxu0 }
 0x504   :  { %v3881_v48 = vadd.f32 %v2243_v46, %v1279_v47  ;;  %v2623_v49 = vpop.f32.mrb[17].mxu0  ;;  %v1310_v47 = vld [vmem:[#allocation19 + $0xd8] sm:$0xff] }
 0x505   :  { %v1282_v50 = vpop.f32.mrb[18].mxu0 }
 0x506   :  { %v3883_v54 = vadd.f32 %v2243_v46, %v1282_v50  ;;  %v2624_v55 = vpop.f32.mrb[19].mxu0  ;;  %v1286_v56 = vmul.f32 %v3881_v48, %v3881_v48  ;;  %v2905_v46 = vpack.c.bf16 %v1308_v45, %v1307_v44 }
 0x508   :  { %1288 = vadd.xlane.f32.xlu0 %v1286_v56  ;;  %v1287_v58 = vmul.f32 %v3883_v54, %v3883_v54  ;;  %v1311_v56 = vld [vmem:[#allocation19 + $0xe0] sm:$0xff] }
 0x50a   :  { %1290 = vadd.xlane.f32.xlu1 %v1287_v58 }
 0x523   :  { %v1512_v60 = vpop.f32.mrb[20].mxu0 }
 0x524   :  { %v3889_v61 = vadd.f32 %v2254_v59, %v1512_v60  ;;  %v2678_v62 = vpop.f32.mrb[21].mxu0  ;;  %v1314_v60 = vld [vmem:[#allocation19 + $0xf8] sm:$0xff] }
 0x525   :  { %v1515_v63 = vpop.f32.mrb[22].mxu0 }
 0x526   :  { %v3891_v2 = vadd.f32 %v2254_v59, %v1515_v63  ;;  %v2679_v4 = vpop.f32.mrb[23].mxu0  ;;  %v1519_v5 = vmul.f32 %v3889_v61, %v3889_v61  ;;  %v1313_v59 = vld [vmem:[#allocation19 + $0xf0] sm:$0xff]  ;;  %v1532_v63 = vld [vmem:[#allocation19 + $0x100] sm:$0xff] }
 0x527   :  { %v2917_v62 = vpack.c.bf16 %v1314_v60, %v1313_v59  ;;  %v1533_v4 = vld [vmem:[#allocation19 + $0x108] sm:$0xff]  ;;  %v1775_v59 = vld [vmem:[#allocation19 + $0x1d0] sm:$0xff]  ;;  %v1776_v60 = vld [vmem:[#allocation19 + $0x1d8] sm:$0xff] }
 0x528   :  { %1521 = vadd.xlane.f32.xlu0 %v1519_v5  ;;  %v1520_v6 = vmul.f32 %v3891_v2, %v3891_v2 }
 0x52a   :  { %1523 = vadd.xlane.f32.xlu1 %v1520_v6 }
 0x543   :  { %v1745_v8 = vpop.f32.mrb[24].mxu0 }
 0x544   :  { %v3897_v9 = vadd.f32 %v2265_v7, %v1745_v8  ;;  %v2733_v10 = vpop.f32.mrb[25].mxu0 }
 0x545   :  { %v1748_v11 = vpop.f32.mrb[26].mxu0  ;;  %v1534_v10 = vld [vmem:[#allocation19 + $0x110] sm:$0xff] }
 0x546   :  { %v3899_v12 = vadd.f32 %v2265_v7, %v1748_v11  ;;  %v2734_v13 = vpop.f32.mrb[27].mxu0  ;;  %v1752_v14 = vmul.f32 %v3897_v9, %v3897_v9  ;;  %v2921_v7 = vpack.c.bf16 %v1533_v4, %v1532_v63  ;;  %v1535_v11 = vld [vmem:[#allocation19 + $0x118] sm:$0xff] }
 0x548   :  { %1754 = vadd.xlane.f32.xlu0 %v1752_v14  ;;  %v1753_v16 = vmul.f32 %v3899_v12, %v3899_v12  ;;  %v2925_v14 = vpack.c.bf16 %v1535_v11, %v1534_v10  ;;  %v1778_v10 = vld [vmem:[#allocation19 + $0x1e8] sm:$0xff] }
 0x54a   :  { %1756 = vadd.xlane.f32.xlu1 %v1753_v16  ;;  %v1536_v16 = vld [vmem:[#allocation19 + $0x120] sm:$0xff] }
 0x563   :  { %v1978_v20 = vpop.f32.mrb[28].mxu0 }
 0x564   :  { %v3906_v21 = vadd.f32 %v2276_v19, %v1978_v20  ;;  %v2788_v22 = vpop.f32.mrb[29].mxu0  ;;  %v1539_v20 = vld [vmem:[#allocation19 + $0x138] sm:$0xff] }
 0x565   :  { %v1981_v24 = vpop.f32.mrb[30].mxu0 }
 0x566   :  { %v3910_v25 = vadd.f32 %v2276_v19, %v1981_v24  ;;  %v2789_v26 = vpop.f32.mrb[31].mxu0  ;;  %v1985_v27 = vmul.f32 %v3906_v21, %v3906_v21  ;;  %v1538_v19 = vld [vmem:[#allocation19 + $0x130] sm:$0xff]  ;;  %v1540_v24 = vld [vmem:[#allocation19 + $0x140] sm:$0xff] }
 0x567   :  { %v2933_v22 = vpack.c.bf16 %v1539_v20, %v1538_v19  ;;  %v1541_v26 = vld [vmem:[#allocation19 + $0x148] sm:$0xff] }
 0x568   :  { %1987 = vadd.xlane.f32.xlu0 %v1985_v27  ;;  %v1986_v28 = vmul.f32 %v3910_v25, %v3910_v25  ;;  %v1542_v27 = vld [vmem:[#allocation19 + $0x150] sm:$0xff]  ;;  %v1999_v19 = vld [vmem:[#allocation19 + $0x208] sm:$0xff] }
 0x56a   :  { %1989 = vadd.xlane.f32.xlu1 %v1986_v28  ;;  %v1543_v28 = vld [vmem:[#allocation19 + $0x158] sm:$0xff] }
 0x56c   :  { %508 = vmax.xlane.f32.xlu0 %v3918_v52 }
 0x56e   :  { %510 = vmax.xlane.f32.xlu1 %v3922_v29 }
 0x575   :  { %v1057_v30 = vpop.xlane.xlu1 %1056 }
 0x576   :  { %v1060_v31 = vmax.f32 %v1057_v30, 1e-24 }
 0x578   :  { %3156 = vrsqrt.f32 %v1060_v31 }
 0x579   :  { %v1059_v32 = vpop.xlane.xlu1 %1058 }
 0x57a   :  { %v1061_v33 = vmax.f32 %v1059_v32, 1e-24 }
 0x57c   :  { %3158 = vrsqrt.f32 %v1061_v33  ;;  %v2941_v33 = vpack.c.bf16 %v1543_v28, %v1542_v27  ;;  %v2001_v27 = vld [vmem:[#allocation19 + $0x218] sm:$0xff] }
 0x582   :  { %v3157_v34 = vpop.eup %3156 }
 0x583   :  { %v3926_v35 = vmul.f32 %v3157_v34, %v3873_v15  ;;  %v2901_v15 = vpack.c.bf16 %v1306_v43, %v1305_v42  ;;  %v1766_v42 = vld [vmem:[#allocation19 + $0x188] sm:$0xff] }
 0x585   :  { %2602 = vmatprep.mubr.f32.mxu1 %v3926_v35 }
 0x586   :  { %v3159_v37 = vpop.eup %3158 }
 0x587   :  { %v3930_v1 = vmul.f32 %v3159_v37, %v3875_v18  ;;  %v1309_v18 = vld [vmem:[#allocation19 + $0xd0] sm:$0xff]  ;;  %v2945_v37 = vpack.c.bf16 %v1545_v3, %v1544_v36  ;;  %v2006_v3 = vld [vmem:[#allocation19 + $0x240] sm:$0xff] }
 0x588   :  { %v2909_v53 = vpack.c.bf16 %v1310_v47, %v1309_v18  ;;  %v1768_v18 = vld [vmem:[#allocation19 + $0x198] sm:$0xff] }
 0x589   :  { %2603 = vmatmul.mubr.f32.vlgmr.msra.gmra.mrb[12].mxu1 %v3930_v1 }
 0x58a   :  { %2892 = vmatpush3.bf16.msra.mxu1 %v2889_v57  ;;  %v1312_v57 = vld [vmem:[#allocation19 + $0xe8] sm:$0xff] }
 0x58b   :  { %2894 = vmatprep.subr.bf16.mxu1 %v2893_v38  ;;  %v2913_v58 = vpack.c.bf16 %v1312_v57, %v1311_v56  ;;  %v1773_v57 = vld [vmem:[#allocation19 + $0x1c0] sm:$0xff] }
 0x58e   :  { %2896 = vmatpush3.bf16.msra.mxu1 %v2893_v38  ;;  %v1546_v38 = vld [vmem:[#allocation19 + $0x170] sm:$0xff] }
 0x58f   :  { %2898 = vmatprep.subr.bf16.mxu1 %v2897_v41  ;;  %v2949_v40 = vpack.c.bf16 %v1547_v39, %v1546_v38  ;;  %v2008_v38 = vld [vmem:[#allocation19 + $0x250] sm:$0xff]  ;;  %v2009_v39 = vld [vmem:[#allocation19 + $0x258] sm:$0xff] }
 0x592   :  { %2900 = vmatpush3.bf16.msra.mxu1 %v2897_v41  ;;  %v1765_v41 = vld [vmem:[#allocation19 + $0x180] sm:$0xff] }
 0x593   :  { %2902 = vmatprep.subr.bf16.mxu1 %v2901_v15  ;;  %v2953_v44 = vpack.c.bf16 %v1766_v42, %v1765_v41 }
 0x595   :  { %v1289_v49 = vpop.xlane.xlu0 %1288 }
 0x596   :  { %v1292_v50 = vmax.f32 %v1289_v49, 1e-24  ;;  %2904 = vmatpush3.bf16.msra.mxu1 %v2901_v15 }
 0x597   :  { %v1291_v51 = vpop.xlane.xlu1 %1290  ;;  %2906 = vmatprep.subr.bf16.mxu1 %v2905_v46 }
 0x598   :  { %3160 = vrsqrt.f32 %v1292_v50  ;;  %v1293_v55 = vmax.f32 %v1291_v51, 1e-24  ;;  %v1769_v50 = vld [vmem:[#allocation19 + $0x1a0] sm:$0xff]  ;;  %v1770_v51 = vld [vmem:[#allocation19 + $0x1a8] sm:$0xff] }
 0x59a   :  { %3162 = vrsqrt.f32 %v1293_v55  ;;  %2908 = vmatpush3.bf16.msra.mxu1 %v2905_v46  ;;  %v1767_v46 = vld [vmem:[#allocation19 + $0x190] sm:$0xff]  ;;  %v1772_v55 = vld [vmem:[#allocation19 + $0x1b8] sm:$0xff] }
 0x59b   :  { %2910 = vmatprep.subr.bf16.mxu1 %v2909_v53  ;;  %v2957_v49 = vpack.c.bf16 %v1768_v18, %v1767_v46  ;;  %v2011_v46 = vld [vmem:[#allocation19 + $0x268] sm:$0xff] }
 0x59e   :  { %2912 = vmatpush3.bf16.msra.mxu1 %v2909_v53  ;;  %v1771_v53 = vld [vmem:[#allocation19 + $0x1b0] sm:$0xff] }
 0x59f   :  { %2914 = vmatprep.subr.bf16.mxu1 %v2913_v58  ;;  %v2965_v56 = vpack.c.bf16 %v1772_v55, %v1771_v53  ;;  %v2013_v53 = vld [vmem:[#allocation19 + $0x278] sm:$0xff] }
 0x5a2   :  { %v3161_v5 = vpop.eup %3160  ;;  %2916 = vmatpush3.bf16.msra.mxu1 %v2913_v58  ;;  %v1774_v58 = vld [vmem:[#allocation19 + $0x1c8] sm:$0xff] }
 0x5a3   :  { %2918 = vmatprep.subr.bf16.mxu1 %v2917_v62  ;;  %v3934_v6 = vmul.f32 %v3161_v5, %v3881_v48  ;;  %v2929_v48 = vpack.c.bf16 %v1537_v17, %v1536_v16  ;;  %v2973_v5 = vpack.c.bf16 %v1776_v60, %v1775_v59  ;;  %v1780_v16 = vld [vmem:[#allocation19 + $0x1f8] sm:$0xff] }
 0x5a4   :  { %v3163_v8 = vpop.eup %3162 }
 0x5a5   :  { %2657 = vmatprep.mubr.f32.mxu1 %v3934_v6  ;;  %v3938_v13 = vmul.f32 %v3163_v8, %v3883_v54  ;;  %v2937_v54 = vpack.c.bf16 %v1541_v26, %v1540_v24  ;;  %v1777_v8 = vld [vmem:[#allocation19 + $0x1e0] sm:$0xff] }
 0x5a6   :  { %2920 = vmatpush3.bf16.msra.mxu1 %v2917_v62  ;;  %v2977_v11 = vpack.c.bf16 %v1778_v10, %v1777_v8 }
 0x5a7   :  { %2922 = vmatprep.subr.bf16.mxu1 %v2921_v7 }
 0x5a9   :  { %2658 = vmatmul.mubr.f32.vlgmr.msra.gmra.mrb[14].mxu1 %v3938_v13 }
 0x5aa   :  { %2924 = vmatpush3.bf16.msra.mxu1 %v2921_v7 }
 0x5ab   :  { %2926 = vmatprep.subr.bf16.mxu1 %v2925_v14 }
 0x5ae   :  { %2928 = vmatpush3.bf16.msra.mxu1 %v2925_v14  ;;  %v1779_v14 = vld [vmem:[#allocation19 + $0x1f0] sm:$0xff] }
 0x5af   :  { %2930 = vmatprep.subr.bf16.mxu1 %v2929_v48  ;;  %v2981_v17 = vpack.c.bf16 %v1780_v16, %v1779_v14 }
 0x5b2   :  { %2932 = vmatpush3.bf16.msra.mxu1 %v2929_v48  ;;  %v1998_v48 = vld [vmem:[#allocation19 + $0x200] sm:$0xff] }
 0x5b3   :  { %2934 = vmatprep.subr.bf16.mxu1 %v2933_v22  ;;  %v2985_v24 = vpack.c.bf16 %v1999_v19, %v1998_v48 }
 0x5b5   :  { %v1522_v30 = vpop.xlane.xlu0 %1521 }
 0x5b6   :  { %v1525_v31 = vmax.f32 %v1522_v30, 1e-24  ;;  %2936 = vmatpush3.bf16.msra.mxu1 %v2933_v22 }
 0x5b7   :  { %v1524_v32 = vpop.xlane.xlu1 %1523  ;;  %2938 = vmatprep.subr.bf16.mxu1 %v2937_v54 }
 0x5b8   :  { %3164 = vrsqrt.f32 %v1525_v31  ;;  %v1526_v34 = vmax.f32 %v1524_v32, 1e-24  ;;  %v2002_v31 = vld [vmem:[#allocation19 + $0x220] sm:$0xff]  ;;  %v2003_v32 = vld [vmem:[#allocation19 + $0x228] sm:$0xff] }
 0x5ba   :  { %3166 = vrsqrt.f32 %v1526_v34  ;;  %2940 = vmatpush3.bf16.msra.mxu1 %v2937_v54  ;;  %v2000_v54 = vld [vmem:[#allocation19 + $0x210] sm:$0xff]  ;;  %v2005_v34 = vld [vmem:[#allocation19 + $0x238] sm:$0xff] }
 0x5bb   :  { %2942 = vmatprep.subr.bf16.mxu1 %v2941_v33  ;;  %v2989_v30 = vpack.c.bf16 %v2001_v27, %v2000_v54 }
 0x5be   :  { %2944 = vmatpush3.bf16.msra.mxu1 %v2941_v33  ;;  %v2004_v33 = vld [vmem:[#allocation19 + $0x230] sm:$0xff] }
 0x5bf   :  { %2946 = vmatprep.subr.bf16.mxu1 %v2945_v37  ;;  %v2997_v36 = vpack.c.bf16 %v2005_v34, %v2004_v33 }
 0x5c2   :  { %v3165_v43 = vpop.eup %3164  ;;  %2948 = vmatpush3.bf16.msra.mxu1 %v2945_v37  ;;  %v2007_v37 = vld [vmem:[#allocation19 + $0x248] sm:$0xff] }
 0x5c3   :  { %2950 = vmatprep.subr.bf16.mxu1 %v2949_v40  ;;  %v3942_v15 = vmul.f32 %v3165_v43, %v3889_v61  ;;  %v2961_v61 = vpack.c.bf16 %v1770_v51, %v1769_v50  ;;  %v3005_v43 = vpack.c.bf16 %v2009_v39, %v2008_v38 }
 0x5c4   :  { %v3167_v45 = vpop.eup %3166 }
 0x5c5   :  { %2712 = vmatprep.mubr.f32.mxu1 %v3942_v15  ;;  %v3946_v47 = vmul.f32 %v3167_v45, %v3891_v2  ;;  %v2969_v2 = vpack.c.bf16 %v1774_v58, %v1773_v57  ;;  %v2010_v45 = vld [vmem:[#allocation19 + $0x260] sm:$0xff] }
 0x5c6   :  { %2952 = vmatpush3.bf16.msra.mxu1 %v2949_v40  ;;  %v3009_v51 = vpack.c.bf16 %v2011_v46, %v2010_v45 }
 0x5c7   :  { %2954 = vmatprep.subr.bf16.mxu1 %v2953_v44 }
 0x5c9   :  { %2713 = vmatmul.mubr.f32.vlgmr.msra.gmra.mrb[16].mxu1 %v3946_v47 }
 0x5ca   :  { %2956 = vmatpush3.bf16.msra.mxu1 %v2953_v44 }
 0x5cb   :  { %2958 = vmatprep.subr.bf16.mxu1 %v2957_v49 }
 0x5ce   :  { %2960 = vmatpush3.bf16.msra.mxu1 %v2957_v49 }
 0x5cf   :  { %2962 = vmatprep.subr.bf16.mxu1 %v2961_v61 }
 0x5d2   :  { %2964 = vmatpush3.bf16.msra.mxu1 %v2961_v61  ;;  %v2012_v61 = vld [vmem:[#allocation19 + $0x270] sm:$0xff] }
 0x5d3   :  { %2966 = vmatprep.subr.bf16.mxu1 %v2965_v56 }
 0x5d5   :  { %v1755_v62 = vpop.xlane.xlu0 %1754 }
 0x5d6   :  { %v1758_v63 = vmax.f32 %v1755_v62, 1e-24  ;;  %2968 = vmatpush3.bf16.msra.mxu1 %v2965_v56  ;;  %v3013_v56 = vpack.c.bf16 %v2013_v53, %v2012_v61 }
 0x5d7   :  { %v1757_v4 = vpop.xlane.xlu1 %1756  ;;  %2970 = vmatprep.subr.bf16.mxu1 %v2969_v2 }
 0x5d8   :  { %3168 = vrsqrt.f32 %v1758_v63  ;;  %v1759_v7 = vmax.f32 %v1757_v4, 1e-24 }
 0x5da   :  { %3170 = vrsqrt.f32 %v1759_v7  ;;  %2972 = vmatpush3.bf16.msra.mxu1 %v2969_v2 }
 0x5db   :  { %2974 = vmatprep.subr.bf16.mxu1 %v2973_v5 }
 0x5de   :  { %2976 = vmatpush3.bf16.msra.mxu1 %v2973_v5 }
 0x5df   :  { %2978 = vmatprep.subr.bf16.mxu1 %v2977_v11 }
 0x5e2   :  { %v3169_v20 = vpop.eup %3168  ;;  %2980 = vmatpush3.bf16.msra.mxu1 %v2977_v11 }
 0x5e3   :  { %2982 = vmatprep.subr.bf16.mxu1 %v2981_v17  ;;  %v3950_v22 = vmul.f32 %v3169_v20, %v3897_v9  ;;  %v2993_v9 = vpack.c.bf16 %v2003_v32, %v2002_v31 }
 0x5e4   :  { %v3171_v26 = vpop.eup %3170 }
 0x5e5   :  { %2767 = vmatprep.mubr.f32.mxu1 %v3950_v22  ;;  %v3954_v28 = vmul.f32 %v3171_v26, %v3899_v12  ;;  %v3001_v12 = vpack.c.bf16 %v2007_v37, %v2006_v3 }
 0x5e6   :  { %2984 = vmatpush3.bf16.msra.mxu1 %v2981_v17 }
 0x5e7   :  { %2986 = vmatprep.subr.bf16.mxu1 %v2985_v24 }
 0x5e9   :  { %2768 = vmatmul.mubr.f32.vlgmr.msra.gmra.mrb[18].mxu1 %v3954_v28 }
 0x5ea   :  { %2988 = vmatpush3.bf16.msra.mxu1 %v2985_v24 }
 0x5eb   :  { %2990 = vmatprep.subr.bf16.mxu1 %v2989_v30 }
 0x5ee   :  { %2992 = vmatpush3.bf16.msra.mxu1 %v2989_v30 }
 0x5ef   :  { %2994 = vmatprep.subr.bf16.mxu1 %v2993_v9 }
 0x5f2   :  { %2996 = vmatpush3.bf16.msra.mxu1 %v2993_v9 }
 0x5f3   :  { %2998 = vmatprep.subr.bf16.mxu1 %v2997_v36 }
 0x5f5   :  { %v1988_v40 = vpop.xlane.xlu0 %1987 }
 0x5f6   :  { %v1991_v41 = vmax.f32 %v1988_v40, 1e-24  ;;  %3000 = vmatpush3.bf16.msra.mxu1 %v2997_v36 }
 0x5f7   :  { %v1990_v42 = vpop.xlane.xlu1 %1989  ;;  %3002 = vmatprep.subr.bf16.mxu1 %v3001_v12 }
 0x5f8   :  { %3172 = vrsqrt.f32 %v1991_v41  ;;  %v1992_v44 = vmax.f32 %v1990_v42, 1e-24 }
 0x5f9   :  { %v509_v18 = vpop.xlane.xlu0 %508 }
 0x5fa   :  { %3174 = vrsqrt.f32 %v1992_v44  ;;  %vm512_vm3 = vcmp.eq.f32.partialorder %v3918_v52, %v509_v18  ;;  %3004 = vmatpush3.bf16.msra.mxu1 %v3001_v12 }
 0x5fb   :  { %v511_v49 = vpop.xlane.xlu1 %510  ;;  %v514_v50 = vsel %vm512_vm3, %v3908_v23, 128.0  ;;  %3006 = vmatprep.subr.bf16.mxu1 %v3005_v43 }
 0x5fc   :  { %vm513_vm4 = vcmp.eq.f32.partialorder %v3922_v29, %v511_v49  ;;  %516 = vmin.xlane.f32.xlu0 %v514_v50 }
 0x5fd   :  { %v515_v55 = vsel %vm513_vm4, %v3908_v23, 128.0 }
 0x5fe   :  { %3008 = vmatpush3.bf16.msra.mxu1 %v3005_v43  ;;  %518 = vmin.xlane.f32.xlu1 %v515_v55 }
 0x5ff   :  { %3010 = vmatprep.subr.bf16.mxu1 %v3009_v51 }
 0x602   :  { %v3173_v57 = vpop.eup %3172  ;;  %3012 = vmatpush3.bf16.msra.mxu1 %v3009_v51 }
 0x603   :  { %3014 = vmatprep.subr.bf16.mxu1 %v3013_v56  ;;  %v3962_v52 = vmul.f32 %v3173_v57, %v3906_v21 }
 0x604   :  { %v3175_v58 = vpop.eup %3174 }
 0x605   :  { %2822 = vmatprep.mubr.f32.mxu1 %v3962_v52  ;;  %v3966_v29 = vmul.f32 %v3175_v58, %v3910_v25 }
 0x606   :  { %3016 = vmatpush3.bf16.msra.mxu1 %v3013_v56 }
 0x609   :  { %2823 = vmatmul.mubr.f32.vlgmr.msra.gmra.mrb[20].mxu1 %v3966_v29 }
 0x65c   :  { %v2604_v23 = vpop.f32.mrb[12].mxu1 }
 0x65d   :  { %v1148_v2 = vpop.f32.mrb[13].mxu1 }
 0x65e   :  { %3429 = shalt.err (!%p3426_p8)
}
 0x65f   :  { %s3430_s29 = scalar_lea.hbm %s4072_s12, 256 }
 0x660   :  { %p3431_p9 = scmp.ne.s32.totalorder %s4072_s12, %s3430_s29  ;;  %p3434_p10 = scmp.lt.u32.totalorder %s3430_s29, %s4072_s12 }
 0x662   :  { %p3436_p11 = pnand %p3434_p10, %p3431_p9 }
 0x664   :  { %3439 = shalt.err (!%p3436_p11)
}
 0x665   :  { %2130 = dma.vmem_to_hbm [thread:$0]  %s2125_s26, 256, %s4072_s12, [#allocation22], %s3529_s3, %s3529_s3, %s3530_s16  }
 0x666   :  { %s3440_s18 = scalar_lea.vmem %s3969_s1, 256  ;;  %p3445_p13 = scmp.lt.s32.totalorder %s3969_s1, %s3969_s1 }
 0x667   :  { %p3441_p12 = scmp.ne.s32.totalorder %s3969_s1, %s3440_s18  ;;  %p3446_p0 = scmp.lt.s32.totalorder %s3440_s18, %s3440_s18 }
 0x669   :  { %p3447_p1 = por %p3446_p0, %p3445_p13 }
 0x66b   :  { %p3448_p2 = pnand %p3447_p1, %p3441_p12 }
 0x66d   :  { %3451 = shalt.err (!%p3448_p2)
}
 0x66e   :  { %s3452_s7 = scalar_lea.hbm %s4071_s11, 256 }
 0x66f   :  { %p3453_p3 = scmp.ne.s32.totalorder %s4071_s11, %s3452_s7  ;;  %p3456_p4 = scmp.lt.u32.totalorder %s3452_s7, %s4071_s11 }
 0x671   :  { %p3458_p5 = pnand %p3456_p4, %p3453_p3 }
 0x673   :  { %3461 = shalt.err (!%p3458_p5)
}
 0x674   :  { %2118 = dma.vmem_to_hbm [thread:$0]  %s3969_s1, 256, %s4071_s11, [#allocation4], %s3529_s3, %s3529_s3, %s3530_s16  }
 0x675   :  { %s3548_s11 = smov [#allocation24]  }
 0x676   :  { %s2148_s8 = sshll.u32 %s3548_s11, 4  ;;  %s2149_s8 = int_to_ptr.vmem [resolvable:$true] %s2148_s8 }
 0x677   :  { %s3462_s25 = scalar_lea.vmem %s2149_s8, 256  ;;  %p3467_p7 = scmp.lt.s32.totalorder %s2149_s8, %s2149_s8 }
 0x678   :  { %p3463_p6 = scmp.ne.s32.totalorder %s2149_s8, %s3462_s25  ;;  %p3468_p8 = scmp.lt.s32.totalorder %s3462_s25, %s3462_s25 }
 0x67a   :  { %p3469_p9 = por %p3468_p8, %p3467_p7 }
 0x67c   :  { %v2659_v21 = vpop.f32.mrb[14].mxu1  ;;  %p3470_p10 = pnand %p3469_p9, %p3463_p6 }
 0x67d   :  { %v1381_v25 = vpop.f32.mrb[15].mxu1 }
 0x689   :  { %v517_v59 = vpop.xlane.xlu0 %516 }
 0x68a   :  { %vm1157_vm5 = vcmp.eq.f32.partialorder %v517_v59, 0.0  ;;  %vm1390_vm6 = vcmp.eq.f32.partialorder %v517_v59, 1.0  ;;  %vm1623_vm7 = vcmp.eq.f32.partialorder %v517_v59, 2.0  ;;  %vm1856_vm8 = vcmp.eq.f32.partialorder %v517_v59, 3.0 }
 0x68b   :  { %v2241_v60 = vsel %vm1157_vm5, 1.0, %v3543_v0  ;;  %v2252_v62 = vsel %vm1390_vm6, 1.0, %v3543_v0  ;;  %v519_v63 = vpop.xlane.xlu1 %518  ;;  %v2263_v4 = vsel %vm1623_vm7, 1.0, %v3543_v0  ;;  %v4010_v5 = vsel %vm1856_vm8, 1.0, %v3543_v0 }
 0x68c   :  { %v1167_v7 = vmul.f32 %v2241_v60, %v3926_v35  ;;  %v1400_v8 = vmul.f32 %v2252_v62, %v3934_v6  ;;  %vm1158_vm9 = vcmp.eq.f32.partialorder %v519_v63, 0.0  ;;  %vm1391_vm10 = vcmp.eq.f32.partialorder %v519_v63, 1.0 }
 0x68d   :  { %v2242_v10 = vsel %vm1158_vm9, 1.0, %v3543_v0  ;;  %v2253_v11 = vsel %vm1391_vm10, 1.0, %v3543_v0  ;;  %vm1624_vm11 = vcmp.eq.f32.partialorder %v519_v63, 2.0  ;;  %v1163_v14 = vmul.f32 %v2241_v60, %v1148_v2 }
 0x68e   :  { %v1168_v16 = vmul.f32 %v2242_v10, %v3930_v1  ;;  %v1401_v17 = vmul.f32 %v2253_v11, %v3938_v13  ;;  %v1164_v48 = vmul.f32 %v2604_v23, %v2242_v10  ;;  %v1397_v19 = vmul.f32 %v2659_v21, %v2253_v11 }
 0x68f   :  { %v2264_v20 = vsel %vm1624_vm11, 1.0, %v3543_v0  ;;  %v1396_v24 = vmul.f32 %v2252_v62, %v1381_v25  ;;  %v1402_v35 = vadd.f32 %v1400_v8, %v1167_v7  ;;  %v1633_v6 = vmul.f32 %v2263_v4, %v3942_v15 }
 0x690   :  { %v1399_v26 = vadd.f32 %v1397_v19, %v1164_v48  ;;  %v1403_v54 = vadd.f32 %v1401_v17, %v1168_v16  ;;  %v1634_v27 = vmul.f32 %v2264_v20, %v3946_v47  ;;  %vm1857_vm12 = vcmp.eq.f32.partialorder %v519_v63, 3.0 }
 0x691   :  { %v1398_v30 = vadd.f32 %v1396_v24, %v1163_v14  ;;  %v1635_v31 = vadd.f32 %v1633_v6, %v1402_v35  ;;  %v2275_v32 = vsel %vm1857_vm12, 1.0, %v3543_v0  ;;  %v1866_v1 = vmul.f32 %v4010_v5, %v3950_v22 }
 0x692   :  { %v1636_v13 = vadd.f32 %v1634_v27, %v1403_v54  ;;  %v1867_v9 = vmul.f32 %v2275_v32, %v3954_v28  ;;  %vm2090_vm13 = vcmp.eq.f32.partialorder %v519_v63, 4.0  ;;  %vm2089_vm14 = vcmp.eq.f32.partialorder %v517_v59, 4.0 }
 0x693   :  { %v1868_v33 = vadd.f32 %v1866_v1, %v1635_v31  ;;  %v2286_v15 = vsel %vm2090_vm13, 1.0, %v3543_v0  ;;  %v2285_v34 = vsel %vm2089_vm14, 1.0, %v3543_v0 }
 0x694   :  { %v1869_v47 = vadd.f32 %v1867_v9, %v1636_v13  ;;  %v2100_v36 = vmul.f32 %v2286_v15, %v3966_v29  ;;  %v2099_v3 = vmul.f32 %v2285_v34, %v3962_v52 }
 0x696   :  { %v2102_v37 = vadd.f32 %v2100_v36, %v1869_v47  ;;  %v2101_v12 = vadd.f32 %v2099_v3, %v1868_v33 }
 0x698   :  { %2106 = vst [vmem:[#allocation24 + $0x8] sm:$0xff] %v2102_v37  ;;  %2105 = vst [vmem:[#allocation24] sm:$0xff] %v2101_v12 }
 0x699   :  { %3473 = shalt.err (!%p3470_p10)
}
 0x69a   :  { %s3474_s21 = scalar_lea.hbm %s4074_s14, 256 }
 0x69b   :  { %p3475_p11 = scmp.ne.s32.totalorder %s4074_s14, %s3474_s21  ;;  %p3478_p12 = scmp.lt.u32.totalorder %s3474_s21, %s4074_s14 }
 0x69d   :  { %p3480_p13 = pnand %p3478_p12, %p3475_p11 }
 0x69f   :  { %3483 = shalt.err (!%p3480_p13)
}
 0x6a0   :  { %2154 = dma.vmem_to_hbm [thread:$0]  %s2149_s8, 256, %s4074_s14, [#allocation25], %s3529_s3, %s3529_s3, %s3530_s16   ;;  %v2714_v0 = vpop.f32.mrb[16].mxu1 }
 0x6a1   :  { %v1630_v22 = vmul.f32 %v2714_v0, %v2264_v20  ;;  %v1614_v28 = vpop.f32.mrb[17].mxu1  ;;  %s3549_s17 = smov [#allocation23]  }
 0x6a2   :  { %v1629_v38 = vmul.f32 %v2263_v4, %v1614_v28  ;;  %s2136_s0 = sshll.u32 %s3549_s17, 4  ;;  %s2137_s0 = int_to_ptr.vmem [resolvable:$true] %s2136_s0 }
 0x6a3   :  { %v1632_v39 = vadd.f32 %v1630_v22, %v1399_v26  ;;  %s3484_s14 = scalar_lea.vmem %s2137_s0, 256  ;;  %p3489_p1 = scmp.lt.s32.totalorder %s2137_s0, %s2137_s0 }
 0x6a4   :  { %v1631_v40 = vadd.f32 %v1629_v38, %v1398_v30  ;;  %p3485_p0 = scmp.ne.s32.totalorder %s2137_s0, %s3484_s14  ;;  %p3490_p2 = scmp.lt.s32.totalorder %s3484_s14, %s3484_s14 }
 0x6a6   :  { %p3491_p3 = por %p3490_p2, %p3489_p1 }
 0x6a8   :  { %p3492_p4 = pnand %p3491_p3, %p3485_p0 }
 0x6bc   :  { %v2769_v41 = vpop.f32.mrb[18].mxu1 }
 0x6bd   :  { %v1863_v42 = vmul.f32 %v2769_v41, %v2275_v32  ;;  %v1847_v43 = vpop.f32.mrb[19].mxu1 }
 0x6be   :  { %v1862_v44 = vmul.f32 %v4010_v5, %v1847_v43 }
 0x6bf   :  { %v1865_v45 = vadd.f32 %v1863_v42, %v1632_v39 }
 0x6c0   :  { %v1864_v46 = vadd.f32 %v1862_v44, %v1631_v40 }
 0x6dc   :  { %v2824_v18 = vpop.f32.mrb[20].mxu1 }
 0x6dd   :  { %v2096_v49 = vmul.f32 %v2824_v18, %v2286_v15  ;;  %v2080_v50 = vpop.f32.mrb[21].mxu1 }
 0x6de   :  { %v2095_v51 = vmul.f32 %v2285_v34, %v2080_v50 }
 0x6df   :  { %v2098_v61 = vadd.f32 %v2096_v49, %v1865_v45 }
 0x6e0   :  { %v2097_v53 = vadd.f32 %v2095_v51, %v1864_v46 }
 0x6e1   :  { %2104 = vst [vmem:[#allocation23 + $0x8] sm:$0xff] %v2098_v61 }
 0x6e2   :  { %2103 = vst [vmem:[#allocation23] sm:$0xff] %v2097_v53 }
 0x6e3   :  { %3495 = shalt.err (!%p3492_p4)
}
 0x6e4   :  { %s3496_s9 = scalar_lea.hbm %s4073_s13, 256 }
 0x6e5   :  { %p3497_p5 = scmp.ne.s32.totalorder %s4073_s13, %s3496_s9  ;;  %p3500_p6 = scmp.lt.u32.totalorder %s3496_s9, %s4073_s13 }
 0x6e7   :  { %p3502_p7 = pnand %p3500_p6, %p3497_p5 }
 0x6e9   :  { %3505 = shalt.err (!%p3502_p7)
}
 0x6ea   :  { %2142 = dma.vmem_to_hbm [thread:$0]  %s2137_s0, 256, %s4073_s13, [#allocation22], %s3529_s3, %s3529_s3, %s3530_s16  }
 0x6eb   :  { %3518 = dma.done.wait [#allocation4], 256  }
 0x6ec   :  { %3519 = vsyncadd [#allocation4], 4294967040 }
 0x6ed   :  { %3520 = dma.done.wait [#allocation22], 512  }
 0x6ee   :  { %3521 = vsyncadd [#allocation22], 4294966784 }
 0x6ef   :  { %3522 = dma.done.wait [#allocation25], 256  }
 0x6f0   :  { %3523 = vsyncadd [#allocation25], 4294967040 }
 0x6f1   :  { %2167 = vsyncpa [#allocation3], 1 }
 0x6f2   :  { %2168 = vsyncpa [#allocation6], 1 }
 0x6f3   :  { %2169 = vsyncpa [#allocation9], 1 }
 0x6f4   :  { %2170 = vsyncpa [#allocation12], 1 }
 0x6f5   :  { %2171 = vsyncpa [#allocation15], 1 }
 0x6f6   :  { %2172 = vsyncpa [#allocation18], 1 }
 0x6f7   :  { %2173 = vsyncpa [#allocation4], 1 }
 0x6f8   :  { %2174 = vsyncpa [#allocation22], 1 }
 0x6f9   :  { %2175 = vsyncpa [#allocation25], 1 }

</bundles_post_ra>
